<compile_context>
chip_gen: v7x
topology: tpu7x:2x2x1
jax: 0.10.0
libtpu: 0.0.40
codegen_flags: <defaults>
</compile_context>

<pallas_src>
import functools
import math

import jax
import jax.numpy as jnp
from jax.experimental import pallas as pl
from jax.experimental.pallas import tpu as pltpu

TOTAL_BONES = 55
OUT_CH_PAD = 64            # final matmul M padded to 64, sliced back to 55 before store
INPUT_CH = 63              # 3 + 3 * 2 * 10 (NeRF xyz embedder, 10 freqs + identity)
INPUT_CH_PAD = 64          # 63 channels + one constant-1.0 bias channel
HIDDEN = 128
NUM_FREQS = 10

# Kernel channel order: [x, y, z,
#                        sin(2^0 x), sin(2^0 y), sin(2^0 z), sin(2^1 x), ... sin(2^9 z),
#                        cos(2^0 x), ...,                                 cos(2^9 z),
#                        1.0 (bias channel)]
# Canonical (checkpoint / reference) order: [xyz, sin(f0)(3), cos(f0)(3), sin(f1)(3), ...]
# _KERNEL_CHANNEL_PERM[k] = canonical channel feeding kernel channel k (k < 63).
_KERNEL_CHANNEL_PERM = tuple(
    list(range(3))
    + [3 + 6 * f + c for f in range(NUM_FREQS) for c in range(3)]        # sin rows
    + [3 + 6 * f + 3 + c for f in range(NUM_FREQS) for c in range(3)]    # cos rows
)


# ---------------------------------------------------------------------------
# Canonical NeRF xyz embedder (defines the parameter/channel convention; used
# only by the pure-JAX reference).
# ---------------------------------------------------------------------------
def xyz_embedder(pts):
    """pts: (..., 3) -> (..., 63). Order: [xyz, sin(f0 xyz), cos(f0 xyz), sin(f1 xyz), ...]."""
    freqs = 2.0 ** jnp.arange(NUM_FREQS, dtype=pts.dtype)          # (10,)
    xb = pts[..., None, :] * freqs[:, None]                        # (..., 10, 3)
    sc = jnp.stack([jnp.sin(xb), jnp.cos(xb)], axis=-2)            # (..., 10, 2, 3)
    sc = sc.reshape(*pts.shape[:-1], 2 * 3 * NUM_FREQS)            # (..., 60)
    return jnp.concatenate([pts, sc], axis=-1)                     # (..., 63)


# ---------------------------------------------------------------------------
# Shared in-kernel MLP tail.
#   f      : (64, T) bf16 feature block, row 63 == 1.0 (bias channel)
#   weights: (Cout, K) bf16, stationary MXU operand; biases (Cout, 1) f32
#   out_ref: (1, 55, T)
# ---------------------------------------------------------------------------
def _mlp_tail(f, w0_ref, w1_ref, b1_ref, w2_ref, b2_ref,
              w3f_ref, w3h_ref, wf_ref, bf_ref, out_ref):
    h = jnp.dot(w0_ref[...], f, preferred_element_type=jnp.float32)        # b0 folded in col 63
    h = jnp.maximum(h, 0.0).astype(jnp.bfloat16)                           # (128, T)

    h = jnp.dot(w1_ref[...], h, preferred_element_type=jnp.float32) + b1_ref[...]
    h = jnp.maximum(h, 0.0).astype(jnp.bfloat16)                           # (128, T)

    h = jnp.dot(w2_ref[...], h, preferred_element_type=jnp.float32) + b2_ref[...]
    h = jnp.maximum(h, 0.0).astype(jnp.bfloat16)                           # (128, T)

    # skip cat([features, net]) folded into two aligned matmuls; b3 folded in w3f col 63.
    h = (jnp.dot(w3f_ref[...], f, preferred_element_type=jnp.float32)
         + jnp.dot(w3h_ref[...], h, preferred_element_type=jnp.float32))
    h = jnp.maximum(h, 0.0).astype(jnp.bfloat16)                           # (128, T)

    out = jnp.dot(wf_ref[...], h, preferred_element_type=jnp.float32) + bf_ref[...]
    out_ref[0] = out[:TOTAL_BONES, :].astype(out_ref.dtype)                # (55, T), lane-dense


def lbs_kernel_fused(pts_ref, w0_ref, w1_ref, b1_ref, w2_ref, b2_ref,
                     w3f_ref, w3h_ref, wf_ref, bf_ref, out_ref):
    """Preferred path: raw (1, 3, T) f32 points in, NeRF features built in VMEM."""
    p = pts_ref[0]                                                         # (3, T) f32
    scaled = jnp.concatenate([p * (2.0 ** i) for i in range(NUM_FREQS)],
                             axis=0)                                       # (30, T) freq-major
    feat = jnp.concatenate(
        [p, jnp.sin(scaled), jnp.cos(scaled), jnp.ones_like(p[:1])],
        axis=0)                                                            # (64, T) f32
    _mlp_tail(feat.astype(jnp.bfloat16),
              w0_ref, w1_ref, b1_ref, w2_ref, b2_ref,
              w3f_ref, w3h_ref, wf_ref, bf_ref, out_ref)


def lbs_kernel_feats(f_ref, w0_ref, w1_ref, b1_ref, w2_ref, b2_ref,
                     w3f_ref, w3h_ref, wf_ref, bf_ref, out_ref):
    """Fallback path: (1, 64, T) bf16 precomputed feature block in."""
    _mlp_tail(f_ref[0],
              w0_ref, w1_ref, b1_ref, w2_ref, b2_ref,
              w3f_ref, w3h_ref, wf_ref, bf_ref, out_ref)


# ---------------------------------------------------------------------------
# Fallback glue: channel-major embedder in one slim XLA pass (no (B,N,63) f32
# materialization, no 63-channel transpose).  Channel order == kernel order.
# ---------------------------------------------------------------------------
def _features_channel_major(pts_t):
    """(B, 3, Np) f32 -> (B, 64, Np) bf16 in kernel channel order."""
    b, _, n = pts_t.shape
    freqs = 2.0 ** jnp.arange(NUM_FREQS, dtype=jnp.float32)
    xb = (pts_t[:, None, :, :] * freqs[None, :, None, None]
          ).reshape(b, 3 * NUM_FREQS, n)                                   # (B, 30, Np)
    feat = jnp.concatenate(
        [pts_t, jnp.sin(xb), jnp.cos(xb), jnp.ones((b, 1, n), jnp.float32)],
        axis=1)                                                            # (B, 64, Np)
    return feat.astype(jnp.bfloat16)


# ---------------------------------------------------------------------------
# Parameter preprocessing: transpose to (Cout, Cin), permute feature columns
# to the kernel channel order, fold b0/b3 into the constant-1 channel, pad
# unaligned dims, cast to bf16.
# ---------------------------------------------------------------------------
def _prep_kernel_params(params):
    (w0, b0), (w1, b1), (w2, b2), (w3, b3), (wf, bf) = params
    perm = jnp.asarray(_KERNEL_CHANNEL_PERM, dtype=jnp.int32)

    def feat_w(w, b):
        # w: (63, Cout) canonical, b: (1, Cout) -> (Cout, 64) bf16, bias in column 63.
        wt = jnp.take(jnp.transpose(w), perm, axis=1)                      # (Cout, 63)
        return jnp.concatenate([wt, jnp.transpose(b)], axis=1).astype(jnp.bfloat16)

    def hid_w(w):
        return jnp.transpose(w).astype(jnp.bfloat16)                       # (Cout, Cin)

    def col_b(b, pad_out=0):
        bt = jnp.transpose(b)                                              # (Cout, 1)
        if pad_out:
            bt = jnp.pad(bt, ((0, pad_out), (0, 0)))
        return bt.astype(jnp.float32)

    opad = OUT_CH_PAD - TOTAL_BONES                                        # 55 -> 64
    return [
        feat_w(w0, b0),                                  # (128, 64)  b0 folded
        hid_w(w1), col_b(b1),                            # (128, 128), (128, 1)
        hid_w(w2), col_b(b2),
        feat_w(w3[:INPUT_CH], b3),                       # skip: features part, b3 folded
        hid_w(w3[INPUT_CH:]),                            # skip: hidden part (128, 128)
        jnp.pad(jnp.transpose(wf), ((0, opad), (0, 0))).astype(jnp.bfloat16),  # (64, 128)
        col_b(bf, pad_out=opad),                         # (64, 1)
    ]


# ---------------------------------------------------------------------------
# Tiling helper
# ---------------------------------------------------------------------------
def _round_up(x, m):
    return ((x + m - 1) // m) * m


def _pick_tile(n_batch, n_points, tile):
    """Lane-aligned point tile; cap for small N and keep >= 2 grid programs so
    both v7x TensorCores get work (v5e/v6e are single-TC, so this only binds there)."""
    tile = max(128, min(_round_up(tile, 128), _round_up(n_points, 128)))
    while tile > 128 and n_batch * ((n_points + tile - 1) // tile) < 2:
        tile = max(128, (tile // 2) // 128 * 128)
    return tile


# ---------------------------------------------------------------------------
# pallas_call wrapper
# ---------------------------------------------------------------------------
@functools.partial(jax.jit, static_argnames=("tile", "out_dtype", "fuse_embedder"))
def _lbs_impl(pts, params, *, tile, out_dtype, fuse_embedder):
    B, N, _ = pts.shape
    tile = _pick_tile(B, N, tile)
    n_blocks = pl.cdiv(N, tile)
    n_pad = n_blocks * tile

    # 12 B/pt of glue: transpose raw points to channel-major, pad the point axis.
    pts_t = jnp.transpose(pts.astype(jnp.float32), (0, 2, 1))              # (B, 3, N)
    pts_t = jnp.pad(pts_t, ((0, 0), (0, 0), (0, n_pad - N)))               # (B, 3, n_pad)

    kparams = _prep_kernel_params(params)

    if fuse_embedder:
        kernel, x = lbs_kernel_fused, pts_t
        x_spec = pl.BlockSpec((1, 3, tile), lambda b, i: (b, 0, i))
    else:
        # TODO(synk): used only if Mosaic cannot lower the fused embedder;
        # still a single slim channel-major XLA pass.
        kernel, x = lbs_kernel_feats, _features_channel_major(pts_t)
        x_spec = pl.BlockSpec((1, INPUT_CH_PAD, tile), lambda b, i: (b, 0, i))

    grid = (B, n_blocks)
    # Weights/biases are tiny: full-array VMEM-resident blocks every step.
    in_specs = [x_spec] + [pl.BlockSpec(p.shape, lambda b, i: (0, 0)) for p in kparams]

    # Output uses the TRUE N: a ragged final block is masked on writeback, so
    # there is no post-kernel out[:, :, :N] slice copy.
    return pl.pallas_call(
        kernel,
        out_shape=jax.ShapeDtypeStruct((B, TOTAL_BONES, N), out_dtype),
        grid=grid,
        in_specs=in_specs,
        out_specs=pl.BlockSpec((1, TOTAL_BONES, tile), lambda b, i: (b, 0, i)),
        compiler_params=pltpu.CompilerParams(
            dimension_semantics=("parallel", "parallel")),
    )(x, *kparams)


@functools.lru_cache(maxsize=None)
def _fused_embedder_supported():
    """One-time probe: can Mosaic lower the fused variant (vector sin/cos +
    sublane concat) and does it match the reference?  Falls back otherwise."""
    try:
        params = init_params(jax.random.PRNGKey(0))
        pts = jax.random.normal(jax.random.PRNGKey(1), (1, 128, 3), jnp.float32)
        out = _lbs_impl(pts, params, tile=128, out_dtype=jnp.float32,
                        fuse_embedder=True)
        out = jax.block_until_ready(out)
        err = float(jnp.max(jnp.abs(out - lbs_ref(pts, params))))
        return bool(err < 5e-2)
    except Exception:
        return False


def lbs_offset_decoder(pts, params, *, tile=2048, out_dtype=jnp.float32):
    """pts: (B, N, 3) -> bone-weight logits (B, total_bones, N), PyTorch layout.

    out_dtype=jnp.bfloat16 halves the output store stream (useful on the
    HBM-bound v6e) if the consumer tolerates it; default float32 matches the
    PyTorch module.
    """
    return _lbs_impl(pts, params, tile=tile, out_dtype=out_dtype,
                     fuse_embedder=_fused_embedder_supported())


# ---------------------------------------------------------------------------
# Deterministic parameter init (Conv1d(k=1) == per-point linear; stored (in, out))
# ---------------------------------------------------------------------------
def init_params(key):
    dims = [
        (INPUT_CH, HIDDEN),            # bw_linears[0]: Conv1d(63, 128, 1)
        (HIDDEN, HIDDEN),              # bw_linears[1]: Conv1d(128, 128, 1)
        (HIDDEN, HIDDEN),              # bw_linears[2]: Conv1d(128, 128, 1)
        (HIDDEN + INPUT_CH, HIDDEN),   # bw_linears[3]: Conv1d(191, 128, 1)  (skip)
        (HIDDEN, TOTAL_BONES),         # bw_fc:         Conv1d(128, 55, 1)
    ]
    params = []
    for din, dout in dims:
        key, kw, kb = jax.random.split(key, 3)
        bound = 1.0 / math.sqrt(din)
        w = jax.random.uniform(kw, (din, dout), jnp.float32, -bound, bound)
        b = jax.random.uniform(kb, (1, dout), jnp.float32, -bound, bound)
        params.append((w, b))
    return params


# ---------------------------------------------------------------------------
# Pure-JAX f32 reference (canonical channel order) for correctness checking
# ---------------------------------------------------------------------------
def lbs_ref(pts, params):
    feats = xyz_embedder(pts.astype(jnp.float32))                  # (B, N, 63)
    net = feats
    for i in range(4):
        w, b = params[i]
        net = jnp.maximum(net @ w + b, 0.0)
        if i == 2:                                                  # skips = [2]
            net = jnp.concatenate([feats, net], axis=-1)
    wf, bf = params[4]
    bw = net @ wf + bf                                              # (B, N, 55)
    return jnp.transpose(bw, (0, 2, 1))                             # (B, 55, N)


if __name__ == "__main__":
    key = jax.random.PRNGKey(0)
    kp, kx = jax.random.split(key)

    params = init_params(kp)
    B, N = 2, 256
    pts = jax.random.normal(kx, (B, N, 3), dtype=jnp.float32)       # (B, N_points, 3)

    bw = lbs_offset_decoder(pts, params)
    bw = jax.block_until_ready(bw)

    ref = lbs_ref(pts, params)
    assert bw.shape == (B, TOTAL_BONES, N), bw.shape
    assert bw.dtype == jnp.float32, bw.dtype
    # bf16 matmuls with f32 accumulation (+ in-kernel transcendentals on the
    # fused path) -> relaxed tolerance vs the f32 reference.
    max_err = float(jnp.max(jnp.abs(bw - ref)))
    assert max_err < 5e-2, f"mismatch vs JAX reference, max abs err {max_err}"

    print("KERNEL_OK")
</pallas_src>

<mosaic_0001>
module attributes {stable_mosaic.version = 11 : i64} {
  func.func @lbs_kernel_fused(%arg0: i32, %arg1: i32, %arg2: memref<1x3x128xf32, #tpu.memory_space<vmem>>, %arg3: memref<128x64xbf16, #tpu.memory_space<vmem>>, %arg4: memref<128x128xbf16, #tpu.memory_space<vmem>>, %arg5: memref<128x1xf32, #tpu.memory_space<vmem>>, %arg6: memref<128x128xbf16, #tpu.memory_space<vmem>>, %arg7: memref<128x1xf32, #tpu.memory_space<vmem>>, %arg8: memref<128x64xbf16, #tpu.memory_space<vmem>>, %arg9: memref<128x128xbf16, #tpu.memory_space<vmem>>, %arg10: memref<64x128xbf16, #tpu.memory_space<vmem>>, %arg11: memref<64x1xf32, #tpu.memory_space<vmem>>, %arg12: memref<1x55x128xf32, #tpu.memory_space<vmem>>) attributes {dimension_semantics = [#tpu.dimension_semantics<parallel>, #tpu.dimension_semantics<parallel>], iteration_bounds = array<i64: 1, 1>, scalar_prefetch = 0 : i64, scratch_operands = 0 : i64, tpu.core_type = #tpu.core_type<tc>, window_params = [{transform_indices = @transform_0, window_bounds = array<i64: 1, 3, 128>}, {pipeline_mode = #tpu.pipeline_mode<synchronous>, transform_indices = @transform_1, window_bounds = array<i64: 128, 64>}, {pipeline_mode = #tpu.pipeline_mode<synchronous>, transform_indices = @transform_2, window_bounds = array<i64: 128, 128>}, {pipeline_mode = #tpu.pipeline_mode<synchronous>, transform_indices = @transform_3, window_bounds = array<i64: 128, 1>}, {pipeline_mode = #tpu.pipeline_mode<synchronous>, transform_indices = @transform_4, window_bounds = array<i64: 128, 128>}, {pipeline_mode = #tpu.pipeline_mode<synchronous>, transform_indices = @transform_5, window_bounds = array<i64: 128, 1>}, {pipeline_mode = #tpu.pipeline_mode<synchronous>, transform_indices = @transform_6, window_bounds = array<i64: 128, 64>}, {pipeline_mode = #tpu.pipeline_mode<synchronous>, transform_indices = @transform_7, window_bounds = array<i64: 128, 128>}, {pipeline_mode = #tpu.pipeline_mode<synchronous>, transform_indices = @transform_8, window_bounds = array<i64: 64, 128>}, {pipeline_mode = #tpu.pipeline_mode<synchronous>, transform_indices = @transform_9, window_bounds = array<i64: 64, 1>}, {transform_indices = @transform_10, window_bounds = array<i64: 1, 55, 128>}]} {
    %c0 = arith.constant 0 : index
    %c0_0 = arith.constant 0 : index
    %c0_1 = arith.constant 0 : index
    %0 = vector.load %arg2[%c0, %c0_0, %c0_1] : memref<1x3x128xf32, #tpu.memory_space<vmem>>, vector<1x3x128xf32>
    %1 = vector.shape_cast %0 : vector<1x3x128xf32> to vector<3x128xf32>
    %cst = arith.constant 1.000000e+00 : f32
    %2 = vector.broadcast %cst : f32 to vector<3x128xf32>
    %3 = arith.mulf %1, %2 : vector<3x128xf32>
    %cst_2 = arith.constant 2.000000e+00 : f32
    %4 = vector.broadcast %cst_2 : f32 to vector<3x128xf32>
    %5 = arith.mulf %1, %4 : vector<3x128xf32>
    %cst_3 = arith.constant 4.000000e+00 : f32
    %6 = vector.broadcast %cst_3 : f32 to vector<3x128xf32>
    %7 = arith.mulf %1, %6 : vector<3x128xf32>
    %cst_4 = arith.constant 8.000000e+00 : f32
    %8 = vector.broadcast %cst_4 : f32 to vector<3x128xf32>
    %9 = arith.mulf %1, %8 : vector<3x128xf32>
    %cst_5 = arith.constant 1.600000e+01 : f32
    %10 = vector.broadcast %cst_5 : f32 to vector<3x128xf32>
    %11 = arith.mulf %1, %10 : vector<3x128xf32>
    %cst_6 = arith.constant 3.200000e+01 : f32
    %12 = vector.broadcast %cst_6 : f32 to vector<3x128xf32>
    %13 = arith.mulf %1, %12 : vector<3x128xf32>
    %cst_7 = arith.constant 6.400000e+01 : f32
    %14 = vector.broadcast %cst_7 : f32 to vector<3x128xf32>
    %15 = arith.mulf %1, %14 : vector<3x128xf32>
    %cst_8 = arith.constant 1.280000e+02 : f32
    %16 = vector.broadcast %cst_8 : f32 to vector<3x128xf32>
    %17 = arith.mulf %1, %16 : vector<3x128xf32>
    %cst_9 = arith.constant 2.560000e+02 : f32
    %18 = vector.broadcast %cst_9 : f32 to vector<3x128xf32>
    %19 = arith.mulf %1, %18 : vector<3x128xf32>
    %cst_10 = arith.constant 5.120000e+02 : f32
    %20 = vector.broadcast %cst_10 : f32 to vector<3x128xf32>
    %21 = arith.mulf %1, %20 : vector<3x128xf32>
    %22 = tpu.concatenate %3, %5, %7, %9, %11, %13, %15, %17, %19, %21 in 0 : vector<3x128xf32>, vector<3x128xf32>, vector<3x128xf32>, vector<3x128xf32>, vector<3x128xf32>, vector<3x128xf32>, vector<3x128xf32>, vector<3x128xf32>, vector<3x128xf32>, vector<3x128xf32> -> vector<30x128xf32>
    %23 = math.sin %22 : vector<30x128xf32>
    %24 = math.cos %22 : vector<30x128xf32>
    %cst_11 = arith.constant 1.000000e+00 : f32
    %25 = vector.broadcast %cst_11 : f32 to vector<1x128xf32>
    %26 = tpu.concatenate %1, %23, %24, %25 in 0 : vector<3x128xf32>, vector<30x128xf32>, vector<30x128xf32>, vector<1x128xf32> -> vector<64x128xf32>
    %27 = arith.truncf %26 : vector<64x128xf32> to vector<64x128xbf16>
    %c0_12 = arith.constant 0 : index
    %c0_13 = arith.constant 0 : index
    %28 = vector.load %arg3[%c0_12, %c0_13] : memref<128x64xbf16, #tpu.memory_space<vmem>>, vector<128x64xbf16>
    %cst_14 = arith.constant dense<0.000000e+00> : vector<128x128xf32>
    %29 = tpu.matmul %28, %27, %cst_14 {dimension_numbers = #tpu.dot_dimension_numbers<[1], [0], [0], [1], [0, 0, 1, 1], [], []>} : vector<128x64xbf16>, vector<64x128xbf16>, vector<128x128xf32> -> vector<128x128xf32>
    %cst_15 = arith.constant 0.000000e+00 : f32
    %30 = vector.broadcast %cst_15 : f32 to vector<128x128xf32>
    %31 = arith.maximumf %29, %30 : vector<128x128xf32>
    %32 = arith.truncf %31 : vector<128x128xf32> to vector<128x128xbf16>
    %c0_16 = arith.constant 0 : index
    %c0_17 = arith.constant 0 : index
    %33 = vector.load %arg4[%c0_16, %c0_17] : memref<128x128xbf16, #tpu.memory_space<vmem>>, vector<128x128xbf16>
    %cst_18 = arith.constant dense<0.000000e+00> : vector<128x128xf32>
    %34 = tpu.matmul %33, %32, %cst_18 {dimension_numbers = #tpu.dot_dimension_numbers<[1], [0], [0], [1], [0, 0, 1, 1], [], []>} : vector<128x128xbf16>, vector<128x128xbf16>, vector<128x128xf32> -> vector<128x128xf32>
    %c0_19 = arith.constant 0 : index
    %c0_20 = arith.constant 0 : index
    %35 = vector.load %arg5[%c0_19, %c0_20] : memref<128x1xf32, #tpu.memory_space<vmem>>, vector<128x1xf32>
    %36 = vector.broadcast %35 : vector<128x1xf32> to vector<128x128xf32>
    %37 = arith.addf %34, %36 : vector<128x128xf32>
    %cst_21 = arith.constant 0.000000e+00 : f32
    %38 = vector.broadcast %cst_21 : f32 to vector<128x128xf32>
    %39 = arith.maximumf %37, %38 : vector<128x128xf32>
    %40 = arith.truncf %39 : vector<128x128xf32> to vector<128x128xbf16>
    %c0_22 = arith.constant 0 : index
    %c0_23 = arith.constant 0 : index
    %41 = vector.load %arg6[%c0_22, %c0_23] : memref<128x128xbf16, #tpu.memory_space<vmem>>, vector<128x128xbf16>
    %cst_24 = arith.constant dense<0.000000e+00> : vector<128x128xf32>
    %42 = tpu.matmul %41, %40, %cst_24 {dimension_numbers = #tpu.dot_dimension_numbers<[1], [0], [0], [1], [0, 0, 1, 1], [], []>} : vector<128x128xbf16>, vector<128x128xbf16>, vector<128x128xf32> -> vector<128x128xf32>
    %c0_25 = arith.constant 0 : index
    %c0_26 = arith.constant 0 : index
    %43 = vector.load %arg7[%c0_25, %c0_26] : memref<128x1xf32, #tpu.memory_space<vmem>>, vector<128x1xf32>
    %44 = vector.broadcast %43 : vector<128x1xf32> to vector<128x128xf32>
    %45 = arith.addf %42, %44 : vector<128x128xf32>
    %cst_27 = arith.constant 0.000000e+00 : f32
    %46 = vector.broadcast %cst_27 : f32 to vector<128x128xf32>
    %47 = arith.maximumf %45, %46 : vector<128x128xf32>
    %48 = arith.truncf %47 : vector<128x128xf32> to vector<128x128xbf16>
    %c0_28 = arith.constant 0 : index
    %c0_29 = arith.constant 0 : index
    %49 = vector.load %arg8[%c0_28, %c0_29] : memref<128x64xbf16, #tpu.memory_space<vmem>>, vector<128x64xbf16>
    %cst_30 = arith.constant dense<0.000000e+00> : vector<128x128xf32>
    %50 = tpu.matmul %49, %27, %cst_30 {dimension_numbers = #tpu.dot_dimension_numbers<[1], [0], [0], [1], [0, 0, 1, 1], [], []>} : vector<128x64xbf16>, vector<64x128xbf16>, vector<128x128xf32> -> vector<128x128xf32>
    %c0_31 = arith.constant 0 : index
    %c0_32 = arith.constant 0 : index
    %51 = vector.load %arg9[%c0_31, %c0_32] : memref<128x128xbf16, #tpu.memory_space<vmem>>, vector<128x128xbf16>
    %cst_33 = arith.constant dense<0.000000e+00> : vector<128x128xf32>
    %52 = tpu.matmul %51, %48, %cst_33 {dimension_numbers = #tpu.dot_dimension_numbers<[1], [0], [0], [1], [0, 0, 1, 1], [], []>} : vector<128x128xbf16>, vector<128x128xbf16>, vector<128x128xf32> -> vector<128x128xf32>
    %53 = arith.addf %50, %52 : vector<128x128xf32>
    %cst_34 = arith.constant 0.000000e+00 : f32
    %54 = vector.broadcast %cst_34 : f32 to vector<128x128xf32>
    %55 = arith.maximumf %53, %54 : vector<128x128xf32>
    %56 = arith.truncf %55 : vector<128x128xf32> to vector<128x128xbf16>
    %c0_35 = arith.constant 0 : index
    %c0_36 = arith.constant 0 : index
    %57 = vector.load %arg10[%c0_35, %c0_36] : memref<64x128xbf16, #tpu.memory_space<vmem>>, vector<64x128xbf16>
    %cst_37 = arith.constant dense<0.000000e+00> : vector<64x128xf32>
    %58 = tpu.matmul %57, %56, %cst_37 {dimension_numbers = #tpu.dot_dimension_numbers<[1], [0], [0], [1], [0, 0, 1, 1], [], []>} : vector<64x128xbf16>, vector<128x128xbf16>, vector<64x128xf32> -> vector<64x128xf32>
    %c0_38 = arith.constant 0 : index
    %c0_39 = arith.constant 0 : index
    %59 = vector.load %arg11[%c0_38, %c0_39] : memref<64x1xf32, #tpu.memory_space<vmem>>, vector<64x1xf32>
    %60 = vector.broadcast %59 : vector<64x1xf32> to vector<64x128xf32>
    %61 = arith.addf %58, %60 : vector<64x128xf32>
    %62 = vector.extract_strided_slice %61 {offsets = [0, 0], sizes = [55, 128], strides = [1, 1]} : vector<64x128xf32> to vector<55x128xf32>
    %c0_40 = arith.constant 0 : index
    %c0_41 = arith.constant 0 : index
    %c0_42 = arith.constant 0 : index
    %63 = vector.load %arg12[%c0_40, %c0_41, %c0_42] : memref<1x55x128xf32, #tpu.memory_space<vmem>>, vector<1x55x128xf32>
    %64 = vector.shape_cast %63 : vector<1x55x128xf32> to vector<55x128xf32>
    %65 = vector.shape_cast %62 : vector<55x128xf32> to vector<1x55x128xf32>
    tpu.vector_store %arg12[%c0_40, %c0_41, %c0_42], %65 {strides = array<i32>} : memref<1x55x128xf32, #tpu.memory_space<vmem>>, vector<1x55x128xf32>,
    return
  }
  func.func @transform_0(%arg0: i32, %arg1: i32) -> (i32, i32, i32) {
    %c0_i32 = arith.constant 0 : i32
    %c0_i32_0 = arith.constant 0 : i32
    return %arg0, %c0_i32, %arg1 : i32, i32, i32
  }
  func.func @transform_1(%arg0: i32, %arg1: i32) -> (i32, i32) {
    %c0_i32 = arith.constant 0 : i32
    %c0_i32_0 = arith.constant 0 : i32
    %c0_i32_1 = arith.constant 0 : i32
    return %c0_i32, %c0_i32_0 : i32, i32
  }
  func.func @transform_2(%arg0: i32, %arg1: i32) -> (i32, i32) {
    %c0_i32 = arith.constant 0 : i32
    %c0_i32_0 = arith.constant 0 : i32
    %c0_i32_1 = arith.constant 0 : i32
    return %c0_i32, %c0_i32_0 : i32, i32
  }
  func.func @transform_3(%arg0: i32, %arg1: i32) -> (i32, i32) {
    %c0_i32 = arith.constant 0 : i32
    %c0_i32_0 = arith.constant 0 : i32
    %c0_i32_1 = arith.constant 0 : i32
    return %c0_i32, %c0_i32_0 : i32, i32
  }
  func.func @transform_4(%arg0: i32, %arg1: i32) -> (i32, i32) {
    %c0_i32 = arith.constant 0 : i32
    %c0_i32_0 = arith.constant 0 : i32
    %c0_i32_1 = arith.constant 0 : i32
    return %c0_i32, %c0_i32_0 : i32, i32
  }
  func.func @transform_5(%arg0: i32, %arg1: i32) -> (i32, i32) {
    %c0_i32 = arith.constant 0 : i32
    %c0_i32_0 = arith.constant 0 : i32
    %c0_i32_1 = arith.constant 0 : i32
    return %c0_i32, %c0_i32_0 : i32, i32
  }
  func.func @transform_6(%arg0: i32, %arg1: i32) -> (i32, i32) {
    %c0_i32 = arith.constant 0 : i32
    %c0_i32_0 = arith.constant 0 : i32
    %c0_i32_1 = arith.constant 0 : i32
    return %c0_i32, %c0_i32_0 : i32, i32
  }
  func.func @transform_7(%arg0: i32, %arg1: i32) -> (i32, i32) {
    %c0_i32 = arith.constant 0 : i32
    %c0_i32_0 = arith.constant 0 : i32
    %c0_i32_1 = arith.constant 0 : i32
    return %c0_i32, %c0_i32_0 : i32, i32
  }
  func.func @transform_8(%arg0: i32, %arg1: i32) -> (i32, i32) {
    %c0_i32 = arith.constant 0 : i32
    %c0_i32_0 = arith.constant 0 : i32
    %c0_i32_1 = arith.constant 0 : i32
    return %c0_i32, %c0_i32_0 : i32, i32
  }
  func.func @transform_9(%arg0: i32, %arg1: i32) -> (i32, i32) {
    %c0_i32 = arith.constant 0 : i32
    %c0_i32_0 = arith.constant 0 : i32
    %c0_i32_1 = arith.constant 0 : i32
    return %c0_i32, %c0_i32_0 : i32, i32
  }
  func.func @transform_10(%arg0: i32, %arg1: i32) -> (i32, i32, i32) {
    %c0_i32 = arith.constant 0 : i32
    %c0_i32_0 = arith.constant 0 : i32
    return %arg0, %c0_i32, %arg1 : i32, i32, i32
  }
}

module attributes {stable_mosaic.version = 11 : i64} {
  func.func @lbs_kernel_feats(%arg0: i32, %arg1: i32, %arg2: memref<1x64x256xbf16, #tpu.memory_space<vmem>>, %arg3: memref<128x64xbf16, #tpu.memory_space<vmem>>, %arg4: memref<128x128xbf16, #tpu.memory_space<vmem>>, %arg5: memref<128x1xf32, #tpu.memory_space<vmem>>, %arg6: memref<128x128xbf16, #tpu.memory_space<vmem>>, %arg7: memref<128x1xf32, #tpu.memory_space<vmem>>, %arg8: memref<128x64xbf16, #tpu.memory_space<vmem>>, %arg9: memref<128x128xbf16, #tpu.memory_space<vmem>>, %arg10: memref<64x128xbf16, #tpu.memory_space<vmem>>, %arg11: memref<64x1xf32, #tpu.memory_space<vmem>>, %arg12: memref<1x55x256xf32, #tpu.memory_space<vmem>>) attributes {dimension_semantics = [#tpu.dimension_semantics<parallel>, #tpu.dimension_semantics<parallel>], iteration_bounds = array<i64: 2, 1>, scalar_prefetch = 0 : i64, scratch_operands = 0 : i64, tpu.core_type = #tpu.core_type<tc>, window_params = [{transform_indices = @transform_0, window_bounds = array<i64: 1, 64, 256>}, {pipeline_mode = #tpu.pipeline_mode<synchronous>, transform_indices = @transform_1, window_bounds = array<i64: 128, 64>}, {pipeline_mode = #tpu.pipeline_mode<synchronous>, transform_indices = @transform_2, window_bounds = array<i64: 128, 128>}, {pipeline_mode = #tpu.pipeline_mode<synchronous>, transform_indices = @transform_3, window_bounds = array<i64: 128, 1>}, {pipeline_mode = #tpu.pipeline_mode<synchronous>, transform_indices = @transform_4, window_bounds = array<i64: 128, 128>}, {pipeline_mode = #tpu.pipeline_mode<synchronous>, transform_indices = @transform_5, window_bounds = array<i64: 128, 1>}, {pipeline_mode = #tpu.pipeline_mode<synchronous>, transform_indices = @transform_6, window_bounds = array<i64: 128, 64>}, {pipeline_mode = #tpu.pipeline_mode<synchronous>, transform_indices = @transform_7, window_bounds = array<i64: 128, 128>}, {pipeline_mode = #tpu.pipeline_mode<synchronous>, transform_indices = @transform_8, window_bounds = array<i64: 64, 128>}, {pipeline_mode = #tpu.pipeline_mode<synchronous>, transform_indices = @transform_9, window_bounds = array<i64: 64, 1>}, {transform_indices = @transform_10, window_bounds = array<i64: 1, 55, 256>}]} {
    %c0 = arith.constant 0 : index
    %c0_0 = arith.constant 0 : index
    %c0_1 = arith.constant 0 : index
    %0 = vector.load %arg2[%c0, %c0_0, %c0_1] : memref<1x64x256xbf16, #tpu.memory_space<vmem>>, vector<1x64x256xbf16>
    %1 = vector.shape_cast %0 : vector<1x64x256xbf16> to vector<64x256xbf16>
    %c0_2 = arith.constant 0 : index
    %c0_3 = arith.constant 0 : index
    %2 = vector.load %arg3[%c0_2, %c0_3] : memref<128x64xbf16, #tpu.memory_space<vmem>>, vector<128x64xbf16>
    %cst = arith.constant dense<0.000000e+00> : vector<128x256xf32>
    %3 = tpu.matmul %2, %1, %cst {dimension_numbers = #tpu.dot_dimension_numbers<[1], [0], [0], [1], [0, 0, 1, 1], [], []>} : vector<128x64xbf16>, vector<64x256xbf16>, vector<128x256xf32> -> vector<128x256xf32>
    %cst_4 = arith.constant 0.000000e+00 : f32
    %4 = vector.broadcast %cst_4 : f32 to vector<128x256xf32>
    %5 = arith.maximumf %3, %4 : vector<128x256xf32>
    %6 = arith.truncf %5 : vector<128x256xf32> to vector<128x256xbf16>
    %c0_5 = arith.constant 0 : index
    %c0_6 = arith.constant 0 : index
    %7 = vector.load %arg4[%c0_5, %c0_6] : memref<128x128xbf16, #tpu.memory_space<vmem>>, vector<128x128xbf16>
    %cst_7 = arith.constant dense<0.000000e+00> : vector<128x256xf32>
    %8 = tpu.matmul %7, %6, %cst_7 {dimension_numbers = #tpu.dot_dimension_numbers<[1], [0], [0], [1], [0, 0, 1, 1], [], []>} : vector<128x128xbf16>, vector<128x256xbf16>, vector<128x256xf32> -> vector<128x256xf32>
    %c0_8 = arith.constant 0 : index
    %c0_9 = arith.constant 0 : index
    %9 = vector.load %arg5[%c0_8, %c0_9] : memref<128x1xf32, #tpu.memory_space<vmem>>, vector<128x1xf32>
    %10 = vector.broadcast %9 : vector<128x1xf32> to vector<128x256xf32>
    %11 = arith.addf %8, %10 : vector<128x256xf32>
    %cst_10 = arith.constant 0.000000e+00 : f32
    %12 = vector.broadcast %cst_10 : f32 to vector<128x256xf32>
    %13 = arith.maximumf %11, %12 : vector<128x256xf32>
    %14 = arith.truncf %13 : vector<128x256xf32> to vector<128x256xbf16>
    %c0_11 = arith.constant 0 : index
    %c0_12 = arith.constant 0 : index
    %15 = vector.load %arg6[%c0_11, %c0_12] : memref<128x128xbf16, #tpu.memory_space<vmem>>, vector<128x128xbf16>
    %cst_13 = arith.constant dense<0.000000e+00> : vector<128x256xf32>
    %16 = tpu.matmul %15, %14, %cst_13 {dimension_numbers = #tpu.dot_dimension_numbers<[1], [0], [0], [1], [0, 0, 1, 1], [], []>} : vector<128x128xbf16>, vector<128x256xbf16>, vector<128x256xf32> -> vector<128x256xf32>
    %c0_14 = arith.constant 0 : index
    %c0_15 = arith.constant 0 : index
    %17 = vector.load %arg7[%c0_14, %c0_15] : memref<128x1xf32, #tpu.memory_space<vmem>>, vector<128x1xf32>
    %18 = vector.broadcast %17 : vector<128x1xf32> to vector<128x256xf32>
    %19 = arith.addf %16, %18 : vector<128x256xf32>
    %cst_16 = arith.constant 0.000000e+00 : f32
    %20 = vector.broadcast %cst_16 : f32 to vector<128x256xf32>
    %21 = arith.maximumf %19, %20 : vector<128x256xf32>
    %22 = arith.truncf %21 : vector<128x256xf32> to vector<128x256xbf16>
    %c0_17 = arith.constant 0 : index
    %c0_18 = arith.constant 0 : index
    %23 = vector.load %arg8[%c0_17, %c0_18] : memref<128x64xbf16, #tpu.memory_space<vmem>>, vector<128x64xbf16>
    %cst_19 = arith.constant dense<0.000000e+00> : vector<128x256xf32>
    %24 = tpu.matmul %23, %1, %cst_19 {dimension_numbers = #tpu.dot_dimension_numbers<[1], [0], [0], [1], [0, 0, 1, 1], [], []>} : vector<128x64xbf16>, vector<64x256xbf16>, vector<128x256xf32> -> vector<128x256xf32>
    %c0_20 = arith.constant 0 : index
    %c0_21 = arith.constant 0 : index
    %25 = vector.load %arg9[%c0_20, %c0_21] : memref<128x128xbf16, #tpu.memory_space<vmem>>, vector<128x128xbf16>
    %cst_22 = arith.constant dense<0.000000e+00> : vector<128x256xf32>
    %26 = tpu.matmul %25, %22, %cst_22 {dimension_numbers = #tpu.dot_dimension_numbers<[1], [0], [0], [1], [0, 0, 1, 1], [], []>} : vector<128x128xbf16>, vector<128x256xbf16>, vector<128x256xf32> -> vector<128x256xf32>
    %27 = arith.addf %24, %26 : vector<128x256xf32>
    %cst_23 = arith.constant 0.000000e+00 : f32
    %28 = vector.broadcast %cst_23 : f32 to vector<128x256xf32>
    %29 = arith.maximumf %27, %28 : vector<128x256xf32>
    %30 = arith.truncf %29 : vector<128x256xf32> to vector<128x256xbf16>
    %c0_24 = arith.constant 0 : index
    %c0_25 = arith.constant 0 : index
    %31 = vector.load %arg10[%c0_24, %c0_25] : memref<64x128xbf16, #tpu.memory_space<vmem>>, vector<64x128xbf16>
    %cst_26 = arith.constant dense<0.000000e+00> : vector<64x256xf32>
    %32 = tpu.matmul %31, %30, %cst_26 {dimension_numbers = #tpu.dot_dimension_numbers<[1], [0], [0], [1], [0, 0, 1, 1], [], []>} : vector<64x128xbf16>, vector<128x256xbf16>, vector<64x256xf32> -> vector<64x256xf32>
    %c0_27 = arith.constant 0 : index
    %c0_28 = arith.constant 0 : index
    %33 = vector.load %arg11[%c0_27, %c0_28] : memref<64x1xf32, #tpu.memory_space<vmem>>, vector<64x1xf32>
    %34 = vector.broadcast %33 : vector<64x1xf32> to vector<64x256xf32>
    %35 = arith.addf %32, %34 : vector<64x256xf32>
    %36 = vector.extract_strided_slice %35 {offsets = [0, 0], sizes = [55, 256], strides = [1, 1]} : vector<64x256xf32> to vector<55x256xf32>
    %c0_29 = arith.constant 0 : index
    %c0_30 = arith.constant 0 : index
    %c0_31 = arith.constant 0 : index
    %37 = vector.load %arg12[%c0_29, %c0_30, %c0_31] : memref<1x55x256xf32, #tpu.memory_space<vmem>>, vector<1x55x256xf32>
    %38 = vector.shape_cast %37 : vector<1x55x256xf32> to vector<55x256xf32>
    %39 = vector.shape_cast %36 : vector<55x256xf32> to vector<1x55x256xf32>
    tpu.vector_store %arg12[%c0_29, %c0_30, %c0_31], %39 {strides = array<i32>} : memref<1x55x256xf32, #tpu.memory_space<vmem>>, vector<1x55x256xf32>,
    return
  }
  func.func @transform_0(%arg0: i32, %arg1: i32) -> (i32, i32, i32) {
    %c0_i32 = arith.constant 0 : i32
    %c0_i32_0 = arith.constant 0 : i32
    return %arg0, %c0_i32, %arg1 : i32, i32, i32
  }
  func.func @transform_1(%arg0: i32, %arg1: i32) -> (i32, i32) {
    %c0_i32 = arith.constant 0 : i32
    %c0_i32_0 = arith.constant 0 : i32
    %c0_i32_1 = arith.constant 0 : i32
    return %c0_i32, %c0_i32_0 : i32, i32
  }
  func.func @transform_2(%arg0: i32, %arg1: i32) -> (i32, i32) {
    %c0_i32 = arith.constant 0 : i32
    %c0_i32_0 = arith.constant 0 : i32
    %c0_i32_1 = arith.constant 0 : i32
    return %c0_i32, %c0_i32_0 : i32, i32
  }
  func.func @transform_3(%arg0: i32, %arg1: i32) -> (i32, i32) {
    %c0_i32 = arith.constant 0 : i32
    %c0_i32_0 = arith.constant 0 : i32
    %c0_i32_1 = arith.constant 0 : i32
    return %c0_i32, %c0_i32_0 : i32, i32
  }
  func.func @transform_4(%arg0: i32, %arg1: i32) -> (i32, i32) {
    %c0_i32 = arith.constant 0 : i32
    %c0_i32_0 = arith.constant 0 : i32
    %c0_i32_1 = arith.constant 0 : i32
    return %c0_i32, %c0_i32_0 : i32, i32
  }
  func.func @transform_5(%arg0: i32, %arg1: i32) -> (i32, i32) {
    %c0_i32 = arith.constant 0 : i32
    %c0_i32_0 = arith.constant 0 : i32
    %c0_i32_1 = arith.constant 0 : i32
    return %c0_i32, %c0_i32_0 : i32, i32
  }
  func.func @transform_6(%arg0: i32, %arg1: i32) -> (i32, i32) {
    %c0_i32 = arith.constant 0 : i32
    %c0_i32_0 = arith.constant 0 : i32
    %c0_i32_1 = arith.constant 0 : i32
    return %c0_i32, %c0_i32_0 : i32, i32
  }
  func.func @transform_7(%arg0: i32, %arg1: i32) -> (i32, i32) {
    %c0_i32 = arith.constant 0 : i32
    %c0_i32_0 = arith.constant 0 : i32
    %c0_i32_1 = arith.constant 0 : i32
    return %c0_i32, %c0_i32_0 : i32, i32
  }
  func.func @transform_8(%arg0: i32, %arg1: i32) -> (i32, i32) {
    %c0_i32 = arith.constant 0 : i32
    %c0_i32_0 = arith.constant 0 : i32
    %c0_i32_1 = arith.constant 0 : i32
    return %c0_i32, %c0_i32_0 : i32, i32
  }
  func.func @transform_9(%arg0: i32, %arg1: i32) -> (i32, i32) {
    %c0_i32 = arith.constant 0 : i32
    %c0_i32_0 = arith.constant 0 : i32
    %c0_i32_1 = arith.constant 0 : i32
    return %c0_i32, %c0_i32_0 : i32, i32
  }
  func.func @transform_10(%arg0: i32, %arg1: i32) -> (i32, i32, i32) {
    %c0_i32 = arith.constant 0 : i32
    %c0_i32_0 = arith.constant 0 : i32
    return %arg0, %c0_i32, %arg1 : i32, i32, i32
  }
}

</mosaic_0001>

<bundles_post_ra>
// kernel: _lbs_impl.1
= control target key start
LH: loop header
LB: loop body
LE: loop exit
PB: predicated region body
PF: predicated region fallthrough
CT: control target
= control target key end

     0   :  { %vm70_vm0 = vcmask 1042432   ;;  %vm72_vm1 = vcmask 1045504   ;;  %vm74_vm2 = vcmask 1040384   ;;  %vm76_vm3 = vcmask 1043456   ;;  %s3418_s0 = inlined_call_operand.vmem [shape: f32[1,3,128], index: 0, kind: input, shape index: {}]   ;;  %s3419_s1 = inlined_call_operand.vmem [shape: bf16[128,64], index: 1, kind: input, shape index: {}]   ;;  %s3420_s2 = inlined_call_operand.vmem [shape: bf16[128,128], index: 2, kind: input, shape index: {}]   ;;  %s3421_s3 = inlined_call_operand.vmem [shape: f32[128,1], index: 3, kind: input, shape index: {}]   ;;  %s3422_s5 = inlined_call_operand.vmem [shape: f32[128,1], index: 5, kind: input, shape index: {}]   ;;  %s3423_s9 = inlined_call_operand.vmem [shape: f32[64,1], index: 9, kind: input, shape index: {}]   ;;  %s3424_s4 = inlined_call_operand.vmem [shape: bf16[128,128], index: 4, kind: input, shape index: {}]   ;;  %s3425_s7 = inlined_call_operand.vmem [shape: bf16[128,128], index: 7, kind: input, shape index: {}]   ;;  %s3426_s6 = inlined_call_operand.vmem [shape: bf16[128,64], index: 6, kind: input, shape index: {}]   ;;  %s3427_s8 = inlined_call_operand.vmem [shape: bf16[64,128], index: 8, kind: input, shape index: {}]   ;;  %s3428_s10 = inlined_call_operand.vmem [shape: f32[1,55,128], index: 10, kind: output, shape index: {}]  }
   0x1   :  { %v2741_v0 = vld [vmem:[%s3418_s0] sm:$0x7]  ;;  %vm78_vm4 = vcmask 1046528   ;;  %vm80_vm5 = vcmask 1041408   ;;  %vm82_vm6 = vcmask 1044480  }
   0x2   :  { %v37_v1 = vmul.f32 2.0, %v2741_v0  ;;  %v38_v2 = vmul.f32 4.0, %v2741_v0  ;;  %v39_v3 = vmul.f32 8.0, %v2741_v0  ;;  %v40_v4 = vmul.f32 16.0, %v2741_v0 }
   0x3   :  { %v41_v5 = vmul.f32 32.0, %v2741_v0  ;;  %v42_v6 = vmul.f32 64.0, %v2741_v0  ;;  %v43_v16 = vmul.f32 128.0, %v2741_v0  ;;  %v2771_v38 = vmul.f32 512.0, %v2741_v0 }
   0x4   :  { %v47_v7 = vrot.slane %v37_v1, 5  ;;  %v50_v8 = vrot.slane %v38_v2, 2  ;;  %v53_v9 = vrot.slane %v39_v3, 7  ;;  %v56_v10 = vrot.slane %v40_v4, 4 }
   0x5   :  { %v59_v11 = vrot.slane %v41_v5, 1  ;;  %v62_v20 = vrot.slane %v42_v6, 6  ;;  %v65_v27 = vrot.slane %v43_v16, 3  ;;  %v2676_v48 = vmov 683565275  }
   0x6   :  { %v71_v12 = vsel %vm70_vm0, %v2741_v0, %v47_v7  ;;  %v75_v13 = vsel %vm74_vm2, %v50_v8, %v53_v9  ;;  %v2677_v50 = vmov 2475754826   ;;  %v2678_v52 = vmov 2131351028  }
   0x7   :  { %v2753_v14 = vsel %vm72_vm1, %v71_v12, %v50_v8  ;;  %v77_v15 = vsel %vm76_vm3, %v75_v13, %v56_v10  ;;  %v81_v29 = vsel %vm80_vm5, %v59_v11, %v62_v20  ;;  %v2679_v54 = vmov 2102212464  }
   0x8   :  { %v2757_v17 = vsel %vm78_vm4, %v77_v15, %v59_v11  ;;  %v85_v18 = vand.u32 2147483647, %v2753_v14  ;;  %v88_v19 = vand.u32 2139095040, %v2753_v14  ;;  %v2767_v33 = vsel %vm82_vm6, %v81_v29, %v65_v27 }
   0x9   :  { %v189_v21 = vand.u32 2147483647, %v2757_v17  ;;  %v192_v22 = vand.u32 2139095040, %v2757_v17  ;;  %v296_v36 = vand.u32 2139095040, %v2767_v33  ;;  %v293_v45 = vand.u32 2147483647, %v2767_v33 }
   0xa   :  { %v89_v23 = vshrl.u32 %v88_v19, 23  ;;  %v92_v24 = vand.u32 8388607, %v85_v18  ;;  %v2680_v56 = vmov 920167782   ;;  %vm1007_vm6 = vcmask 523264  }
   0xb   :  { %v193_v25 = vshrl.u32 %v192_v22, 23  ;;  %v196_v26 = vand.u32 8388607, %v189_v21  ;;  %v2778_v46 = vshrl.u32 %v296_v36, 23  ;;  %v2681_v1 = vmov 1326507024  }
   0xc   :  { %v2231_v28 = vadd.s32 4294967169, %v89_v23  ;;  %v93_v31 = vor.u32 8388608, %v92_v24 }
   0xd   :  { %v2235_v30 = vadd.s32 4294967169, %v193_v25  ;;  %v197_v34 = vor.u32 8388608, %v196_v26 }
   0xe   :  { %v95_v32 = vadd.s32 1, %v2231_v28  ;;  %v2773_v41 = vshll.u32 %v93_v31, 8 }
   0xf   :  { %v199_v35 = vadd.s32 1, %v2235_v30  ;;  %v2775_v44 = vshll.u32 %v197_v34, 8 }
  0x10   :  { %vm96_vm7 = vcmp.gt.s32.totalorder %v95_v32, 0 }
  0x11   :  { %v97_v37 = vsel %vm96_vm7, %v95_v32, 0  ;;  %vm200_vm8 = vcmp.gt.s32.totalorder %v199_v35, 0 }
  0x12   :  { %v98_v39 = vshrl.u32 %v97_v37, 5  ;;  %v99_v40 = vand.u32 31, %v97_v37  ;;  %v201_v42 = vsel %vm200_vm8, %v199_v35, 0  ;;  %vm87_vm8 = vcmp.lt.s32.totalorder %v2753_v14, 0 }
  0x13   :  { %v203_v43 = vand.u32 31, %v201_v42  ;;  %v2785_v58 = vshrl.u32 %v201_v42, 5 }
  0x14   :  { %v100_v47 = vsub.s32 32, %v99_v40  ;;  %v102_v49 = vshll.u32 %v2676_v48, %v99_v40  ;;  %v105_v51 = vshll.u32 %v2677_v50, %v99_v40  ;;  %v108_v53 = vshll.u32 %v2678_v52, %v99_v40 }
  0x15   :  { %v111_v55 = vshll.u32 %v2679_v54, %v99_v40  ;;  %v114_v57 = vshll.u32 %v2680_v56, %v99_v40  ;;  %vm117_vm9 = vcmp.lt.s32.totalorder %v98_v39, 1  ;;  %vm118_vm10 = vcmp.lt.s32.totalorder %v98_v39, 2 }
  0x16   :  { %v101_v59 = vshrl.u32 %v2676_v48, %v100_v47  ;;  %v103_v60 = vshrl.u32 %v2677_v50, %v100_v47  ;;  %v106_v61 = vshrl.u32 %v2678_v52, %v100_v47  ;;  %v109_v62 = vshrl.u32 %v2679_v54, %v100_v47 }
  0x17   :  { %v112_v63 = vshrl.u32 %v2680_v56, %v100_v47  ;;  %v115_v2 = vshrl.u32 %v2681_v1, %v100_v47  ;;  %vm120_vm11 = vcmp.lt.s32.totalorder %v98_v39, 4  ;;  %v204_v6 = vsub.s32 32, %v203_v43 }
  0x18   :  { %v104_v3 = vor.u32 %v103_v60, %v102_v49  ;;  %v107_v4 = vor.u32 %v106_v61, %v105_v51  ;;  %v110_v5 = vor.u32 %v109_v62, %v108_v53  ;;  %vm119_vm12 = vcmp.lt.s32.totalorder %v98_v39, 3 }
  0x19   :  { %v113_v7 = vor.u32 %v112_v63, %v111_v55  ;;  %v116_v8 = vor.u32 %v115_v2, %v114_v57  ;;  %v206_v9 = vshll.u32 %v2676_v48, %v203_v43  ;;  %v209_v20 = vshll.u32 %v2677_v50, %v203_v43 }
  0x1a   :  { %v121_v10 = vsel %vm117_vm9, %v101_v59, %v104_v3  ;;  %v122_v11 = vsel %vm120_vm11, %v110_v5, 2102212464  ;;  %v125_v12 = vsel %vm117_vm9, %v104_v3, %v107_v4  ;;  %v129_v13 = vsel %vm117_vm9, %v107_v4, %v110_v5 }
  0x1b   :  { %v123_v15 = vsel %vm119_vm12, %v107_v4, %v122_v11  ;;  %v126_v16 = vsel %vm120_vm11, %v113_v7, 920167782  ;;  %v130_v19 = vsel %vm120_vm11, %v116_v8, 1326507024  ;;  %v205_v24 = vshrl.u32 %v2676_v48, %v204_v6 }
  0x1c   :  { %v127_v22 = vsel %vm119_vm12, %v110_v5, %v126_v16  ;;  %v131_v23 = vsel %vm119_vm12, %v113_v7, %v130_v19  ;;  %v207_v25 = vshrl.u32 %v2677_v50, %v204_v6  ;;  %v124_v26 = vsel %vm118_vm10, %v121_v10, %v123_v15  ;;  %v2616_v15 = vld [vmem:[%s3419_s1] sm:$0xff]  }
  0x1d   :  { %v128_v27 = vsel %vm118_vm10, %v125_v12, %v127_v22  ;;  %v132_v28 = vsel %vm118_vm10, %v129_v13, %v131_v23  ;;  %v210_v29 = vshrl.u32 %v2678_v52, %v204_v6  ;;  %v212_v37 = vshll.u32 %v2678_v52, %v203_v43  ;;  %2415 = vmatprep.mubr.msk.bf16.mxu0 %vm1007_vm6, %v2616_v15 }
  0x1e   :  { %v2805_v30 = vmul.u32.u64.low %v2773_v41, %v132_v28  ;;  %v2806_v31 = vmul.u32.u64.high %v2773_v41, %v132_v28, %v2805_v30  ;;  %v2809_v32 = vmul.u32.u64.low %v2773_v41, %v128_v27  ;;  %v2810_v34 = vmul.u32.u64.high %v2773_v41, %v128_v27, %v2809_v32 }
  0x1f   :  { %v208_v35 = vor.u32 %v207_v25, %v206_v9  ;;  %v211_v36 = vor.u32 %v210_v29, %v209_v20  ;;  %v213_v40 = vshrl.u32 %v2679_v54, %v204_v6  ;;  %v215_v39 = vshll.u32 %v2679_v54, %v203_v43 }
  0x20   :  { %v216_v42 = vshrl.u32 %v2680_v56, %v204_v6  ;;  %v218_v47 = vshll.u32 %v2680_v56, %v203_v43  ;;  %v219_v49 = vshrl.u32 %v2681_v1, %v204_v6  ;;  %v140_v51 = vmul.u32 %v2773_v41, %v124_v26 }
  0x21   :  { %v214_v53 = vor.u32 %v213_v40, %v212_v37  ;;  %vm221_vm13 = vcmp.lt.s32.totalorder %v2785_v58, 1  ;;  %vm222_vm14 = vcmp.lt.s32.totalorder %v2785_v58, 2  ;;  %vm142_vm15 = vc.u32 %v2806_v31, %v2809_v32 }
  0x22   :  { %v143_v55 = vadd.s32 1, %v2810_v34  ;;  %v217_v57 = vor.u32 %v216_v42, %v215_v39  ;;  %vm223_vm1 = vcmp.lt.s32.totalorder %v2785_v58, 3  ;;  %v220_v59 = vor.u32 %v219_v49, %v218_v47 }
  0x23   :  { %vm224_vm3 = vcmp.lt.s32.totalorder %v2785_v58, 4  ;;  %v225_v43 = vsel %vm221_vm13, %v205_v24, %v208_v35  ;;  %v229_v60 = vsel %vm221_vm13, %v208_v35, %v211_v36  ;;  %v233_v63 = vsel %vm221_vm13, %v211_v36, %v214_v53 }
  0x24   :  { %v144_v41 = vsel %vm142_vm15, %v143_v55, %v2810_v34  ;;  %v226_v61 = vsel %vm224_vm3, %v214_v53, 2102212464  ;;  %v230_v62 = vsel %vm224_vm3, %v217_v57, 920167782  ;;  %v234_v5 = vsel %vm224_vm3, %v220_v59, 1326507024 }
  0x25   :  { %v145_v2 = vadd.s32 %v144_v41, %v140_v51  ;;  %v227_v3 = vsel %vm223_vm1, %v211_v36, %v226_v61  ;;  %v231_v4 = vsel %vm223_vm1, %v214_v53, %v230_v62  ;;  %v235_v8 = vsel %vm223_vm1, %v217_v57, %v234_v5 }
  0x26   :  { %v228_v6 = vsel %vm222_vm14, %v225_v43, %v227_v3  ;;  %v232_v7 = vsel %vm222_vm14, %v229_v60, %v231_v4  ;;  %v2239_v9 = vadd.s32 4294967169, %v2778_v46  ;;  %v236_v11 = vsel %vm222_vm14, %v233_v63, %v235_v8 }
  0x27   :  { %v146_v10 = vadd.s32 536870912, %v145_v2  ;;  %v2842_v12 = vmul.u32.u64.low %v2775_v44, %v232_v7  ;;  %v2843_v13 = vmul.u32.u64.high %v2775_v44, %v232_v7, %v2842_v12  ;;  %v44_v46 = vmul.f32 256.0, %v2741_v0 }
  0x28   :  { %v2850_v16 = vmul.u32.u64.low %v2775_v44, %v236_v11  ;;  %v2851_v19 = vmul.u32.u64.high %v2775_v44, %v236_v11, %v2850_v16  ;;  %v303_v20 = vadd.s32 1, %v2239_v9  ;;  %v68_v58 = vrot.slane %v2771_v38, 5 }
  0x29   :  { %v147_v22 = vshrl.u32 %v146_v10, 30  ;;  %v244_v23 = vmul.u32 %v2775_v44, %v228_v6  ;;  %v300_v24 = vand.u32 8388607, %v293_v45  ;;  %v247_v26 = vadd.s32 1, %v2843_v13 }
  0x2a   :  { %vm304_vm5 = vcmp.gt.s32.totalorder %v303_v20, 0  ;;  %vm246_vm7 = vc.u32 %v2851_v19, %v2842_v12  ;;  %v2866_v44 = vsel %vm70_vm0, %v44_v46, %v68_v58  ;;  %v141_v36 = vadd.s32 %v2809_v32, %v2806_v31 }
  0x2b   :  { %v148_v25 = vshll.u32 %v147_v22, 30  ;;  %v305_v27 = vsel %vm304_vm5, %v303_v20, 0  ;;  %v248_v38 = vsel %vm246_vm7, %v247_v26, %v2843_v13  ;;  %v301_v34 = vor.u32 8388608, %v300_v24 }
  0x2c   :  { %v307_v28 = vand.u32 31, %v305_v27  ;;  %v249_v30 = vadd.s32 %v248_v38, %v244_v23  ;;  %v171_v40 = vsub.s32 4, %v147_v22  ;;  %v400_v47 = vand.u32 2139095040, %v2866_v44 }
  0x2d   :  { %v2862_v29 = vsub.s32 %v145_v2, %v148_v25  ;;  %v2880_v32 = vshll.u32 %v301_v34, 8  ;;  %vm2884_vm9 = vcmp.le.f32.partialorder %v85_v18, 0.7853982  ;;  %vm191_vm10 = vcmp.lt.s32.totalorder %v2757_v17, 0 }
  0x2e   :  { %v308_v35 = vsub.s32 32, %v307_v28  ;;  %v250_v39 = vadd.s32 536870912, %v249_v30  ;;  %v310_v42 = vshll.u32 %v2676_v48, %v307_v28  ;;  %v313_v53 = vshll.u32 %v2677_v50, %v307_v28 }
  0x2f   :  { %v151_v37 = vsub.s32 0, %v2862_v29  ;;  %v316_v59 = vshll.u32 %v2678_v52, %v307_v28  ;;  %v306_v41 = vshrl.u32 %v305_v27, 5  ;;  %v319_v61 = vshll.u32 %v2679_v54, %v307_v28 }
  0x30   :  { %v311_v51 = vshrl.u32 %v2677_v50, %v308_v35  ;;  %v314_v55 = vshrl.u32 %v2678_v52, %v308_v35  ;;  %v251_v57 = vshrl.u32 %v250_v39, 30  ;;  %v317_v31 = vshrl.u32 %v2679_v54, %v308_v35 }
  0x31   :  { %v2232_v49 = vmin.u32 %v151_v37, %v2862_v29  ;;  %v320_v62 = vshrl.u32 %v2680_v56, %v308_v35  ;;  %v172_v63 = vsel %vm87_vm8, %v171_v40, %v147_v22  ;;  %v309_v3 = vshrl.u32 %v2676_v48, %v308_v35 }
  0x32   :  { %v252_v2 = vshll.u32 %v251_v57, 30  ;;  %v401_v4 = vshrl.u32 %v400_v47, 23  ;;  %v275_v18 = vsub.s32 4, %v251_v57  ;;  %v312_v6 = vor.u32 %v311_v51, %v310_v42 }
  0x33   :  { %v153_v60 = vclz %v2232_v49  ;;  %v315_v7 = vor.u32 %v314_v55, %v313_v53  ;;  %v318_v9 = vor.u32 %v317_v31, %v316_v59  ;;  %v322_v10 = vshll.u32 %v2680_v56, %v307_v28 }
  0x34   :  { %v2894_v8 = vsub.s32 %v249_v30, %v252_v2  ;;  %v323_v11 = vshrl.u32 %v2681_v1, %v308_v35  ;;  %v321_v13 = vor.u32 %v320_v62, %v319_v61  ;;  %vm325_vm12 = vcmp.lt.s32.totalorder %v306_v41, 1 }
  0x35   :  { %v2233_v5 = vadd.s32 4294967294, %v153_v60  ;;  %vm326_vm13 = vcmp.lt.s32.totalorder %v306_v41, 2  ;;  %vm327_vm14 = vcmp.lt.s32.totalorder %v306_v41, 3  ;;  %vm328_vm15 = vcmp.lt.s32.totalorder %v306_v41, 4 }
  0x36   :  { %v255_v16 = vsub.s32 0, %v2894_v8  ;;  %vm2902_vm1 = vcmp.le.f32.partialorder %v189_v21, 0.7853982  ;;  %v330_v23 = vsel %vm328_vm15, %v318_v9, 2102212464  ;;  %v324_v25 = vor.u32 %v323_v11, %v322_v10 }
  0x37   :  { %vm2234_vm11 = vcmp.lt.s32.totalorder %v2233_v5, 0  ;;  %v329_v26 = vsel %vm325_vm12, %v309_v3, %v312_v6  ;;  %v331_v27 = vsel %vm327_vm14, %v315_v7, %v330_v23  ;;  %v334_v30 = vsel %vm328_vm15, %v321_v13, 920167782 }
  0x38   :  { %v156_v15 = vsel %vm2234_vm11, 0, %v2233_v5  ;;  %v2236_v24 = vmin.u32 %v255_v16, %v2894_v8  ;;  %v2914_v21 = vsel %vm2884_vm9, 0, %v172_v63  ;;  %v245_v34 = vadd.s32 %v2842_v12, %v2851_v19 }
  0x39   :  { %v157_v20 = vsub.s32 32, %v156_v15  ;;  %v158_v22 = vshll.u32 %v2862_v29, %v156_v15  ;;  %v161_v46 = vsub.s32 4294967266, %v156_v15  ;;  %v333_v29 = vsel %vm325_vm12, %v312_v6, %v315_v7 }
  0x3a   :  { %v257_v35 = vclz %v2236_v24  ;;  %v276_v37 = vsel %vm191_vm10, %v275_v18, %v251_v57  ;;  %v337_v42 = vsel %vm325_vm12, %v315_v7, %v318_v9  ;;  %v332_v49 = vsel %vm326_vm13, %v329_v26, %v331_v27 }
  0x3b   :  { %v159_v28 = vshrl.u32 %v141_v36, %v157_v20  ;;  %v162_v38 = vadd.s32 127, %v161_v46  ;;  %v335_v36 = vsel %vm327_vm14, %v318_v9, %v334_v30  ;;  %v338_v53 = vsel %vm328_vm15, %v324_v25, 1326507024 }
  0x3c   :  { %v2237_v47 = vadd.s32 4294967294, %v257_v35  ;;  %v336_v51 = vsel %vm326_vm13, %v333_v29, %v335_v36  ;;  %v339_v12 = vsel %vm327_vm14, %v321_v13, %v338_v53  ;;  %v2243_v19 = vadd.s32 4294967169, %v401_v4 }
  0x3d   :  { %v160_v40 = vor.u32 %v159_v28, %v158_v22  ;;  %v163_v39 = vshll.u32 %v162_v38, 23  ;;  %v340_v57 = vsel %vm326_vm13, %v337_v42, %v339_v12  ;;  %v278_v4 = vsel %vm2902_vm1, 0, %v276_v37 }
  0x3e   :  { %vm2238_vm3 = vcmp.lt.s32.totalorder %v2237_v47, 0  ;;  %v2928_v31 = vmul.u32.u64.low %v2880_v32, %v336_v51  ;;  %v2929_v60 = vmul.u32.u64.high %v2880_v32, %v336_v51, %v2928_v31  ;;  %v178_v6 = vadd.s32 3, %v2914_v21 }
  0x3f   :  { %v164_v55 = vor.u32 4788187, %v163_v39  ;;  %v167_v59 = vcvt.s32.f32 %v160_v40  ;;  %v260_v62 = vsel %vm2238_vm3, 0, %v2237_v47  ;;  %v348_v7 = vmul.u32 %v2880_v32, %v332_v49 }
  0x40   :  { %v2933_v63 = vmul.u32.u64.low %v2880_v32, %v340_v57  ;;  %v2934_v2 = vmul.u32.u64.high %v2880_v32, %v340_v57, %v2933_v63  ;;  %v261_v3 = vsub.s32 32, %v260_v62  ;;  %v262_v5 = vshll.u32 %v2894_v8, %v260_v62 }
  0x41   :  { %v165_v61 = vand.u32 2147483647, %v164_v55  ;;  %v265_v18 = vsub.s32 4294967266, %v260_v62  ;;  %v407_v9 = vadd.s32 1, %v2243_v19  ;;  %v351_v13 = vadd.s32 1, %v2929_v60 }
  0x42   :  { %v263_v10 = vshrl.u32 %v245_v34, %v261_v3  ;;  %v397_v15 = vand.u32 2147483647, %v2866_v44  ;;  %v282_v20 = vadd.s32 3, %v278_v4  ;;  %vm350_vm5 = vc.u32 %v2934_v2, %v2928_v31 }
  0x43   :  { %v168_v41 = vmul.f32 %v167_v59, %v165_v61  ;;  %v266_v11 = vadd.s32 127, %v265_v18  ;;  %vm408_vm7 = vcmp.gt.s32.totalorder %v407_v9, 0  ;;  %v352_v46 = vsel %vm350_vm5, %v351_v13, %v2929_v60 }
  0x44   :  { %v264_v8 = vor.u32 %v263_v10, %v262_v5  ;;  %v409_v23 = vsel %vm408_vm7, %v407_v9, 0  ;;  %v2948_v24 = vand.u32 3, %v178_v6  ;;  %v353_v25 = vadd.s32 %v352_v46, %v348_v7 }
  0x45   :  { %v169_v16 = vxor.u32 2147483648, %v168_v41  ;;  %v267_v22 = vshll.u32 %v266_v11, 23  ;;  %v411_v26 = vand.u32 31, %v409_v23  ;;  %v2953_v35 = vand.u32 3, %v282_v20 }
  0x46   :  { %v271_v38 = vcvt.s32.f32 %v264_v8  ;;  %v354_v29 = vadd.s32 536870912, %v353_v25  ;;  %v404_v37 = vand.u32 8388607, %v397_v15  ;;  %vm180_vm11 = vcmp.lt.s32.totalorder %v2948_v24, 2 }
  0x47   :  { %v170_v32 = vsel %vm87_vm8, %v169_v16, %v168_v41  ;;  %v268_v28 = vor.u32 4788187, %v267_v22  ;;  %v412_v30 = vsub.s32 32, %v411_v26  ;;  %vm184_vm8 = vcmp.eq.s32.totalorder %v2948_v24, 2 }
  0x48   :  { %v173_v27 = vsel %vm2884_vm9, %v2753_v14, %v170_v32  ;;  %v2958_v40 = vshrl.u32 %v354_v29, 30  ;;  %v414_v39 = vshll.u32 %v2676_v48, %v411_v26  ;;  %v417_v36 = vshll.u32 %v2677_v50, %v411_v26 }
  0x49   :  { %2660 = vcosq.f32 %v173_v27  ;;  %v269_v34 = vand.u32 2147483647, %v268_v28  ;;  %v415_v43 = vshrl.u32 %v2677_v50, %v412_v30  ;;  %vm181_vm9 = vcmp.eq.s32.totalorder %v2948_v24, 0 }
  0x4a   :  { %2662 = vsinq.f32 %v173_v27  ;;  %v418_v47 = vshrl.u32 %v2678_v52, %v412_v30  ;;  %v423_v49 = vshll.u32 %v2679_v54, %v411_v26  ;;  %v424_v51 = vshrl.u32 %v2680_v56, %v412_v30 }
  0x4b   :  { %v272_v42 = vmul.f32 %v271_v38, %v269_v34  ;;  %v356_v53 = vshll.u32 %v2958_v40, 30  ;;  %v410_v55 = vshrl.u32 %v409_v23, 5  ;;  %v420_v59 = vshll.u32 %v2678_v52, %v411_v26 }
  0x4c   :  { %v421_v12 = vshrl.u32 %v2679_v54, %v412_v30  ;;  %v405_v50 = vor.u32 8388608, %v404_v37  ;;  %v2972_v57 = vand.u32 3, %v2914_v21  ;;  %v2974_v60 = vand.u32 3, %v278_v4 }
  0x4d   :  { %v273_v19 = vxor.u32 2147483648, %v272_v42  ;;  %vm177_vm12 = vweird.f32 %v2753_v14  ;;  %v2977_v61 = vsub.s32 %v353_v25, %v356_v53  ;;  %v413_v62 = vshrl.u32 %v2676_v48, %v412_v30 }
  0x4e   :  { %v426_v63 = vshll.u32 %v2680_v56, %v411_v26  ;;  %v427_v3 = vshrl.u32 %v2681_v1, %v412_v30  ;;  %v416_v54 = vor.u32 %v415_v43, %v414_v39  ;;  %v419_v5 = vor.u32 %v418_v47, %v417_v36 }
  0x4f   :  { %v274_v52 = vsel %vm191_vm10, %v273_v19, %v272_v42  ;;  %v425_v18 = vor.u32 %v424_v51, %v423_v49  ;;  %v359_v4 = vsub.s32 0, %v2977_v61  ;;  %v422_v41 = vor.u32 %v421_v12, %v420_v59 }
  0x50   :  { %v277_v21 = vsel %vm2902_vm1, %v2757_v17, %v274_v52  ;;  %vm429_vm13 = vcmp.lt.s32.totalorder %v410_v55, 1  ;;  %vm431_vm14 = vcmp.lt.s32.totalorder %v410_v55, 3  ;;  %vm432_vm15 = vcmp.lt.s32.totalorder %v410_v55, 4 }
  0x51   :  { %2664 = vcosq.f32 %v277_v21  ;;  %v2988_v48 = vshll.u32 %v405_v50, 8  ;;  %v2240_v1 = vmin.u32 %v359_v4, %v2977_v61  ;;  %v428_v6 = vor.u32 %v427_v3, %v426_v63 }
  0x52   :  { %2666 = vsinq.f32 %v277_v21  ;;  %v434_v7 = vsel %vm432_vm15, %v422_v41, 2102212464  ;;  %vm288_vm10 = vcmp.eq.s32.totalorder %v2953_v35, 2  ;;  %vm430_vm1 = vcmp.lt.s32.totalorder %v410_v55, 2 }
  0x53   :  { %v2661_v56 = vpop.eup %2660  ;;  %v437_v58 = vsel %vm429_vm13, %v416_v54, %v419_v5  ;;  %v438_v11 = vsel %vm432_vm15, %v425_v18, 920167782  ;;  %vm285_vm3 = vcmp.eq.s32.totalorder %v2953_v35, 0  ;;  %v349_v16 = vadd.s32 %v2928_v31, %v2934_v2 }
  0x54   :  { %v2663_v9 = vpop.eup %2662  ;;  %v185_v10 = vxor.u32 2147483648, %v2661_v56  ;;  %v361_v20 = vclz %v2240_v1  ;;  %v433_v8 = vsel %vm429_vm13, %v413_v62, %v416_v54  ;;  %vm284_vm5 = vcmp.lt.s32.totalorder %v2953_v35, 2 }
  0x55   :  { %v182_v13 = vxor.u32 2147483648, %v2663_v9  ;;  %v435_v46 = vsel %vm431_vm14, %v419_v5, %v434_v7  ;;  %v439_v23 = vsel %vm431_vm14, %v422_v41, %v438_v11  ;;  %v441_v32 = vsel %vm429_vm13, %v419_v5, %v422_v41 }
  0x56   :  { %v186_v22 = vsel %vm184_vm8, %v185_v10, %v2663_v9  ;;  %vm281_vm7 = vweird.f32 %v2757_v17  ;;  %v2241_v31 = vadd.s32 4294967294, %v361_v20  ;;  %v440_v2 = vsel %vm430_vm1, %v437_v58, %v439_v23 }
  0x57   :  { %v183_v25 = vsel %vm181_vm9, %v2661_v56, %v182_v13  ;;  %v442_v26 = vsel %vm432_vm15, %v428_v6, 1326507024  ;;  %v3014_v38 = vmul.u32.u64.low %v2988_v48, %v440_v2  ;;  %v3015_v29 = vmul.u32.u64.high %v2988_v48, %v440_v2, %v3014_v38 }
  0x58   :  { %v187_v27 = vsel %vm180_vm11, %v183_v25, %v186_v22  ;;  %v443_v28 = vsel %vm431_vm14, %v425_v18, %v442_v26  ;;  %vm2242_vm8 = vcmp.lt.s32.totalorder %v2241_v31, 0  ;;  %v436_v30 = vsel %vm430_vm1, %v433_v8, %v435_v46 }
  0x59   :  { %v444_v34 = vsel %vm430_vm1, %v441_v32, %v443_v28  ;;  %vm595_vm9 = vcmp.lt.s32.totalorder %v2972_v57, 2  ;;  %v188_v37 = vsel %vm177_vm12, nan, %v187_v27  ;;  %v364_v39 = vsel %vm2242_vm8, 0, %v2241_v31 }
  0x5a   :  { %v3024_v24 = vmul.u32.u64.low %v2988_v48, %v444_v34  ;;  %v3025_v43 = vmul.u32.u64.high %v2988_v48, %v444_v34, %v3024_v24  ;;  %v365_v36 = vsub.s32 32, %v364_v39  ;;  %v366_v42 = vshll.u32 %v2977_v61, %v364_v39 }
  0x5b   :  { %v369_v47 = vsub.s32 4294967266, %v364_v39  ;;  %vm596_vm11 = vcmp.eq.s32.totalorder %v2972_v57, 0  ;;  %v2665_v49 = vpop.eup %2664  ;;  %v452_v51 = vmul.u32 %v2988_v48, %v436_v30  ;;  %v455_v53 = vadd.s32 1, %v3015_v29 }
  0x5c   :  { %v598_v55 = vsel %vm596_vm11, %v2661_v56, %v182_v13  ;;  %vm599_vm13 = vcmp.eq.s32.totalorder %v2972_v57, 2  ;;  %v2667_v59 = vpop.eup %2666  ;;  %v289_v12 = vxor.u32 2147483648, %v2665_v49  ;;  %v367_v19 = vshrl.u32 %v349_v16, %v365_v36 }
  0x5d   :  { %v370_v50 = vadd.s32 127, %v369_v47  ;;  %v601_v62 = vsel %vm599_vm13, %v185_v10, %v2663_v9  ;;  %v286_v63 = vxor.u32 2147483648, %v2667_v59  ;;  %v917_v3 = vrot.slane %v188_v37, 5 }
  0x5e   :  { %vm454_vm14 = vc.u32 %v3025_v43, %v3014_v38  ;;  %v602_v61 = vsel %vm595_vm9, %v598_v55, %v601_v62  ;;  %v290_v52 = vsel %vm288_vm10, %v289_v12, %v2667_v59  ;;  %v368_v54 = vor.u32 %v367_v19, %v366_v42 }
  0x5f   :  { %v371_v5 = vshll.u32 %v370_v50, 23  ;;  %v456_v18 = vsel %vm454_vm14, %v455_v53, %v3015_v29  ;;  %v287_v21 = vsel %vm285_vm3, %v2665_v49, %v286_v63  ;;  %v3043_v41 = vsel %vm177_vm12, nan, %v602_v61 }
  0x60   :  { %v457_v4 = vadd.s32 %v456_v18, %v452_v51  ;;  %v291_v48 = vsel %vm284_vm5, %v287_v21, %v290_v52  ;;  %vm698_vm15 = vcmp.lt.s32.totalorder %v2974_v60, 2  ;;  %vm699_vm10 = vcmp.eq.s32.totalorder %v2974_v60, 0 }
  0x61   :  { %v372_v57 = vor.u32 4788187, %v371_v5  ;;  %v3051_v56 = vsel %vm281_vm7, nan, %v291_v48  ;;  %v701_v6 = vsel %vm699_vm10, %v2665_v49, %v286_v63  ;;  %vm702_vm1 = vcmp.eq.s32.totalorder %v2974_v60, 2 }
  0x62   :  { %v458_v1 = vadd.s32 536870912, %v457_v4  ;;  %v918_v14 = vrot.slane %v3051_v56, 5  ;;  %v944_v7 = vsel %vm70_vm0, %v2741_v0, %v917_v3  ;;  %v375_v35 = vcvt.s32.f32 %v368_v54 }
  0x63   :  { %v704_v9 = vsel %vm702_vm1, %v289_v12, %v2667_v59  ;;  %v373_v10 = vand.u32 2147483647, %v372_v57  ;;  %v933_v13 = vrot.slane %v3043_v41, 7  ;;  %vm295_vm12 = vcmp.lt.s32.totalorder %v2767_v33, 0 }
  0x64   :  { %v459_v58 = vshrl.u32 %v458_v1, 30  ;;  %v705_v11 = vsel %vm698_vm15, %v701_v6, %v704_v9  ;;  %v919_v16 = vsel %vm70_vm0, %v917_v3, %v918_v14  ;;  %vm3080_vm3 = vcmp.le.f32.partialorder %v293_v45, 0.7853982 }
  0x65   :  { %v3063_v20 = vsel %vm281_vm7, nan, %v705_v11  ;;  %v3065_v60 = vpack.c.bf16 %v919_v16, %v944_v7  ;;  %v376_v22 = vmul.f32 %v375_v35, %v373_v10  ;;  %v453_v28 = vadd.s32 %v3014_v38, %v3025_v43 }
  0x66   :  { %v460_v8 = vshll.u32 %v459_v58, 30  ;;  %v934_v0 = vrot.slane %v3063_v20, 7  ;;  %v379_v29 = vsub.s32 4, %v2958_v40  ;;  %v483_v55 = vsub.s32 4, %v459_v58  ;;  %v2618_v20 = vld [vmem:[%s3419_s1 + $0x10] sm:$0xff]  }
  0x67   :  { %2407 = vmatprep.subr.bf16.mxu0 %v3065_v60  ;;  %v377_v32 = vxor.u32 2147483648, %v376_v22  ;;  %vm399_vm7 = vcmp.lt.s32.totalorder %v2866_v44, 0  ;;  %vm398_vm8 = vcmp.le.f32.partialorder %v397_v15, 0.7853982  ;;  %vm385_vm1 = vweird.f32 %v2767_v33 }
  0x68   :  { %v461_v46 = vsub.s32 %v457_v4, %v460_v8  ;;  %v3074_v23 = vsel %vm74_vm2, %v933_v13, %v934_v0  ;;  %2408 = vmatpush3.bf16.msra.mxu0 %v3065_v60  ;;  %v380_v42 = vsel %vm295_vm12, %v379_v29, %v2958_v40  ;;  %v484_v40 = vsel %vm399_vm7, %v483_v55, %v459_v58  ;;  %v1172_v55 = vld [vmem:[%s3421_s3 + $0x18] sm:$0xff] }
  0x69   :  { %v378_v26 = vsel %vm295_vm12, %v377_v32, %v376_v22  ;;  %v382_v47 = vsel %vm3080_vm3, 0, %v380_v42  ;;  %v486_v52 = vsel %vm398_vm8, 0, %v484_v40  ;;  %v2623_v42 = vld [vmem:[%s3419_s1 + $0x38] sm:$0xff]   ;;  %v1179_v40 = vld [vmem:[%s3421_s3 + $0x50] sm:$0xff] }
  0x6a   :  { %v463_v17 = vsub.s32 0, %v461_v46  ;;  %v381_v30 = vsel %vm3080_vm3, %v2767_v33, %v378_v26  ;;  %v386_v59 = vadd.s32 3, %v382_v47  ;;  %v800_v54 = vand.u32 3, %v382_v47  ;;  %v1169_v47 = vld [vmem:[%s3421_s3] sm:$0xff] }
  0x6b   :  { %2668 = vcosq.f32 %v381_v30  ;;  %v490_v21 = vadd.s32 3, %v486_v52  ;;  %v903_v6 = vand.u32 3, %v486_v52  ;;  %v1182_v52 = vld [vmem:[%s3421_s3 + $0x68] sm:$0xff] }
  0x6c   :  { %v2244_v25 = vmin.u32 %v463_v17, %v461_v46  ;;  %2670 = vsinq.f32 %v381_v30  ;;  %v387_v63 = vand.u32 3, %v386_v59  ;;  %vm802_vm13 = vcmp.eq.s32.totalorder %v800_v54, 0  ;;  %v1175_v59 = vld [vmem:[%s3421_s3 + $0x30] sm:$0xff] }
  0x6d   :  { %vm805_vm14 = vcmp.eq.s32.totalorder %v800_v54, 2  ;;  %vm801_vm10 = vcmp.lt.s32.totalorder %v800_v54, 2  ;;  %v491_v48 = vand.u32 3, %v490_v21  ;;  %vm908_vm3 = vcmp.eq.s32.totalorder %v903_v6, 2  ;;  %v1450_v54 = vld [vmem:[%s3422_s5] sm:$0xff]  ;;  %v1451_v21 = vld [vmem:[%s3422_s5 + $0x8] sm:$0xff] }
  0x6e   :  { %v465_v31 = vclz %v2244_v25  ;;  %vm389_vm9 = vcmp.eq.s32.totalorder %v387_v63, 0  ;;  %vm392_vm11 = vcmp.eq.s32.totalorder %v387_v63, 2  ;;  %vm388_vm15 = vcmp.lt.s32.totalorder %v387_v63, 2  ;;  %v1181_v63 = vld [vmem:[%s3421_s3 + $0x60] sm:$0xff] }
  0x6f   :  { %vm496_vm12 = vcmp.eq.s32.totalorder %v491_v48, 2 }
  0x70   :  { %v2245_v27 = vadd.s32 4294967294, %v465_v31 }
  0x72   :  { %vm2246_vm5 = vcmp.lt.s32.totalorder %v2245_v27, 0 }
  0x73   :  { %v468_v34 = vsel %vm2246_vm5, 0, %v2245_v27  ;;  %vm493_vm5 = vcmp.eq.s32.totalorder %v491_v48, 0 }
  0x74   :  { %v469_v37 = vsub.s32 32, %v468_v34  ;;  %v470_v45 = vshll.u32 %v461_v46, %v468_v34  ;;  %v473_v39 = vsub.s32 4294967266, %v468_v34 }
  0x75   :  { %v2669_v19 = vpop.eup %2668 }
  0x76   :  { %v471_v24 = vshrl.u32 %v453_v28, %v469_v37  ;;  %v474_v36 = vadd.s32 127, %v473_v39  ;;  %v2671_v62 = vpop.eup %2670  ;;  %v393_v18 = vxor.u32 2147483648, %v2669_v19 }
  0x77   :  { %v390_v5 = vxor.u32 2147483648, %v2671_v62 }
  0x78   :  { %v472_v38 = vor.u32 %v471_v24, %v470_v45  ;;  %v475_v43 = vshll.u32 %v474_v36, 23  ;;  %v394_v4 = vsel %vm392_vm11, %v393_v18, %v2671_v62  ;;  %v807_v1 = vsel %vm805_vm14, %v393_v18, %v2671_v62  ;;  %v2621_v24 = vld [vmem:[%s3419_s1 + $0x28] sm:$0xff]   ;;  %v2622_v36 = vld [vmem:[%s3419_s1 + $0x30] sm:$0xff]  }
  0x79   :  { %v391_v15 = vsel %vm389_vm9, %v2669_v19, %v390_v5  ;;  %v804_v57 = vsel %vm802_vm13, %v2669_v19, %v390_v5  ;;  %vm904_vm9 = vcmp.lt.s32.totalorder %v903_v6, 2  ;;  %vm489_vm11 = vweird.f32 %v2866_v44  ;;  %v1177_v19 = vld [vmem:[%s3421_s3 + $0x40] sm:$0xff]  ;;  %v1178_v62 = vld [vmem:[%s3421_s3 + $0x48] sm:$0xff]  ;;  %v1184_v5 = vld [vmem:[%s3421_s3 + $0x78] sm:$0xff] }
  0x7a   :  { %v476_v49 = vor.u32 4788187, %v475_v43  ;;  %v479_v51 = vcvt.s32.f32 %v472_v38  ;;  %v395_v7 = vsel %vm388_vm15, %v391_v15, %v394_v4  ;;  %v808_v35 = vsel %vm801_vm10, %v804_v57, %v807_v1  ;;  %v2624_v38 = vld [vmem:[%s3420_s2] sm:$0xff]   ;;  %v1452_v18 = vld [vmem:[%s3422_s5 + $0x10] sm:$0xff]  ;;  %v1453_v4 = vld [vmem:[%s3422_s5 + $0x18] sm:$0xff] }
  0x7b   :  { %v396_v10 = vsel %vm385_vm1, nan, %v395_v7  ;;  %v809_v8 = vsel %vm385_vm1, nan, %v808_v35  ;;  %2447 = vmatprep.mubr.bf16.mxu1 %v2624_v38  ;;  %v2682_v43 = vmov 0   ;;  %v1454_v15 = vld [vmem:[%s3422_s5 + $0x20] sm:$0xff]  ;;  %v1455_v57 = vld [vmem:[%s3422_s5 + $0x28] sm:$0xff]  ;;  %v1460_v7 = vld [vmem:[%s3422_s5 + $0x50] sm:$0xff] }
  0x7c   :  { %v477_v53 = vand.u32 2147483647, %v476_v49  ;;  %v920_v46 = vrot.slane %v396_v10, 5  ;;  %v936_v2 = vrot.slane %v809_v8, 7  ;;  %2614 = vset.pattern.permute.xlu0 %v2682_v43  ;;  %2615 = vset.pattern.permute.xlu1 %v2682_v43  ;;  %v1170_v49 = vld [vmem:[%s3421_s3 + $0x8] sm:$0xff]  ;;  %v1458_v1 = vld [vmem:[%s3422_s5 + $0x40] sm:$0xff] }
  0x7d   :  { %1187 = vperm.xlu0 %2614, %v1169_v47   ;;  %v1459_v35 = vld [vmem:[%s3422_s5 + $0x48] sm:$0xff]  ;;  %v1461_v10 = vld [vmem:[%s3422_s5 + $0x58] sm:$0xff] }
  0x7e   :  { %v480_v12 = vmul.f32 %v479_v51, %v477_v53  ;;  %v921_v28 = vsel %vm70_vm0, %v918_v14, %v920_v46  ;;  %v937_v56 = vsel %vm74_vm2, %v934_v0, %v936_v2  ;;  %v2619_v0 = vld [vmem:[%s3419_s1 + $0x18] sm:$0xff]   ;;  %v1171_v51 = vld [vmem:[%s3421_s3 + $0x10] sm:$0xff]  ;;  %v1173_v53 = vld [vmem:[%s3421_s3 + $0x20] sm:$0xff] }
  0x7f   :  { %1197 = vperm.xlu1 %2615, %v1171_v51   ;;  %v1465_v8 = vld [vmem:[%s3422_s5 + $0x78] sm:$0xff] }
  0x80   :  { %v481_v50 = vxor.u32 2147483648, %v480_v12 }
  0x81   :  { %1192 = vperm.xlu0 %2614, %v1170_v49  }
  0x82   :  { %v482_v3 = vsel %vm399_vm7, %v481_v50, %v480_v12  ;;  %vm905_vm7 = vcmp.eq.s32.totalorder %v903_v6, 0  ;;  %v1174_v12 = vld [vmem:[%s3421_s3 + $0x28] sm:$0xff]  ;;  %v1176_v50 = vld [vmem:[%s3421_s3 + $0x38] sm:$0xff] }
  0x83   :  { %v485_v61 = vsel %vm398_vm8, %v2866_v44, %v482_v3  ;;  %vm492_vm8 = vcmp.lt.s32.totalorder %v491_v48, 2  ;;  %1202 = vperm.xlu1 %2615, %v1172_v55   ;;  %v1180_v3 = vld [vmem:[%s3421_s3 + $0x58] sm:$0xff]  ;;  %v1456_v48 = vld [vmem:[%s3422_s5 + $0x30] sm:$0xff] }
  0x84   :  { %2672 = vcosq.f32 %v485_v61  ;;  %v1457_v6 = vld [vmem:[%s3422_s5 + $0x38] sm:$0xff] }
  0x85   :  { %2674 = vsinq.f32 %v485_v61  ;;  %1207 = vperm.xlu0 %2614, %v1173_v53   ;;  %v1183_v61 = vld [vmem:[%s3421_s3 + $0x70] sm:$0xff] }
  0x87   :  { %1212 = vperm.xlu1 %2615, %v1174_v12  }
  0x89   :  { %1217 = vperm.xlu0 %2614, %v1175_v59  }
  0x8b   :  { %1222 = vperm.xlu1 %2615, %v1176_v50  }
  0x8d   :  { %1227 = vperm.xlu0 %2614, %v1177_v19  }
  0x8e   :  { %v2673_v9 = vpop.eup %2672 }
  0x8f   :  { %v2675_v58 = vpop.eup %2674  ;;  %v497_v11 = vxor.u32 2147483648, %v2673_v9  ;;  %1232 = vperm.xlu1 %2615, %v1178_v62  }
  0x90   :  { %v494_v16 = vxor.u32 2147483648, %v2675_v58 }
  0x91   :  { %v498_v22 = vsel %vm496_vm12, %v497_v11, %v2675_v58  ;;  %v910_v17 = vsel %vm908_vm3, %v497_v11, %v2675_v58  ;;  %1237 = vperm.xlu0 %2614, %v1179_v40   ;;  %v1464_v58 = vld [vmem:[%s3422_s5 + $0x70] sm:$0xff]  ;;  %v1463_v11 = vld [vmem:[%s3422_s5 + $0x68] sm:$0xff] }
  0x92   :  { %v495_v33 = vsel %vm493_vm5, %v2673_v9, %v494_v16  ;;  %v907_v32 = vsel %vm905_vm7, %v2673_v9, %v494_v16  ;;  %v1462_v9 = vld [vmem:[%s3422_s5 + $0x60] sm:$0xff] }
  0x93   :  { %v499_v25 = vsel %vm492_vm8, %v495_v33, %v498_v22  ;;  %v911_v31 = vsel %vm904_vm9, %v907_v32, %v910_v17  ;;  %1242 = vperm.xlu1 %2615, %v1180_v3   ;;  %v2085_v16 = vld [vmem:[%s3423_s9] sm:$0xff]  ;;  %v2087_v22 = vld [vmem:[%s3423_s9 + $0x10] sm:$0xff]  ;;  %v2088_v33 = vld [vmem:[%s3423_s9 + $0x18] sm:$0xff] }
  0x94   :  { %v500_v26 = vsel %vm489_vm11, nan, %v499_v25  ;;  %v912_v27 = vsel %vm489_vm11, nan, %v911_v31  ;;  %v2089_v17 = vld [vmem:[%s3423_s9 + $0x20] sm:$0xff]  ;;  %v2091_v32 = vld [vmem:[%s3423_s9 + $0x30] sm:$0xff]  ;;  %v2090_v25 = vld [vmem:[%s3423_s9 + $0x28] sm:$0xff] }
  0x95   :  { %v922_v29 = vrot.slane %v500_v26, 5  ;;  %v938_v30 = vrot.slane %v912_v27, 7  ;;  %1247 = vperm.xlu0 %2614, %v1181_v63  }
  0x97   :  { %v923_v34 = vsel %vm70_vm0, %v920_v46, %v922_v29  ;;  %v945_v44 = vsel %vm74_vm2, %v922_v29, %v933_v13  ;;  %v939_v37 = vsel %vm74_vm2, %v936_v2, %v938_v30  ;;  %v2617_v13 = vld [vmem:[%s3419_s1 + $0x8] sm:$0xff]   ;;  %1252 = vperm.xlu1 %2615, %v1182_v52  }
  0x98   :  { %v3111_v45 = vpack.c.bf16 %v923_v34, %v921_v28  ;;  %v3114_v39 = vpack.c.bf16 %v3074_v23, %v945_v44  ;;  %v946_v14 = vsel %vm78_vm4, %v939_v37, 1.0  ;;  %v2620_v23 = vld [vmem:[%s3419_s1 + $0x20] sm:$0xff]   ;;  %v2086_v46 = vld [vmem:[%s3423_s9 + $0x8] sm:$0xff] }
  0x99   :  { %v3123_v41 = vpack.c.bf16 %v946_v14, %v937_v56  ;;  %1257 = vperm.xlu0 %2614, %v1183_v61  }
  0x9a   :  { %2409 = vmatprep.subr.bf16.mxu0 %v3111_v45 }
  0x9b   :  { %2410 = vmatpush3.bf16.msra.mxu0 %v3111_v45  ;;  %1262 = vperm.xlu1 %2615, %v1184_v5  }
  0x9c   :  { %2411 = vmatprep.subr.bf16.mxu0 %v3114_v39 }
  0x9d   :  { %1468 = vperm.xlu0 %2614, %v1450_v54  }
  0x9f   :  { %2412 = vmatpush3.bf16.msra.mxu0 %v3114_v39  ;;  %1473 = vperm.xlu1 %2615, %v1451_v21  }
  0xa0   :  { %2413 = vmatprep.subr.bf16.mxu0 %v3123_v41 }
  0xa1   :  { %1478 = vperm.xlu0 %2614, %v1452_v18  }
  0xa3   :  { %2414 = vmatpush3.bf16.msra.mxu0 %v3123_v41  ;;  %1483 = vperm.xlu1 %2615, %v1453_v4   ;;  %v2626_v4 = vld [vmem:[%s3420_s2 + $0x10] sm:$0xff]  }
  0xa5   :  { %1488 = vperm.xlu0 %2614, %v1454_v15   ;;  %v2625_v15 = vld [vmem:[%s3420_s2 + $0x8] sm:$0xff]  }
  0xa6   :  { %2416 = vmatmul.mubr.msk.bf16.vlgmr.msra.gmra.mrb[0].mxu0 %vm1007_vm6, %v2617_v13 }
  0xa7   :  { %2419 = vmatprep.mubr.msk.bf16.mxu0 %vm1007_vm6, %v2618_v20  ;;  %1493 = vperm.xlu1 %2615, %v1455_v57   ;;  %v2628_v57 = vld [vmem:[%s3420_s2 + $0x20] sm:$0xff]  }
  0xa9   :  { %1498 = vperm.xlu0 %2614, %v1456_v48   ;;  %v2627_v48 = vld [vmem:[%s3420_s2 + $0x18] sm:$0xff]  }
  0xab   :  { %1503 = vperm.xlu1 %2615, %v1457_v6   ;;  %v2630_v6 = vld [vmem:[%s3420_s2 + $0x30] sm:$0xff]  }
  0xad   :  { %1508 = vperm.xlu0 %2614, %v1458_v1   ;;  %v2629_v1 = vld [vmem:[%s3420_s2 + $0x28] sm:$0xff]  }
  0xae   :  { %2420 = vmatmul.mubr.msk.bf16.gmra.mrb[4].mxu0 %vm1007_vm6, %v2619_v0 }
  0xaf   :  { %2423 = vmatprep.mubr.msk.bf16.mxu0 %vm1007_vm6, %v2620_v23  ;;  %1513 = vperm.xlu1 %2615, %v1459_v35   ;;  %v2632_v35 = vld [vmem:[%s3424_s4] sm:$0xff]  }
  0xb1   :  { %1518 = vperm.xlu0 %2614, %v1460_v7   ;;  %v2631_v7 = vld [vmem:[%s3420_s2 + $0x38] sm:$0xff]  }
  0xb3   :  { %1523 = vperm.xlu1 %2615, %v1461_v10  }
  0xb5   :  { %1528 = vperm.xlu0 %2614, %v1462_v9  }
  0xb6   :  { %2424 = vmatmul.mubr.msk.bf16.gmra.mrb[8].mxu0 %vm1007_vm6, %v2621_v24 }
  0xb7   :  { %2427 = vmatprep.mubr.msk.bf16.mxu0 %vm1007_vm6, %v2622_v36  ;;  %1533 = vperm.xlu1 %2615, %v1463_v11  }
  0xb9   :  { %1538 = vperm.xlu0 %2614, %v1464_v58  }
  0xbb   :  { %1543 = vperm.xlu1 %2615, %v1465_v8  }
  0xbd   :  { %2095 = vperm.xlu0 %2614, %v2085_v16  }
  0xbe   :  { %2428 = vmatmul.mubr.msk.bf16.gmra.mrb[12].mxu0 %vm1007_vm6, %v2623_v42 }
  0xbf   :  { %2100 = vperm.xlu1 %2615, %v2086_v46   ;;  %2479 = vmatprep.mubr.bf16.mxu0 %v2632_v35 }
  0xc1   :  { %2105 = vperm.xlu0 %2614, %v2087_v22  }
  0xc3   :  { %2110 = vperm.xlu1 %2615, %v2088_v33  }
  0xc5   :  { %2115 = vperm.xlu0 %2614, %v2089_v17  }
  0xc7   :  { %2120 = vperm.xlu1 %2615, %v2090_v25  }
  0xc9   :  { %2125 = vperm.xlu0 %2614, %v2091_v32  }
  0xfc   :  { %v1188_v9 = vpop.permute.xlu0 %1187 }
  0xfe   :  { %v1198_v10 = vpop.permute.xlu1 %1197 }
 0x100   :  { %v1193_v58 = vpop.permute.xlu0 %1192 }
 0x102   :  { %v1203_v11 = vpop.permute.xlu1 %1202 }
 0x104   :  { %v1208_v16 = vpop.permute.xlu0 %1207 }
 0x106   :  { %v1213_v8 = vpop.permute.xlu1 %1212 }
 0x108   :  { %v1218_v22 = vpop.permute.xlu0 %1217 }
 0x10a   :  { %v1223_v32 = vpop.permute.xlu1 %1222 }
 0x179   :  { %v2417_v31 = vpop.f32.mrb[0].mxu0 }
 0x17a   :  { %v1066_v2 = vpop.f32.mrb[1].mxu0  ;;  %v1131_v27 = vmax.f32 %v2417_v31, 0.0 }
 0x17b   :  { %v2418_v26 = vpop.f32.mrb[2].mxu0  ;;  %v1129_v30 = vmax.f32 %v1066_v2, 0.0 }
 0x17c   :  { %v1132_v28 = vmax.f32 %v2418_v26, 0.0  ;;  %v1069_v29 = vpop.f32.mrb[3].mxu0 }
 0x17d   :  { %v1130_v34 = vmax.f32 %v1069_v29, 0.0 }
 0x17e   :  { %v1146_v44 = vpack.c.bf16 %v1132_v28, %v1131_v27 }
 0x17f   :  { %v1145_v37 = vpack.c.bf16 %v1130_v34, %v1129_v30  ;;  %v1228_v30 = vpop.permute.xlu0 %1227 }
 0x181   :  { %v2421_v56 = vpop.f32.mrb[4].mxu0  ;;  %2431 = vmatprep.subr.bf16.mxu1 %v1145_v37 }
 0x182   :  { %v1082_v14 = vpop.f32.mrb[5].mxu0  ;;  %2432 = vmatpush3.bf16.msra.mxu1 %v1145_v37  ;;  %v1135_v20 = vmax.f32 %v2421_v56, 0.0  ;;  %v1233_v56 = vpop.permute.xlu1 %1232 }
 0x183   :  { %v2422_v13 = vpop.f32.mrb[6].mxu0  ;;  %2433 = vmatprep.subr.bf16.mxu1 %v1146_v44  ;;  %v1133_v24 = vmax.f32 %v1082_v14, 0.0 }
 0x184   :  { %v1136_v0 = vmax.f32 %v2422_v13, 0.0  ;;  %v1085_v23 = vpop.f32.mrb[7].mxu0 }
 0x185   :  { %v1134_v36 = vmax.f32 %v1085_v23, 0.0 }
 0x186   :  { %v1148_v42 = vpack.c.bf16 %v1136_v0, %v1135_v20  ;;  %2434 = vmatpush3.bf16.msra.mxu1 %v1146_v44 }
 0x187   :  { %v1147_v38 = vpack.c.bf16 %v1134_v36, %v1133_v24 }
 0x189   :  { %v2425_v43 = vpop.f32.mrb[8].mxu0  ;;  %2435 = vmatprep.subr.bf16.mxu1 %v1147_v38 }
 0x18a   :  { %v1098_v47 = vpop.f32.mrb[9].mxu0  ;;  %2436 = vmatpush3.bf16.msra.mxu1 %v1147_v38  ;;  %v1139_v51 = vmax.f32 %v2425_v43, 0.0  ;;  %v1238_v38 = vpop.permute.xlu0 %1237 }
 0x18b   :  { %v2426_v49 = vpop.f32.mrb[10].mxu0  ;;  %2437 = vmatprep.subr.bf16.mxu1 %v1148_v42  ;;  %v1137_v59 = vmax.f32 %v1098_v47, 0.0 }
 0x18c   :  { %v1140_v53 = vmax.f32 %v2426_v49, 0.0  ;;  %v1101_v55 = vpop.f32.mrb[11].mxu0 }
 0x18d   :  { %v1138_v12 = vmax.f32 %v1101_v55, 0.0 }
 0x18e   :  { %v1150_v19 = vpack.c.bf16 %v1140_v53, %v1139_v51  ;;  %2438 = vmatpush3.bf16.msra.mxu1 %v1148_v42  ;;  %v1243_v51 = vpop.permute.xlu1 %1242 }
 0x18f   :  { %v1149_v50 = vpack.c.bf16 %v1138_v12, %v1137_v59 }
 0x191   :  { %v2429_v40 = vpop.f32.mrb[12].mxu0  ;;  %2439 = vmatprep.subr.bf16.mxu1 %v1149_v50 }
 0x192   :  { %v1114_v62 = vpop.f32.mrb[13].mxu0  ;;  %2440 = vmatpush3.bf16.msra.mxu1 %v1149_v50  ;;  %v1143_v3 = vmax.f32 %v2429_v40, 0.0 }
 0x193   :  { %v2430_v63 = vpop.f32.mrb[14].mxu0  ;;  %2441 = vmatprep.subr.bf16.mxu1 %v1150_v19  ;;  %v1141_v54 = vmax.f32 %v1114_v62, 0.0  ;;  %v1248_v62 = vpop.permute.xlu0 %1247 }
 0x194   :  { %v1144_v61 = vmax.f32 %v2430_v63, 0.0  ;;  %v1117_v52 = vpop.f32.mrb[15].mxu0 }
 0x195   :  { %v1142_v5 = vmax.f32 %v1117_v52, 0.0 }
 0x196   :  { %v1152_v18 = vpack.c.bf16 %v1144_v61, %v1143_v3  ;;  %2442 = vmatpush3.bf16.msra.mxu1 %v1150_v19 }
 0x197   :  { %v1151_v21 = vpack.c.bf16 %v1142_v5, %v1141_v54  ;;  %v1253_v54 = vpop.permute.xlu1 %1252 }
 0x199   :  { %2443 = vmatprep.subr.bf16.mxu1 %v1151_v21 }
 0x19a   :  { %2444 = vmatpush3.bf16.msra.mxu1 %v1151_v21 }
 0x19b   :  { %2445 = vmatprep.subr.bf16.mxu1 %v1152_v18 }
 0x19e   :  { %2446 = vmatpush3.bf16.msra.mxu1 %v1152_v18 }
 0x1a1   :  { %2448 = vmatmul.mubr.bf16.vlgmr.msra.gmra.mrb[0].mxu1 %v2625_v15 }
 0x1a2   :  { %2451 = vmatprep.mubr.bf16.mxu1 %v2626_v4 }
 0x1a9   :  { %2452 = vmatmul.mubr.bf16.gmra.mrb[4].mxu1 %v2627_v48 }
 0x1aa   :  { %2455 = vmatprep.mubr.bf16.mxu1 %v2628_v57  ;;  %v1258_v57 = vpop.permute.xlu0 %1257 }
 0x1b1   :  { %2456 = vmatmul.mubr.bf16.gmra.mrb[8].mxu1 %v2629_v1 }
 0x1b2   :  { %2459 = vmatprep.mubr.bf16.mxu1 %v2630_v6 }
 0x1b9   :  { %2460 = vmatmul.mubr.bf16.gmra.mrb[12].mxu1 %v2631_v7 }
 0x274   :  { %v2449_v46 = vpop.f32.mrb[0].mxu1 }
 0x275   :  { %v1356_v17 = vadd.f32 %v2449_v46, %v1198_v10  ;;  %v1347_v33 = vpop.f32.mrb[1].mxu1 }
 0x276   :  { %v1348_v25 = vadd.f32 %v1347_v33, %v1188_v9  ;;  %v2450_v31 = vpop.f32.mrb[2].mxu1  ;;  %v1263_v9 = vpop.permute.xlu1 %1262 }
 0x277   :  { %v1359_v2 = vadd.f32 %v2450_v31, %v1203_v11  ;;  %v1350_v26 = vpop.f32.mrb[3].mxu1  ;;  %v1412_v28 = vmax.f32 %v1356_v17, 0.0  ;;  %v2633_v31 = vld [vmem:[%s3424_s4 + $0x8] sm:$0xff]  }
 0x278   :  { %v1351_v27 = vadd.f32 %v1350_v26, %v1193_v58  ;;  %v1410_v34 = vmax.f32 %v1348_v25, 0.0  ;;  %v2635_v26 = vld [vmem:[%s3424_s4 + $0x18] sm:$0xff]  }
 0x279   :  { %v1413_v29 = vmax.f32 %v1359_v2, 0.0  ;;  %v2634_v2 = vld [vmem:[%s3424_s4 + $0x10] sm:$0xff]  }
 0x27a   :  { %v1411_v44 = vmax.f32 %v1351_v27, 0.0  ;;  %v2636_v27 = vld [vmem:[%s3424_s4 + $0x20] sm:$0xff]  }
 0x27b   :  { %v1427_v37 = vpack.c.bf16 %v1413_v29, %v1412_v28  ;;  %v2637_v28 = vld [vmem:[%s3424_s4 + $0x28] sm:$0xff]   ;;  %v2638_v29 = vld [vmem:[%s3424_s4 + $0x30] sm:$0xff]  }
 0x27c   :  { %v1426_v14 = vpack.c.bf16 %v1411_v44, %v1410_v34  ;;  %v2453_v13 = vpop.f32.mrb[4].mxu1  ;;  %v2640_v34 = vld [vmem:[%s3425_s7] sm:$0xff]   ;;  %v1469_v44 = vpop.permute.xlu0 %1468 }
 0x27d   :  { %v1372_v20 = vadd.f32 %v2453_v13, %v1218_v22  ;;  %v1363_v0 = vpop.f32.mrb[5].mxu1  ;;  %2511 = vmatprep.mubr.bf16.mxu1 %v2640_v34 }
 0x27e   :  { %v1364_v23 = vadd.f32 %v1363_v0, %v1208_v16  ;;  %v2454_v24 = vpop.f32.mrb[6].mxu1  ;;  %2463 = vmatprep.subr.bf16.mxu0 %v1426_v14 }
 0x27f   :  { %v1375_v36 = vadd.f32 %v2454_v24, %v1223_v32  ;;  %v1366_v42 = vpop.f32.mrb[7].mxu1  ;;  %2464 = vmatpush3.bf16.msra.mxu0 %v1426_v14  ;;  %v1416_v47 = vmax.f32 %v1372_v20, 0.0 }
 0x280   :  { %v1367_v43 = vadd.f32 %v1366_v42, %v1213_v8  ;;  %2465 = vmatprep.subr.bf16.mxu0 %v1427_v37  ;;  %v1414_v53 = vmax.f32 %v1364_v23, 0.0 }
 0x281   :  { %v1417_v49 = vmax.f32 %v1375_v36, 0.0 }
 0x282   :  { %v1415_v55 = vmax.f32 %v1367_v43, 0.0 }
 0x283   :  { %v1429_v59 = vpack.c.bf16 %v1417_v49, %v1416_v47  ;;  %2466 = vmatpush3.bf16.msra.mxu0 %v1427_v37  ;;  %v1474_v37 = vpop.permute.xlu1 %1473 }
 0x284   :  { %v1428_v12 = vpack.c.bf16 %v1415_v55, %v1414_v53  ;;  %v2457_v19 = vpop.f32.mrb[8].mxu1 }
 0x285   :  { %v1388_v50 = vadd.f32 %v2457_v19, %v1238_v38  ;;  %v1379_v40 = vpop.f32.mrb[9].mxu1 }
 0x286   :  { %v1380_v63 = vadd.f32 %v1379_v40, %v1228_v30  ;;  %v2458_v3 = vpop.f32.mrb[10].mxu1  ;;  %2467 = vmatprep.subr.bf16.mxu0 %v1428_v12  ;;  %v2639_v30 = vld [vmem:[%s3424_s4 + $0x38] sm:$0xff]  }
 0x287   :  { %v1391_v61 = vadd.f32 %v2458_v3, %v1243_v51  ;;  %v1382_v52 = vpop.f32.mrb[11].mxu1  ;;  %2468 = vmatpush3.bf16.msra.mxu0 %v1428_v12  ;;  %v1420_v18 = vmax.f32 %v1388_v50, 0.0  ;;  %v1484_v14 = vpop.permute.xlu1 %1483 }
 0x288   :  { %v1383_v5 = vadd.f32 %v1382_v52, %v1233_v56  ;;  %2469 = vmatprep.subr.bf16.mxu0 %v1429_v59  ;;  %v1418_v15 = vmax.f32 %v1380_v63, 0.0  ;;  %v1479_v56 = vpop.permute.xlu0 %1478 }
 0x289   :  { %v1421_v21 = vmax.f32 %v1391_v61, 0.0 }
 0x28a   :  { %v1419_v4 = vmax.f32 %v1383_v5, 0.0 }
 0x28b   :  { %v1431_v48 = vpack.c.bf16 %v1421_v21, %v1420_v18  ;;  %2470 = vmatpush3.bf16.msra.mxu0 %v1429_v59  ;;  %v1494_v20 = vpop.permute.xlu1 %1493 }
 0x28c   :  { %v1430_v1 = vpack.c.bf16 %v1419_v4, %v1418_v15  ;;  %v2461_v6 = vpop.f32.mrb[12].mxu1  ;;  %v1489_v13 = vpop.permute.xlu0 %1488 }
 0x28d   :  { %v1404_v7 = vadd.f32 %v2461_v6, %v1258_v57  ;;  %v1395_v35 = vpop.f32.mrb[13].mxu1 }
 0x28e   :  { %v1396_v10 = vadd.f32 %v1395_v35, %v1248_v62  ;;  %v2462_v58 = vpop.f32.mrb[14].mxu1  ;;  %2471 = vmatprep.subr.bf16.mxu0 %v1430_v1 }
 0x28f   :  { %v1407_v11 = vadd.f32 %v2462_v58, %v1263_v9  ;;  %v1398_v16 = vpop.f32.mrb[15].mxu1  ;;  %2472 = vmatpush3.bf16.msra.mxu0 %v1430_v1  ;;  %v1424_v22 = vmax.f32 %v1404_v7, 0.0  ;;  %v1504_v42 = vpop.permute.xlu1 %1503 }
 0x290   :  { %v1399_v8 = vadd.f32 %v1398_v16, %v1253_v54  ;;  %2473 = vmatprep.subr.bf16.mxu0 %v1431_v48  ;;  %v1422_v17 = vmax.f32 %v1396_v10, 0.0  ;;  %v1499_v0 = vpop.permute.xlu0 %1498 }
 0x291   :  { %v1425_v46 = vmax.f32 %v1407_v11, 0.0 }
 0x292   :  { %v1423_v33 = vmax.f32 %v1399_v8, 0.0 }
 0x293   :  { %v1433_v32 = vpack.c.bf16 %v1425_v46, %v1424_v22  ;;  %2474 = vmatpush3.bf16.msra.mxu0 %v1431_v48  ;;  %v1514_v40 = vpop.permute.xlu1 %1513 }
 0x294   :  { %v1432_v25 = vpack.c.bf16 %v1423_v33, %v1422_v17  ;;  %v1509_v59 = vpop.permute.xlu0 %1508 }
 0x296   :  { %2475 = vmatprep.subr.bf16.mxu0 %v1432_v25 }
 0x297   :  { %2476 = vmatpush3.bf16.msra.mxu0 %v1432_v25  ;;  %v1524_v57 = vpop.permute.xlu1 %1523 }
 0x298   :  { %2477 = vmatprep.subr.bf16.mxu0 %v1433_v32  ;;  %v1519_v21 = vpop.permute.xlu0 %1518 }
 0x29b   :  { %2478 = vmatpush3.bf16.msra.mxu0 %v1433_v32  ;;  %v1534_v17 = vpop.permute.xlu1 %1533 }
 0x29c   :  { %v1529_v11 = vpop.permute.xlu0 %1528 }
 0x29e   :  { %2480 = vmatmul.mubr.bf16.vlgmr.msra.gmra.mrb[16].mxu0 %v2633_v31 }
 0x29f   :  { %2483 = vmatprep.mubr.bf16.mxu0 %v2634_v2 }
 0x2a6   :  { %2484 = vmatmul.mubr.bf16.gmra.mrb[20].mxu0 %v2635_v26 }
 0x2a7   :  { %2487 = vmatprep.mubr.bf16.mxu0 %v2636_v27  ;;  %v1539_v27 = vpop.permute.xlu0 %1538 }
 0x2ae   :  { %2488 = vmatmul.mubr.bf16.gmra.mrb[24].mxu0 %v2637_v28 }
 0x2af   :  { %2491 = vmatprep.mubr.bf16.mxu0 %v2638_v29 }
 0x2b6   :  { %2492 = vmatmul.mubr.bf16.gmra.mrb[28].mxu0 %v2639_v30 }
 0x371   :  { %v2481_v23 = vpop.f32.mrb[16].mxu0 }
 0x372   :  { %v1637_v24 = vadd.f32 %v2481_v23, %v1479_v56  ;;  %v1628_v36 = vpop.f32.mrb[17].mxu0 }
 0x373   :  { %v1629_v38 = vadd.f32 %v1628_v36, %v1469_v44  ;;  %v2482_v43 = vpop.f32.mrb[18].mxu0  ;;  %v1544_v44 = vpop.permute.xlu1 %1543 }
 0x374   :  { %v1640_v47 = vadd.f32 %v2482_v43, %v1484_v14  ;;  %v1631_v49 = vpop.f32.mrb[19].mxu0  ;;  %v1693_v53 = vmax.f32 %v1637_v24, 0.0  ;;  %v2641_v43 = vld [vmem:[%s3425_s7 + $0x8] sm:$0xff]  }
 0x375   :  { %v1632_v51 = vadd.f32 %v1631_v49, %v1474_v37  ;;  %v1691_v12 = vmax.f32 %v1629_v38, 0.0  ;;  %v2643_v49 = vld [vmem:[%s3425_s7 + $0x18] sm:$0xff]  }
 0x376   :  { %v1694_v55 = vmax.f32 %v1640_v47, 0.0  ;;  %v2642_v47 = vld [vmem:[%s3425_s7 + $0x10] sm:$0xff]  }
 0x377   :  { %v1692_v19 = vmax.f32 %v1632_v51, 0.0  ;;  %v2644_v51 = vld [vmem:[%s3425_s7 + $0x20] sm:$0xff]  }
 0x378   :  { %v1708_v50 = vpack.c.bf16 %v1694_v55, %v1693_v53  ;;  %v2647_v53 = vld [vmem:[%s3425_s7 + $0x38] sm:$0xff]   ;;  %v2649_v55 = vld [vmem:[%s3426_s6 + $0x8] sm:$0xff]  }
 0x379   :  { %v1707_v62 = vpack.c.bf16 %v1692_v19, %v1691_v12  ;;  %v2485_v63 = vpop.f32.mrb[20].mxu0  ;;  %v2652_v12 = vld [vmem:[%s3426_s6 + $0x20] sm:$0xff]   ;;  %v2653_v19 = vld [vmem:[%s3426_s6 + $0x28] sm:$0xff]  }
 0x37a   :  { %v1653_v3 = vadd.f32 %v2485_v63, %v1499_v0  ;;  %v1644_v61 = vpop.f32.mrb[21].mxu0 }
 0x37b   :  { %v1645_v52 = vadd.f32 %v1644_v61, %v1489_v13  ;;  %v2486_v54 = vpop.f32.mrb[22].mxu0  ;;  %2495 = vmatprep.subr.bf16.mxu1 %v1707_v62 }
 0x37c   :  { %v1656_v5 = vadd.f32 %v2486_v54, %v1504_v42  ;;  %v1647_v18 = vpop.f32.mrb[23].mxu0  ;;  %2496 = vmatpush3.bf16.msra.mxu1 %v1707_v62  ;;  %v1697_v4 = vmax.f32 %v1653_v3, 0.0  ;;  %v2656_v62 = vld [vmem:[%s3427_s8] sm:$0xff]  }
 0x37d   :  { %v1648_v15 = vadd.f32 %v1647_v18, %v1494_v20  ;;  %2497 = vmatprep.subr.bf16.mxu1 %v1708_v50  ;;  %v1695_v1 = vmax.f32 %v1645_v52, 0.0  ;;  %2567 = vmatprep.mubr.bf16.mxu0 %v2656_v62 }
 0x37e   :  { %v1698_v48 = vmax.f32 %v1656_v5, 0.0 }
 0x37f   :  { %v1696_v6 = vmax.f32 %v1648_v15, 0.0 }
 0x380   :  { %v1710_v7 = vpack.c.bf16 %v1698_v48, %v1697_v4  ;;  %2498 = vmatpush3.bf16.msra.mxu1 %v1708_v50  ;;  %v2654_v50 = vld [vmem:[%s3426_s6 + $0x30] sm:$0xff]  }
 0x381   :  { %v1709_v35 = vpack.c.bf16 %v1696_v6, %v1695_v1  ;;  %v2489_v9 = vpop.f32.mrb[24].mxu0 }
 0x382   :  { %v1669_v10 = vadd.f32 %v2489_v9, %v1519_v21  ;;  %v1660_v58 = vpop.f32.mrb[25].mxu0 }
 0x383   :  { %v1661_v16 = vadd.f32 %v1660_v58, %v1509_v59  ;;  %v2490_v8 = vpop.f32.mrb[26].mxu0  ;;  %2499 = vmatprep.subr.bf16.mxu1 %v1709_v35  ;;  %v2651_v59 = vld [vmem:[%s3426_s6 + $0x18] sm:$0xff]  }
 0x384   :  { %v1672_v22 = vadd.f32 %v2490_v8, %v1524_v57  ;;  %v1663_v46 = vpop.f32.mrb[27].mxu0  ;;  %2500 = vmatpush3.bf16.msra.mxu1 %v1709_v35  ;;  %v1701_v32 = vmax.f32 %v1669_v10, 0.0 }
 0x385   :  { %v1664_v33 = vadd.f32 %v1663_v46, %v1514_v40  ;;  %2501 = vmatprep.subr.bf16.mxu1 %v1710_v7  ;;  %v1699_v31 = vmax.f32 %v1661_v16, 0.0  ;;  %v2655_v40 = vld [vmem:[%s3426_s6 + $0x38] sm:$0xff]  }
 0x386   :  { %v1702_v25 = vmax.f32 %v1672_v22, 0.0 }
 0x387   :  { %v1700_v2 = vmax.f32 %v1664_v33, 0.0 }
 0x388   :  { %v1712_v26 = vpack.c.bf16 %v1702_v25, %v1701_v32  ;;  %2502 = vmatpush3.bf16.msra.mxu1 %v1710_v7 }
 0x389   :  { %v1711_v28 = vpack.c.bf16 %v1700_v2, %v1699_v31  ;;  %v2493_v29 = vpop.f32.mrb[28].mxu0 }
 0x38a   :  { %v1685_v30 = vadd.f32 %v2493_v29, %v1539_v27  ;;  %v1676_v34 = vpop.f32.mrb[29].mxu0 }
 0x38b   :  { %v1677_v37 = vadd.f32 %v1676_v34, %v1529_v11  ;;  %v2494_v56 = vpop.f32.mrb[30].mxu0  ;;  %2503 = vmatprep.subr.bf16.mxu1 %v1711_v28 }
 0x38c   :  { %v1688_v14 = vadd.f32 %v2494_v56, %v1544_v44  ;;  %v1679_v13 = vpop.f32.mrb[31].mxu0  ;;  %2504 = vmatpush3.bf16.msra.mxu1 %v1711_v28  ;;  %v1705_v0 = vmax.f32 %v1685_v30, 0.0 }
 0x38d   :  { %v1680_v20 = vadd.f32 %v1679_v13, %v1534_v17  ;;  %2505 = vmatprep.subr.bf16.mxu1 %v1712_v26  ;;  %v1703_v24 = vmax.f32 %v1677_v37, 0.0  ;;  %v2657_v13 = vld [vmem:[%s3427_s8 + $0x8] sm:$0xff]  }
 0x38e   :  { %v1706_v23 = vmax.f32 %v1688_v14, 0.0 }
 0x38f   :  { %v1704_v36 = vmax.f32 %v1680_v20, 0.0  ;;  %v2658_v20 = vld [vmem:[%s3427_s8 + $0x10] sm:$0xff]  }
 0x390   :  { %v1714_v42 = vpack.c.bf16 %v1706_v23, %v1705_v0  ;;  %2506 = vmatpush3.bf16.msra.mxu1 %v1712_v26  ;;  %v2659_v0 = vld [vmem:[%s3427_s8 + $0x18] sm:$0xff]   ;;  %v2096_v23 = vpop.permute.xlu0 %2095 }
 0x391   :  { %v1713_v38 = vpack.c.bf16 %v1704_v36, %v1703_v24  ;;  %v2101_v36 = vpop.permute.xlu1 %2100 }
 0x393   :  { %2507 = vmatprep.subr.bf16.mxu1 %v1713_v38 }
 0x394   :  { %2508 = vmatpush3.bf16.msra.mxu1 %v1713_v38  ;;  %v2106_v24 = vpop.permute.xlu0 %2105 }
 0x395   :  { %2509 = vmatprep.subr.bf16.mxu1 %v1714_v42 }
 0x398   :  { %2510 = vmatpush3.bf16.msra.mxu1 %v1714_v42  ;;  %v2116_v38 = vpop.permute.xlu0 %2115 }
 0x399   :  { %2527 = vmatprep.subr.bf16.mxu1 %v3065_v60 }
 0x39b   :  { %2512 = vmatmul.mubr.bf16.vlgmr.msra.gmra.mrb[16].mxu1 %v2641_v43 }
 0x39c   :  { %2528 = vmatpush3.bf16.msra.mxu1 %v3065_v60  ;;  %2515 = vmatprep.mubr.bf16.mxu1 %v2642_v47  ;;  %v2645_v60 = vld [vmem:[%s3425_s7 + $0x28] sm:$0xff]  }
 0x39d   :  { %2529 = vmatprep.subr.bf16.mxu1 %v3111_v45 }
 0x3a0   :  { %2530 = vmatpush3.bf16.msra.mxu1 %v3111_v45  ;;  %v2646_v45 = vld [vmem:[%s3425_s7 + $0x30] sm:$0xff]  }
 0x3a1   :  { %2531 = vmatprep.subr.bf16.mxu1 %v3114_v39 }
 0x3a3   :  { %2516 = vmatmul.mubr.bf16.gmra.mrb[20].mxu1 %v2643_v49  ;;  %v2111_v49 = vpop.permute.xlu1 %2110 }
 0x3a4   :  { %2519 = vmatprep.mubr.bf16.mxu1 %v2644_v51  ;;  %2532 = vmatpush3.bf16.msra.mxu1 %v3114_v39  ;;  %v2648_v39 = vld [vmem:[%s3426_s6] sm:$0xff]  }
 0x3a5   :  { %2533 = vmatprep.subr.bf16.mxu1 %v3123_v41 }
 0x3a8   :  { %2534 = vmatpush3.bf16.msra.mxu1 %v3123_v41  ;;  %v2650_v41 = vld [vmem:[%s3426_s6 + $0x10] sm:$0xff]  }
 0x3ab   :  { %2520 = vmatmul.mubr.bf16.gmra.mrb[24].mxu1 %v2645_v60 }
 0x3ac   :  { %2523 = vmatprep.mubr.bf16.mxu1 %v2646_v45 }
 0x3b3   :  { %2524 = vmatmul.mubr.bf16.gmra.mrb[28].mxu1 %v2647_v53 }
 0x3b4   :  { %2535 = vmatprep.mubr.msk.bf16.mxu1 %vm1007_vm6, %v2648_v39 }
 0x3bb   :  { %2536 = vmatmul.mubr.msk.bf16.vlgmr.msra.gmra.mrb[16].mxu1 %vm1007_vm6, %v2649_v55  ;;  %v2126_v55 = vpop.permute.xlu0 %2125 }
 0x3bc   :  { %2539 = vmatprep.mubr.msk.bf16.mxu1 %vm1007_vm6, %v2650_v41 }
 0x3c3   :  { %2540 = vmatmul.mubr.msk.bf16.gmra.mrb[20].mxu1 %vm1007_vm6, %v2651_v59 }
 0x3c4   :  { %2543 = vmatprep.mubr.msk.bf16.mxu1 %vm1007_vm6, %v2652_v12 }
 0x3cb   :  { %2544 = vmatmul.mubr.msk.bf16.gmra.mrb[24].mxu1 %vm1007_vm6, %v2653_v19 }
 0x3cc   :  { %2547 = vmatprep.mubr.msk.bf16.mxu1 %vm1007_vm6, %v2654_v50 }
 0x3d3   :  { %2548 = vmatmul.mubr.msk.bf16.gmra.mrb[28].mxu1 %vm1007_vm6, %v2655_v40  ;;  %v2121_v40 = vpop.permute.xlu1 %2120 }
 0x48e   :  { %v2537_v63 = vpop.f32.mrb[16].mxu1 }
 0x48f   :  { %v1990_v3 = vpop.f32.mrb[17].mxu1  ;;  %v2055_v52 = vmax.f32 %v2537_v63, 0.0 }
 0x490   :  { %v2538_v61 = vpop.f32.mrb[18].mxu1  ;;  %v2053_v18 = vmax.f32 %v1990_v3, 0.0 }
 0x491   :  { %v2056_v54 = vmax.f32 %v2538_v61, 0.0  ;;  %v1993_v5 = vpop.f32.mrb[19].mxu1 }
 0x492   :  { %v2054_v21 = vmax.f32 %v1993_v5, 0.0 }
 0x493   :  { %v2070_v15 = vpack.c.bf16 %v2056_v54, %v2055_v52 }
 0x494   :  { %v2069_v4 = vpack.c.bf16 %v2054_v21, %v2053_v18 }
 0x496   :  { %v2541_v48 = vpop.f32.mrb[20].mxu1  ;;  %2551 = vmatprep.subr.bf16.mxu0 %v2069_v4 }
 0x497   :  { %v2006_v57 = vpop.f32.mrb[21].mxu1  ;;  %2552 = vmatpush3.bf16.msra.mxu0 %v2069_v4  ;;  %v2059_v6 = vmax.f32 %v2541_v48, 0.0 }
 0x498   :  { %v2542_v1 = vpop.f32.mrb[22].mxu1  ;;  %2553 = vmatprep.subr.bf16.mxu0 %v2070_v15  ;;  %v2057_v9 = vmax.f32 %v2006_v57, 0.0 }
 0x499   :  { %v2060_v7 = vmax.f32 %v2542_v1, 0.0  ;;  %v2009_v35 = vpop.f32.mrb[23].mxu1 }
 0x49a   :  { %v2058_v10 = vmax.f32 %v2009_v35, 0.0 }
 0x49b   :  { %v2072_v58 = vpack.c.bf16 %v2060_v7, %v2059_v6  ;;  %2554 = vmatpush3.bf16.msra.mxu0 %v2070_v15 }
 0x49c   :  { %v2071_v11 = vpack.c.bf16 %v2058_v10, %v2057_v9 }
 0x49e   :  { %v2545_v16 = vpop.f32.mrb[24].mxu1  ;;  %2555 = vmatprep.subr.bf16.mxu0 %v2071_v11 }
 0x49f   :  { %v2022_v8 = vpop.f32.mrb[25].mxu1  ;;  %2556 = vmatpush3.bf16.msra.mxu0 %v2071_v11  ;;  %v2063_v46 = vmax.f32 %v2545_v16, 0.0 }
 0x4a0   :  { %v2546_v22 = vpop.f32.mrb[26].mxu1  ;;  %2557 = vmatprep.subr.bf16.mxu0 %v2072_v58  ;;  %v2061_v32 = vmax.f32 %v2022_v8, 0.0 }
 0x4a1   :  { %v2064_v17 = vmax.f32 %v2546_v22, 0.0  ;;  %v2025_v33 = vpop.f32.mrb[27].mxu1 }
 0x4a2   :  { %v2062_v25 = vmax.f32 %v2025_v33, 0.0 }
 0x4a3   :  { %v2074_v31 = vpack.c.bf16 %v2064_v17, %v2063_v46  ;;  %2558 = vmatpush3.bf16.msra.mxu0 %v2072_v58 }
 0x4a4   :  { %v2073_v2 = vpack.c.bf16 %v2062_v25, %v2061_v32 }
 0x4a6   :  { %v2549_v26 = vpop.f32.mrb[28].mxu1  ;;  %2559 = vmatprep.subr.bf16.mxu0 %v2073_v2 }
 0x4a7   :  { %v2038_v27 = vpop.f32.mrb[29].mxu1  ;;  %2560 = vmatpush3.bf16.msra.mxu0 %v2073_v2  ;;  %v2067_v29 = vmax.f32 %v2549_v26, 0.0 }
 0x4a8   :  { %v2550_v28 = vpop.f32.mrb[30].mxu1  ;;  %2561 = vmatprep.subr.bf16.mxu0 %v2074_v31  ;;  %v2065_v44 = vmax.f32 %v2038_v27, 0.0 }
 0x4a9   :  { %v2068_v30 = vmax.f32 %v2550_v28, 0.0  ;;  %v2041_v34 = vpop.f32.mrb[31].mxu1 }
 0x4aa   :  { %v2066_v37 = vmax.f32 %v2041_v34, 0.0 }
 0x4ab   :  { %v2076_v56 = vpack.c.bf16 %v2068_v30, %v2067_v29  ;;  %2562 = vmatpush3.bf16.msra.mxu0 %v2074_v31 }
 0x4ac   :  { %v2075_v14 = vpack.c.bf16 %v2066_v37, %v2065_v44 }
 0x4ae   :  { %2563 = vmatprep.subr.bf16.mxu0 %v2075_v14 }
 0x4af   :  { %2564 = vmatpush3.bf16.msra.mxu0 %v2075_v14 }
 0x4b0   :  { %2565 = vmatprep.subr.bf16.mxu0 %v2076_v56 }
 0x4b3   :  { %2566 = vmatpush3.bf16.msra.mxu0 %v2076_v56 }
 0x4b6   :  { %2568 = vmatmul.mubr.bf16.vlgmr.msra.gmra.mrb[32].mxu0 %v2657_v13 }
 0x4b7   :  { %2571 = vmatprep.mubr.bf16.mxu0 %v2658_v20 }
 0x4be   :  { %2572 = vmatmul.mubr.bf16.gmra.mrb[36].mxu0 %v2659_v0 }
 0x589   :  { %v2569_v42 = vpop.f32.mrb[32].mxu0 }
 0x58a   :  { %v2199_v43 = vadd.f32 %v2569_v42, %v2106_v24  ;;  %v2190_v47 = vpop.f32.mrb[33].mxu0 }
 0x58b   :  { %v2191_v51 = vadd.f32 %v2190_v47, %v2096_v23  ;;  %v2570_v60 = vpop.f32.mrb[34].mxu0 }
 0x58c   :  { %2222 = vst [vmem:[%s3428_s10 + $0x10] sm:$0xff] %v2199_v43  ;;  %v2202_v45 = vadd.f32 %v2570_v60, %v2111_v49  ;;  %v2193_v53 = vpop.f32.mrb[35].mxu0 }
 0x58d   :  { %2220 = vst [vmem:[%s3428_s10] sm:$0xff] %v2191_v51  ;;  %v2194_v39 = vadd.f32 %v2193_v53, %v2101_v36 }
 0x58e   :  { %2223 = vst [vmem:[%s3428_s10 + $0x18] sm:$0xff] %v2202_v45 }
 0x58f   :  { %2221 = vst [vmem:[%s3428_s10 + $0x8] sm:$0xff] %v2194_v39 }
 0x591   :  { %v2573_v41 = vpop.f32.mrb[36].mxu0 }
 0x592   :  { %v2215_v59 = vadd.f32 %v2573_v41, %v2126_v55  ;;  %v2206_v12 = vpop.f32.mrb[37].mxu0 }
 0x593   :  { %v2207_v19 = vadd.f32 %v2206_v12, %v2116_v38  ;;  %v2574_v50 = vpop.f32.mrb[38].mxu0 }
 0x594   :  { %2226 = vst [vmem:[%s3428_s10 + $0x30] sm:$0x7f] %v2215_v59  ;;  %v2209_v62 = vpop.f32.mrb[39].mxu0 }
 0x595   :  { %2224 = vst [vmem:[%s3428_s10 + $0x20] sm:$0xff] %v2207_v19  ;;  %v2210_v63 = vadd.f32 %v2209_v62, %v2121_v40 }
 0x597   :  { %2225 = vst [vmem:[%s3428_s10 + $0x28] sm:$0xff] %v2210_v63 }

// kernel: _lbs_impl.1
= control target key start
LH: loop header
LB: loop body
LE: loop exit
PB: predicated region body
PF: predicated region fallthrough
CT: control target
= control target key end

     0   :  { %s2316_s13 = smov 0   ;;  %s2318_s14 = smov 0   ;;  %s2726_s0 = inlined_call_operand.vmem [shape: bf16[2,64,256], index: 0, kind: input, shape index: {}]   ;;  %s2727_s1 = inlined_call_operand.vmem [shape: bf16[128,64], index: 1, kind: input, shape index: {}]   ;;  %s2728_s2 = inlined_call_operand.vmem [shape: bf16[128,128], index: 2, kind: input, shape index: {}]   ;;  %s2729_s3 = inlined_call_operand.vmem [shape: f32[128,1], index: 3, kind: input, shape index: {}]   ;;  %s2730_s4 = inlined_call_operand.vmem [shape: bf16[128,128], index: 4, kind: input, shape index: {}]   ;;  %s2731_s5 = inlined_call_operand.vmem [shape: f32[128,1], index: 5, kind: input, shape index: {}]   ;;  %s2732_s6 = inlined_call_operand.vmem [shape: bf16[128,64], index: 6, kind: input, shape index: {}]   ;;  %s2733_s7 = inlined_call_operand.vmem [shape: bf16[128,128], index: 7, kind: input, shape index: {}]   ;;  %s2734_s8 = inlined_call_operand.vmem [shape: bf16[64,128], index: 8, kind: input, shape index: {}]   ;;  %s2735_s9 = inlined_call_operand.vmem [shape: f32[64,1], index: 9, kind: input, shape index: {}]   ;;  %s2736_s10 = inlined_call_operand.vmem [shape: f32[2,55,256], index: 10, kind: output, shape index: {}]  }
   0x1   :  { %s2320_s15 = smov 0  }
   0x2 LB: > { %s32_s16 = sadd.s32 1, %s2254_s14  ;;  %p2005_p0 = scmp.ge.s32.totalorder %s2258_s15, 1  ;;  %s2258_s15 = sphi %s2320_s15, %s20_s15   ;;  %s2254_s14 = sphi %s2318_s14, %s2738_s14   ;;  %s2250_s13 = sphi %s2316_s13, %s2737_s13  }
   0x3   : > { %p34_p1 = scmp.ge.s32.totalorder %s32_s16, 2  ;;  %p333_p2 = scmp.lt.s32.totalorder %s2258_s15, 3 }
   0x5   : > { %s2740_s16 = smov (%p34_p1, %s32_s16), 0  ;;  %p334_p3 = pnand %p2005_p0, %p333_p2 }
   0x6   : > { %p380_p4 = scmp.lt.s32.totalorder (!%p334_p3), %s2250_s13, 1  ;;  %v2260_v0 = vmov (!%p334_p3), 0   ;;  %vm504_vm0 = vcmask (!%p334_p3), 523264   ;;  %v2184_v9 = vld [vmem:[%s2727_s1] sm:$0xff] (!%p334_p3)   ;;  %v2185_v10 = vld [vmem:[%s2727_s1 + $0x8] sm:$0xff] (!%p334_p3)   ;;  %v2186_v11 = vld [vmem:[%s2727_s1 + $0x10] sm:$0xff] (!%p334_p3)  }
   0x7   : > { %337 = sbr.rel (%p334_p3) target bundleno = 1436 (0x59c), region = 60  ;;  %561 = vmatprep.mubr.bf16.mxu0 (!%p334_p3), %v2260_v0  ;;  %922 = vmatprep.mubr.bf16.mxu1 (!%p334_p3), %v2260_v0  ;;  %v2187_v12 = vld [vmem:[%s2727_s1 + $0x18] sm:$0xff] (!%p334_p3)   ;;  %v2188_v13 = vld [vmem:[%s2727_s1 + $0x20] sm:$0xff] (!%p334_p3)   ;;  %v2189_v14 = vld [vmem:[%s2727_s1 + $0x28] sm:$0xff] (!%p334_p3)  }
   0x8   : > { %2170 = vset.pattern.permute.xlu0 (!%p334_p3), %v2260_v0  ;;  %2171 = vset.pattern.permute.xlu1 (!%p334_p3), %v2260_v0  ;;  %v2190_v15 = vld [vmem:[%s2727_s1 + $0x30] sm:$0xff] (!%p334_p3)   ;;  %v2191_v16 = vld [vmem:[%s2727_s1 + $0x38] sm:$0xff] (!%p334_p3)   ;;  %v706_v17 = vld [vmem:[%s2729_s3] sm:$0xff] (!%p334_p3) }
   0x9   : > { %724 = vperm.xlu0 (!%p334_p3), %2170, %v706_v17   ;;  %v707_v18 = vld [vmem:[%s2729_s3 + $0x8] sm:$0xff] (!%p334_p3)  ;;  %v708_v19 = vld [vmem:[%s2729_s3 + $0x10] sm:$0xff] (!%p334_p3)  ;;  %v710_v20 = vld [vmem:[%s2729_s3 + $0x20] sm:$0xff] (!%p334_p3) }
   0xa   : > { %734 = vperm.xlu1 (!%p334_p3), %2171, %v708_v19   ;;  %v709_v21 = vld [vmem:[%s2729_s3 + $0x18] sm:$0xff] (!%p334_p3)  ;;  %v712_v22 = vld [vmem:[%s2729_s3 + $0x30] sm:$0xff] (!%p334_p3)  ;;  %v711_v23 = vld [vmem:[%s2729_s3 + $0x28] sm:$0xff] (!%p334_p3) }
   0xb   : > { %v714_v24 = vld [vmem:[%s2729_s3 + $0x40] sm:$0xff] (!%p334_p3)  ;;  %v713_v25 = vld [vmem:[%s2729_s3 + $0x38] sm:$0xff] (!%p334_p3)  ;;  %v716_v26 = vld [vmem:[%s2729_s3 + $0x50] sm:$0xff] (!%p334_p3) }
   0xc   : > { %v715_v27 = vld [vmem:[%s2729_s3 + $0x48] sm:$0xff] (!%p334_p3)  ;;  %v718_v28 = vld [vmem:[%s2729_s3 + $0x60] sm:$0xff] (!%p334_p3)  ;;  %v717_v29 = vld [vmem:[%s2729_s3 + $0x58] sm:$0xff] (!%p334_p3) }
   0xd   : > { %729 = vperm.xlu0 (!%p334_p3), %2170, %v707_v18   ;;  %v720_v30 = vld [vmem:[%s2729_s3 + $0x70] sm:$0xff] (!%p334_p3)  ;;  %v719_v31 = vld [vmem:[%s2729_s3 + $0x68] sm:$0xff] (!%p334_p3)  ;;  %v1027_v32 = vld [vmem:[%s2731_s5] sm:$0xff] (!%p334_p3) }
   0xe   : > { %s2742_s13 = smov (!%p380_p4, %s2250_s13), 1  ;;  %739 = vperm.xlu1 %2171, %v709_v21   ;;  %v721_v33 = vld [vmem:[%s2729_s3 + $0x78] sm:$0xff]  ;;  %v1029_v34 = vld [vmem:[%s2731_s5 + $0x10] sm:$0xff]  ;;  %v1028_v35 = vld [vmem:[%s2731_s5 + $0x8] sm:$0xff] }
   0xf   : > { %s2079_s17 = sshll.u32 %s2742_s13, 6  ;;  %v1031_v36 = vld [vmem:[%s2731_s5 + $0x20] sm:$0xff]  ;;  %v1030_v37 = vld [vmem:[%s2731_s5 + $0x18] sm:$0xff]  ;;  %v1033_v38 = vld [vmem:[%s2731_s5 + $0x30] sm:$0xff]  ;;  %s2144_s19 = smul.u32 112, %s2742_s13 }
  0x10   : > { %s2344_s20 = scalar_lea.vmem %s2726_s0, %s2079_s17  ;;  %v1032_v42 = vld [vmem:[%s2731_s5 + $0x28] sm:$0xff]  ;;  %v1035_v43 = vld [vmem:[%s2731_s5 + $0x40] sm:$0xff]  ;;  %v1034_v51 = vld [vmem:[%s2731_s5 + $0x38] sm:$0xff] }
  0x11   : > { %v2172_v1 = vld [vmem:[%s2344_s20 + $0x4] ss:$8 sps:$4 sm:$0xff]   ;;  %v2174_v2 = vld [vmem:[%s2344_s20] ss:$8 sps:$4 sm:$0xff]   ;;  %v2175_v3 = vld [vmem:[%s2344_s20 + $0x14] ss:$8 sps:$4 sm:$0xff]   ;;  %744 = vperm.xlu0 %2170, %v710_v20  }
  0x12   : > { %529 = vmatprep.subr.bf16.mxu0 %v2172_v1  ;;  %v2177_v4 = vld [vmem:[%s2344_s20 + $0x10] ss:$8 sps:$4 sm:$0xff]   ;;  %v2178_v5 = vld [vmem:[%s2344_s20 + $0x24] ss:$8 sps:$4 sm:$0xff]   ;;  %v2180_v6 = vld [vmem:[%s2344_s20 + $0x20] ss:$8 sps:$4 sm:$0xff]   ;;  %749 = vperm.xlu1 %2171, %v711_v23  }
  0x13   : > { %530 = vmatpush1.bf16.msra.mxu0 %v2174_v2  ;;  %v2181_v7 = vld [vmem:[%s2344_s20 + $0x34] ss:$8 sps:$4 sm:$0xff]   ;;  %v2183_v8 = vld [vmem:[%s2344_s20 + $0x30] ss:$8 sps:$4 sm:$0xff]   ;;  %v1036_v59 = vld [vmem:[%s2731_s5 + $0x48] sm:$0xff] }
  0x14   : > { %531 = vmatprep.subr.bf16.mxu0 %v2175_v3  ;;  %v1037_v52 = vld [vmem:[%s2731_s5 + $0x50] sm:$0xff]  ;;  %v1039_v60 = vld [vmem:[%s2731_s5 + $0x60] sm:$0xff]  ;;  %v1038_v2 = vld [vmem:[%s2731_s5 + $0x58] sm:$0xff] }
  0x15   : > { %754 = vperm.xlu0 %2170, %v712_v22   ;;  %v1041_v3 = vld [vmem:[%s2731_s5 + $0x70] sm:$0xff] }
  0x16   : > { %759 = vperm.xlu1 %2171, %v713_v25   ;;  %v1760_v17 = vld [vmem:[%s2735_s9 + $0x10] sm:$0xff]  ;;  %v1762_v25 = vld [vmem:[%s2735_s9 + $0x20] sm:$0xff] }
  0x17   : > { %532 = vmatpush1.bf16.msra.mxu0 %v2177_v4 }
  0x18   : > { %533 = vmatprep.subr.bf16.mxu0 %v2178_v5 }
  0x19   : > { %764 = vperm.xlu0 %2170, %v714_v24   ;;  %v1759_v24 = vld [vmem:[%s2735_s9 + $0x8] sm:$0xff] }
  0x1a   : > { %769 = vperm.xlu1 %2171, %v715_v27  }
  0x1b   : > { %534 = vmatpush1.bf16.msra.mxu0 %v2180_v6 }
  0x1c   : > { %535 = vmatprep.subr.bf16.mxu0 %v2181_v7 }
  0x1d   : > { %774 = vperm.xlu0 %2170, %v716_v26  }
  0x1e   : > { %779 = vperm.xlu1 %2171, %v717_v29  }
  0x1f   : > { %536 = vmatpush1.bf16.msra.mxu0 %v2183_v8 }
  0x21   : > { %784 = vperm.xlu0 %2170, %v718_v28  }
  0x22   : > { %2025 = vmatmul.mubr.msk.bf16.vlgmr.msra.gmra.mrb[0].mxu0 %vm504_vm0, %v2184_v9  ;;  %789 = vperm.xlu1 %2171, %v719_v31   ;;  %v1764_v31 = vld [vmem:[%s2735_s9 + $0x30] sm:$0xff] }
  0x23   : > { %571 = vmatprep.mubr.bf16.mxu0 %v2260_v0 }
  0x25   : > { %794 = vperm.xlu0 %2170, %v720_v30   ;;  %v1761_v30 = vld [vmem:[%s2735_s9 + $0x18] sm:$0xff] }
  0x26   : > { %799 = vperm.xlu1 %2171, %v721_v33  }
  0x29   : > { %1045 = vperm.xlu0 %2170, %v1027_v32  }
  0x2a   : > { %2026 = vmatmul.mubr.msk.bf16.gmra.mrb[4].mxu0 %vm504_vm0, %v2185_v10  ;;  %1050 = vperm.xlu1 %2171, %v1028_v35   ;;  %v1040_v10 = vld [vmem:[%s2731_s5 + $0x68] sm:$0xff] }
  0x2b   : > { %581 = vmatprep.mubr.bf16.mxu0 %v2260_v0 }
  0x2d   : > { %1055 = vperm.xlu0 %2170, %v1029_v34  }
  0x2e   : > { %1060 = vperm.xlu1 %2171, %v1030_v37  }
  0x31   : > { %1065 = vperm.xlu0 %2170, %v1031_v36  }
  0x32   : > { %2027 = vmatmul.mubr.msk.bf16.gmra.mrb[8].mxu0 %vm504_vm0, %v2186_v11  ;;  %1070 = vperm.xlu1 %2171, %v1032_v42   ;;  %v1758_v11 = vld [vmem:[%s2735_s9] sm:$0xff] }
  0x33   : > { %591 = vmatprep.mubr.bf16.mxu0 %v2260_v0 }
  0x35   : > { %1075 = vperm.xlu0 %2170, %v1033_v38   ;;  %v1763_v38 = vld [vmem:[%s2735_s9 + $0x28] sm:$0xff] }
  0x36   : > { %1080 = vperm.xlu1 %2171, %v1034_v51  }
  0x39   : > { %1085 = vperm.xlu0 %2170, %v1035_v43  }
  0x3a   : > { %2028 = vmatmul.mubr.msk.bf16.gmra.mrb[12].mxu0 %vm504_vm0, %v2187_v12  ;;  %1090 = vperm.xlu1 %2171, %v1036_v59  }
  0x3b   : > { %601 = vmatprep.mubr.bf16.mxu0 %v2260_v0 }
  0x3d   : > { %1095 = vperm.xlu0 %2170, %v1037_v52  }
  0x3e   : > { %1100 = vperm.xlu1 %2171, %v1038_v2  }
  0x41   : > { %1105 = vperm.xlu0 %2170, %v1039_v60  }
  0x42   : > { %2029 = vmatmul.mubr.msk.bf16.gmra.mrb[16].mxu0 %vm504_vm0, %v2188_v13  ;;  %1110 = vperm.xlu1 %2171, %v1040_v10   ;;  %v2192_v10 = vld [vmem:[%s2728_s2] sm:$0xff]  }
  0x43   : > { %611 = vmatprep.mubr.bf16.mxu0 %v2260_v0 }
  0x45   : > { %1115 = vperm.xlu0 %2170, %v1041_v3  }
  0x49   : > { %1768 = vperm.xlu0 %2170, %v1758_v11   ;;  %v2193_v11 = vld [vmem:[%s2728_s2 + $0x20] sm:$0xff]  }
  0x4a   : > { %2030 = vmatmul.mubr.msk.bf16.gmra.mrb[20].mxu0 %vm504_vm0, %v2189_v14 }
  0x4b   : > { %621 = vmatprep.mubr.bf16.mxu0 %v2260_v0 }
  0x4d   : > { %1778 = vperm.xlu0 %2170, %v1760_v17   ;;  %v2199_v17 = vld [vmem:[%s2728_s2 + $0x38] sm:$0xff]  }
  0x51   : > { %1788 = vperm.xlu0 %2170, %v1762_v25  }
  0x52   : > { %2031 = vmatmul.mubr.msk.bf16.gmra.mrb[24].mxu0 %vm504_vm0, %v2190_v15 }
  0x53   : > { %631 = vmatprep.mubr.bf16.mxu0 %v2260_v0 }
  0x55   : > { %1798 = vperm.xlu0 %2170, %v1764_v31  }
  0x5a   : > { %2032 = vmatmul.mubr.msk.bf16.gmra.mrb[28].mxu0 %vm504_vm0, %v2191_v16  ;;  %v1042_v16 = vld [vmem:[%s2731_s5 + $0x78] sm:$0xff] }
  0x5b   : > { %882 = vmatprep.mubr.bf16.mxu0 %v2260_v0  ;;  %1120 = vperm.xlu1 %2171, %v1042_v16   ;;  %v2198_v16 = vld [vmem:[%s2728_s2 + $0x18] sm:$0xff]  }
  0x5f   : > { %1773 = vperm.xlu1 %2171, %v1759_v24  }
  0x63   : > { %1783 = vperm.xlu1 %2171, %v1761_v30  }
  0x67   : > { %1793 = vperm.xlu1 %2171, %v1763_v38  }
  0xf5   : > { %v563_v39 = vpop.f32.mrb[0].mxu0 }
  0xf6   : > { %v565_v40 = vpop.f32.mrb[1].mxu0  ;;  %v642_v44 = vmax.f32 %v563_v39, 0.0 }
  0xf7   : > { %v567_v41 = vpop.f32.mrb[2].mxu0  ;;  %v643_v47 = vmax.f32 %v565_v40, 0.0 }
  0xf8   : > { %v644_v45 = vmax.f32 %v567_v41, 0.0  ;;  %v569_v46 = vpop.f32.mrb[3].mxu0 }
  0xf9   : > { %v645_v48 = vmax.f32 %v569_v46, 0.0 }
  0xfa   : > { %v674_v49 = vpack.c.bf16 %v644_v45, %v642_v44 }
  0xfb   : > { %v675_v50 = vpack.c.bf16 %v645_v48, %v643_v47 }
  0xfd   : > { %v573_v53 = vpop.f32.mrb[4].mxu0  ;;  %850 = vmatprep.subr.bf16.mxu0 %v675_v50  ;;  %2080 = vmatprep.subr.bf16.mxu1 %v675_v50 }
  0xfe   : > { %v575_v54 = vpop.f32.mrb[5].mxu0  ;;  %851 = vmatpush1.bf16.msra.mxu0 %v674_v49  ;;  %2088 = vmatpush1.bf16.msra.mxu1 %v674_v49  ;;  %v646_v56 = vmax.f32 %v573_v53, 0.0 }
  0xff   : > { %v577_v55 = vpop.f32.mrb[6].mxu0  ;;  %v647_v61 = vmax.f32 %v575_v54, 0.0 }
 0x100   : > { %v648_v57 = vmax.f32 %v577_v55, 0.0  ;;  %v579_v58 = vpop.f32.mrb[7].mxu0 }
 0x101   : > { %v649_v62 = vmax.f32 %v579_v58, 0.0 }
 0x102   : > { %v676_v63 = vpack.c.bf16 %v648_v57, %v646_v56 }
 0x103   : > { %v677_v1 = vpack.c.bf16 %v649_v62, %v647_v61 }
 0x105   : > { %v583_v4 = vpop.f32.mrb[8].mxu0  ;;  %852 = vmatprep.subr.bf16.mxu0 %v677_v1  ;;  %2081 = vmatprep.subr.bf16.mxu1 %v677_v1 }
 0x106   : > { %v585_v5 = vpop.f32.mrb[9].mxu0  ;;  %853 = vmatpush1.bf16.msra.mxu0 %v676_v63  ;;  %2089 = vmatpush1.bf16.msra.mxu1 %v676_v63  ;;  %v650_v7 = vmax.f32 %v583_v4, 0.0 }
 0x107   : > { %v587_v6 = vpop.f32.mrb[10].mxu0  ;;  %v651_v12 = vmax.f32 %v585_v5, 0.0 }
 0x108   : > { %v652_v8 = vmax.f32 %v587_v6, 0.0  ;;  %v589_v9 = vpop.f32.mrb[11].mxu0 }
 0x109   : > { %v653_v13 = vmax.f32 %v589_v9, 0.0 }
 0x10a   : > { %v678_v14 = vpack.c.bf16 %v652_v8, %v650_v7 }
 0x10b   : > { %v679_v15 = vpack.c.bf16 %v653_v13, %v651_v12  ;;  %v2194_v12 = vld [vmem:[%s2728_s2 + $0x8] sm:$0xff]  }
 0x10c   : > { %v2195_v13 = vld [vmem:[%s2728_s2 + $0x28] sm:$0xff]  }
 0x10d   : > { %v593_v18 = vpop.f32.mrb[12].mxu0  ;;  %854 = vmatprep.subr.bf16.mxu0 %v679_v15  ;;  %2082 = vmatprep.subr.bf16.mxu1 %v679_v15  ;;  %v2197_v15 = vld [vmem:[%s2728_s2 + $0x30] sm:$0xff]  }
 0x10e   : > { %v595_v19 = vpop.f32.mrb[13].mxu0  ;;  %855 = vmatpush1.bf16.msra.mxu0 %v678_v14  ;;  %2090 = vmatpush1.bf16.msra.mxu1 %v678_v14  ;;  %v654_v21 = vmax.f32 %v593_v18, 0.0  ;;  %v2196_v14 = vld [vmem:[%s2728_s2 + $0x10] sm:$0xff]   ;;  %v725_v18 = vpop.permute.xlu0 %724 }
 0x10f   : > { %v597_v20 = vpop.f32.mrb[14].mxu0  ;;  %v655_v26 = vmax.f32 %v595_v19, 0.0  ;;  %v735_v19 = vpop.permute.xlu1 %734 }
 0x110   : > { %v656_v22 = vmax.f32 %v597_v20, 0.0  ;;  %v599_v23 = vpop.f32.mrb[15].mxu0 }
 0x111   : > { %v657_v27 = vmax.f32 %v599_v23, 0.0 }
 0x112   : > { %v680_v28 = vpack.c.bf16 %v656_v22, %v654_v21  ;;  %v730_v20 = vpop.permute.xlu0 %729 }
 0x113   : > { %v681_v29 = vpack.c.bf16 %v657_v27, %v655_v26  ;;  %v740_v21 = vpop.permute.xlu1 %739 }
 0x115   : > { %v603_v32 = vpop.f32.mrb[16].mxu0  ;;  %856 = vmatprep.subr.bf16.mxu0 %v681_v29  ;;  %2083 = vmatprep.subr.bf16.mxu1 %v681_v29 }
 0x116   : > { %v605_v33 = vpop.f32.mrb[17].mxu0  ;;  %857 = vmatpush1.bf16.msra.mxu0 %v680_v28  ;;  %2091 = vmatpush1.bf16.msra.mxu1 %v680_v28  ;;  %v658_v35 = vmax.f32 %v603_v32, 0.0  ;;  %v2543_v22 = vpop.permute.xlu0 %744 }
 0x117   : > { %v607_v34 = vpop.f32.mrb[18].mxu0  ;;  %v659_v39 = vmax.f32 %v605_v33, 0.0  ;;  %v2545_v23 = vpop.permute.xlu1 %749 }
 0x118   : > { %v660_v36 = vmax.f32 %v607_v34, 0.0  ;;  %v609_v37 = vpop.f32.mrb[19].mxu0 }
 0x119   : > { %v661_v40 = vmax.f32 %v609_v37, 0.0 }
 0x11a   : > { %v682_v41 = vpack.c.bf16 %v660_v36, %v658_v35  ;;  %v2547_v24 = vpop.permute.xlu0 %754 }
 0x11b   : > { %v683_v42 = vpack.c.bf16 %v661_v40, %v659_v39  ;;  %v2549_v25 = vpop.permute.xlu1 %759 }
 0x11d   : > { %v613_v43 = vpop.f32.mrb[20].mxu0  ;;  %858 = vmatprep.subr.bf16.mxu0 %v683_v42  ;;  %2084 = vmatprep.subr.bf16.mxu1 %v683_v42 }
 0x11e   : > { %v615_v44 = vpop.f32.mrb[21].mxu0  ;;  %859 = vmatpush1.bf16.msra.mxu0 %v682_v41  ;;  %2092 = vmatpush1.bf16.msra.mxu1 %v682_v41  ;;  %v662_v46 = vmax.f32 %v613_v43, 0.0  ;;  %v765_v26 = vpop.permute.xlu0 %764 }
 0x11f   : > { %v617_v45 = vpop.f32.mrb[22].mxu0  ;;  %v663_v49 = vmax.f32 %v615_v44, 0.0  ;;  %v770_v27 = vpop.permute.xlu1 %769 }
 0x120   : > { %v664_v47 = vmax.f32 %v617_v45, 0.0  ;;  %v619_v48 = vpop.f32.mrb[23].mxu0 }
 0x121   : > { %v665_v50 = vmax.f32 %v619_v48, 0.0 }
 0x122   : > { %v684_v51 = vpack.c.bf16 %v664_v47, %v662_v46 }
 0x123   : > { %v685_v52 = vpack.c.bf16 %v665_v50, %v663_v49 }
 0x125   : > { %v623_v53 = vpop.f32.mrb[24].mxu0  ;;  %860 = vmatprep.subr.bf16.mxu0 %v685_v52  ;;  %2085 = vmatprep.subr.bf16.mxu1 %v685_v52  ;;  %v775_v52 = vpop.permute.xlu0 %774 }
 0x126   : > { %v625_v54 = vpop.f32.mrb[25].mxu0  ;;  %861 = vmatpush1.bf16.msra.mxu0 %v684_v51  ;;  %2093 = vmatpush1.bf16.msra.mxu1 %v684_v51  ;;  %v666_v56 = vmax.f32 %v623_v53, 0.0  ;;  %v780_v53 = vpop.permute.xlu1 %779 }
 0x127   : > { %v627_v55 = vpop.f32.mrb[26].mxu0  ;;  %v667_v59 = vmax.f32 %v625_v54, 0.0 }
 0x128   : > { %v668_v57 = vmax.f32 %v627_v55, 0.0  ;;  %v629_v58 = vpop.f32.mrb[27].mxu0 }
 0x129   : > { %v669_v60 = vmax.f32 %v629_v58, 0.0 }
 0x12a   : > { %v686_v61 = vpack.c.bf16 %v668_v57, %v666_v56 }
 0x12b   : > { %v687_v62 = vpack.c.bf16 %v669_v60, %v667_v59 }
 0x12d   : > { %v633_v63 = vpop.f32.mrb[28].mxu0  ;;  %862 = vmatprep.subr.bf16.mxu0 %v687_v62  ;;  %2086 = vmatprep.subr.bf16.mxu1 %v687_v62 }
 0x12e   : > { %v635_v1 = vpop.f32.mrb[29].mxu0  ;;  %863 = vmatpush1.bf16.msra.mxu0 %v686_v61  ;;  %2094 = vmatpush1.bf16.msra.mxu1 %v686_v61  ;;  %v670_v3 = vmax.f32 %v633_v63, 0.0 }
 0x12f   : > { %v637_v2 = vpop.f32.mrb[30].mxu0  ;;  %v671_v6 = vmax.f32 %v635_v1, 0.0 }
 0x130   : > { %v672_v4 = vmax.f32 %v637_v2, 0.0  ;;  %v639_v5 = vpop.f32.mrb[31].mxu0 }
 0x131   : > { %v673_v7 = vmax.f32 %v639_v5, 0.0 }
 0x132   : > { %v688_v8 = vpack.c.bf16 %v672_v4, %v670_v3 }
 0x133   : > { %v689_v9 = vpack.c.bf16 %v673_v7, %v671_v6 }
 0x135   : > { %864 = vmatprep.subr.bf16.mxu0 %v689_v9  ;;  %2087 = vmatprep.subr.bf16.mxu1 %v689_v9 }
 0x136   : > { %865 = vmatpush1.bf16.msra.mxu0 %v688_v8  ;;  %2095 = vmatpush1.bf16.msra.mxu1 %v688_v8 }
 0x139   : > { %883 = vmatmul.mubr.bf16.vlgmr.msra.gmra.mrb[32].mxu0 %v2192_v10  ;;  %923 = vmatmul.mubr.bf16.vlgmr.msra.gmra.mrb[0].mxu1 %v2193_v11 }
 0x13a   : > { %892 = vmatprep.mubr.bf16.mxu0 %v2260_v0  ;;  %932 = vmatprep.mubr.bf16.mxu1 %v2260_v0 }
 0x141   : > { %893 = vmatmul.mubr.bf16.gmra.mrb[36].mxu0 %v2194_v12  ;;  %933 = vmatmul.mubr.bf16.gmra.mrb[4].mxu1 %v2195_v13 }
 0x142   : > { %902 = vmatprep.mubr.bf16.mxu0 %v2260_v0  ;;  %942 = vmatprep.mubr.bf16.mxu1 %v2260_v0 }
 0x149   : > { %903 = vmatmul.mubr.bf16.gmra.mrb[40].mxu0 %v2196_v14  ;;  %943 = vmatmul.mubr.bf16.gmra.mrb[8].mxu1 %v2197_v15 }
 0x14a   : > { %912 = vmatprep.mubr.bf16.mxu0 %v2260_v0  ;;  %952 = vmatprep.mubr.bf16.mxu1 %v2260_v0 }
 0x151   : > { %913 = vmatmul.mubr.bf16.gmra.mrb[44].mxu0 %v2198_v16  ;;  %953 = vmatmul.mubr.bf16.gmra.mrb[12].mxu1 %v2199_v17 }
 0x152   : > { %1203 = vmatprep.mubr.bf16.mxu0 %v2260_v0  ;;  %1444 = vmatprep.mubr.bf16.mxu1 %v2260_v0 }
 0x20c   : > { %v884_v28 = vpop.f32.mrb[32].mxu0  ;;  %v924_v29 = vpop.f32.mrb[0].mxu1 }
 0x20d   : > { %v885_v30 = vadd.f32 %v884_v28, %v725_v18  ;;  %v886_v31 = vpop.f32.mrb[33].mxu0  ;;  %v925_v32 = vadd.f32 %v924_v29, %v765_v26  ;;  %v926_v33 = vpop.f32.mrb[1].mxu1 }
 0x20e   : > { %v887_v34 = vadd.f32 %v886_v31, %v725_v18  ;;  %v888_v35 = vpop.f32.mrb[34].mxu0  ;;  %v927_v36 = vadd.f32 %v926_v33, %v765_v26  ;;  %v928_v37 = vpop.f32.mrb[2].mxu1 }
 0x20f   : > { %v889_v38 = vadd.f32 %v888_v35, %v730_v20  ;;  %v890_v39 = vpop.f32.mrb[35].mxu0  ;;  %v979_v40 = vmax.f32 %v925_v32, 0.0  ;;  %v929_v41 = vadd.f32 %v928_v37, %v770_v27  ;;  %v930_v42 = vpop.f32.mrb[3].mxu1  ;;  %v963_v46 = vmax.f32 %v885_v30, 0.0 }
 0x210   : > { %v891_v43 = vadd.f32 %v890_v39, %v730_v20  ;;  %v980_v44 = vmax.f32 %v927_v36, 0.0  ;;  %v931_v45 = vadd.f32 %v930_v42, %v770_v27  ;;  %v964_v49 = vmax.f32 %v887_v34, 0.0  ;;  %v790_v20 = vpop.permute.xlu1 %789 }
 0x211   : > { %v965_v47 = vmax.f32 %v889_v38, 0.0  ;;  %v981_v48 = vmax.f32 %v929_v41, 0.0 }
 0x212   : > { %v966_v50 = vmax.f32 %v891_v43, 0.0  ;;  %v982_v51 = vmax.f32 %v931_v45, 0.0 }
 0x213   : > { %v995_v54 = vpack.c.bf16 %v965_v47, %v963_v46  ;;  %v2551_v55 = vpack.c.bf16 %v981_v48, %v979_v40 }
 0x214   : > { %v996_v56 = vpack.c.bf16 %v966_v50, %v964_v49  ;;  %v2553_v57 = vpack.c.bf16 %v982_v51, %v980_v44  ;;  %v894_v58 = vpop.f32.mrb[36].mxu0  ;;  %v934_v59 = vpop.f32.mrb[4].mxu1 }
 0x215   : > { %v895_v60 = vadd.f32 %v894_v58, %v735_v19  ;;  %v935_v61 = vadd.f32 %v934_v59, %v775_v52  ;;  %v896_v62 = vpop.f32.mrb[37].mxu0  ;;  %v936_v63 = vpop.f32.mrb[5].mxu1 }
 0x216   : > { %v897_v1 = vadd.f32 %v896_v62, %v735_v19  ;;  %v937_v2 = vadd.f32 %v936_v63, %v775_v52  ;;  %v898_v3 = vpop.f32.mrb[38].mxu0  ;;  %v938_v4 = vpop.f32.mrb[6].mxu1  ;;  %1171 = vmatprep.subr.bf16.mxu0 %v996_v56 }
 0x217   : > { %v983_v5 = vmax.f32 %v935_v61, 0.0  ;;  %v899_v6 = vadd.f32 %v898_v3, %v740_v21  ;;  %v939_v7 = vadd.f32 %v938_v4, %v780_v53  ;;  %v900_v8 = vpop.f32.mrb[39].mxu0  ;;  %v940_v9 = vpop.f32.mrb[7].mxu1  ;;  %1172 = vmatpush1.bf16.msra.mxu0 %v995_v54  ;;  %v967_v13 = vmax.f32 %v895_v60, 0.0 }
 0x218   : > { %v984_v10 = vmax.f32 %v937_v2, 0.0  ;;  %v901_v11 = vadd.f32 %v900_v8, %v740_v21  ;;  %v941_v12 = vadd.f32 %v940_v9, %v780_v53  ;;  %v968_v16 = vmax.f32 %v897_v1, 0.0  ;;  %v785_v19 = vpop.permute.xlu0 %784  ;;  %v800_v53 = vpop.permute.xlu1 %799 }
 0x219   : > { %v969_v14 = vmax.f32 %v899_v6, 0.0  ;;  %v985_v15 = vmax.f32 %v939_v7, 0.0 }
 0x21a   : > { %v970_v17 = vmax.f32 %v901_v11, 0.0  ;;  %v986_v18 = vmax.f32 %v941_v12, 0.0 }
 0x21b   : > { %v997_v26 = vpack.c.bf16 %v969_v14, %v967_v13  ;;  %v2555_v27 = vpack.c.bf16 %v985_v15, %v983_v5 }
 0x21c   : > { %v998_v28 = vpack.c.bf16 %v970_v17, %v968_v16  ;;  %v2557_v29 = vpack.c.bf16 %v986_v18, %v984_v10  ;;  %v904_v30 = vpop.f32.mrb[40].mxu0  ;;  %v944_v31 = vpop.f32.mrb[8].mxu1 }
 0x21d   : > { %v905_v32 = vadd.f32 %v904_v30, %v2543_v22  ;;  %v945_v21 = vadd.f32 %v944_v31, %v785_v19  ;;  %v906_v33 = vpop.f32.mrb[41].mxu0  ;;  %v946_v34 = vpop.f32.mrb[9].mxu1  ;;  %v2205_v30 = vld [vmem:[%s2730_s4 + $0x28] sm:$0xff]   ;;  %v2206_v31 = vld [vmem:[%s2730_s4 + $0x30] sm:$0xff]  }
 0x21e   : > { %v907_v35 = vadd.f32 %v906_v33, %v2543_v22  ;;  %v947_v36 = vadd.f32 %v946_v34, %v785_v19  ;;  %v908_v37 = vpop.f32.mrb[42].mxu0  ;;  %v948_v38 = vpop.f32.mrb[10].mxu1  ;;  %1173 = vmatprep.subr.bf16.mxu0 %v998_v28 }
 0x21f   : > { %v909_v39 = vadd.f32 %v908_v37, %v2545_v23  ;;  %v949_v40 = vadd.f32 %v948_v38, %v790_v20  ;;  %v910_v41 = vpop.f32.mrb[43].mxu0  ;;  %v950_v42 = vpop.f32.mrb[11].mxu1  ;;  %1174 = vmatpush1.bf16.msra.mxu0 %v997_v26  ;;  %v971_v45 = vmax.f32 %v905_v32, 0.0  ;;  %v987_v46 = vmax.f32 %v945_v21, 0.0  ;;  %v2207_v32 = vld [vmem:[%s2730_s4 + $0x38] sm:$0xff]  }
 0x220   : > { %v911_v43 = vadd.f32 %v910_v41, %v2545_v23  ;;  %v951_v44 = vadd.f32 %v950_v42, %v790_v20  ;;  %v972_v49 = vmax.f32 %v907_v35, 0.0  ;;  %v988_v50 = vmax.f32 %v947_v36, 0.0  ;;  %v795_v52 = vpop.permute.xlu0 %794  ;;  %v1051_v36 = vpop.permute.xlu1 %1050 }
 0x221   : > { %v973_v47 = vmax.f32 %v909_v39, 0.0  ;;  %v989_v48 = vmax.f32 %v949_v40, 0.0 }
 0x222   : > { %v974_v22 = vmax.f32 %v911_v43, 0.0  ;;  %v990_v51 = vmax.f32 %v951_v44, 0.0 }
 0x223   : > { %v999_v54 = vpack.c.bf16 %v973_v47, %v971_v45  ;;  %v1007_v56 = vpack.c.bf16 %v989_v48, %v987_v46 }
 0x224   : > { %v1000_v58 = vpack.c.bf16 %v974_v22, %v972_v49  ;;  %v1008_v59 = vpack.c.bf16 %v990_v51, %v988_v50  ;;  %v914_v60 = vpop.f32.mrb[44].mxu0  ;;  %v954_v61 = vpop.f32.mrb[12].mxu1 }
 0x225   : > { %v915_v62 = vadd.f32 %v914_v60, %v2547_v24  ;;  %v955_v23 = vadd.f32 %v954_v61, %v795_v52  ;;  %v916_v63 = vpop.f32.mrb[45].mxu0  ;;  %v956_v1 = vpop.f32.mrb[13].mxu1 }
 0x226   : > { %v917_v2 = vadd.f32 %v916_v63, %v2547_v24  ;;  %v957_v3 = vadd.f32 %v956_v1, %v795_v52  ;;  %v918_v4 = vpop.f32.mrb[46].mxu0  ;;  %v958_v5 = vpop.f32.mrb[14].mxu1  ;;  %1175 = vmatprep.subr.bf16.mxu0 %v1000_v58 }
 0x227   : > { %v919_v6 = vadd.f32 %v918_v4, %v2549_v25  ;;  %v959_v7 = vadd.f32 %v958_v5, %v800_v53  ;;  %v920_v8 = vpop.f32.mrb[47].mxu0  ;;  %v960_v9 = vpop.f32.mrb[15].mxu1  ;;  %1176 = vmatpush1.bf16.msra.mxu0 %v999_v54  ;;  %v975_v12 = vmax.f32 %v915_v62, 0.0  ;;  %v991_v13 = vmax.f32 %v955_v23, 0.0 }
 0x228   : > { %v921_v10 = vadd.f32 %v920_v8, %v2549_v25  ;;  %v961_v11 = vadd.f32 %v960_v9, %v800_v53  ;;  %v976_v16 = vmax.f32 %v917_v2, 0.0  ;;  %v992_v17 = vmax.f32 %v957_v3, 0.0  ;;  %v2200_v25 = vld [vmem:[%s2730_s4] sm:$0xff]   ;;  %v1046_v21 = vpop.permute.xlu0 %1045  ;;  %v1061_v51 = vpop.permute.xlu1 %1060 }
 0x229   : > { %v977_v14 = vmax.f32 %v919_v6, 0.0  ;;  %v993_v15 = vmax.f32 %v959_v7, 0.0 }
 0x22a   : > { %v978_v24 = vmax.f32 %v921_v10, 0.0  ;;  %v994_v18 = vmax.f32 %v961_v11, 0.0 }
 0x22b   : > { %v1001_v19 = vpack.c.bf16 %v977_v14, %v975_v12  ;;  %v1009_v20 = vpack.c.bf16 %v993_v15, %v991_v13 }
 0x22c   : > { %v1002_v26 = vpack.c.bf16 %v978_v24, %v976_v16  ;;  %v1010_v28 = vpack.c.bf16 %v994_v18, %v992_v17  ;;  %v1056_v47 = vpop.permute.xlu0 %1055  ;;  %v1071_v5 = vpop.permute.xlu1 %1070 }
 0x22e   : > { %1177 = vmatprep.subr.bf16.mxu0 %v1002_v26 }
 0x22f   : > { %1178 = vmatpush1.bf16.msra.mxu0 %v1001_v19 }
 0x230   : > { %1179 = vmatprep.subr.bf16.mxu0 %v2553_v57  ;;  %v2201_v57 = vld [vmem:[%s2730_s4 + $0x8] sm:$0xff]   ;;  %v1066_v63 = vpop.permute.xlu0 %1065 }
 0x233   : > { %1180 = vmatpush1.bf16.msra.mxu0 %v2551_v55  ;;  %v2202_v55 = vld [vmem:[%s2730_s4 + $0x10] sm:$0xff]  }
 0x234   : > { %1181 = vmatprep.subr.bf16.mxu0 %v2557_v29  ;;  %v2204_v29 = vld [vmem:[%s2730_s4 + $0x20] sm:$0xff]   ;;  %v1076_v16 = vpop.permute.xlu0 %1075 }
 0x237   : > { %1182 = vmatpush1.bf16.msra.mxu0 %v2555_v27  ;;  %v2203_v27 = vld [vmem:[%s2730_s4 + $0x18] sm:$0xff]  }
 0x238   : > { %1183 = vmatprep.subr.bf16.mxu0 %v1008_v59 }
 0x23b   : > { %1184 = vmatpush1.bf16.msra.mxu0 %v1007_v56 }
 0x23c   : > { %1185 = vmatprep.subr.bf16.mxu0 %v1010_v28 }
 0x23f   : > { %1186 = vmatpush1.bf16.msra.mxu0 %v1009_v20  ;;  %v1081_v20 = vpop.permute.xlu1 %1080 }
 0x242   : > { %1204 = vmatmul.mubr.bf16.vlgmr.msra.gmra.mrb[48].mxu0 %v2200_v25 }
 0x243   : > { %1213 = vmatprep.mubr.bf16.mxu0 %v2260_v0 }
 0x24a   : > { %1214 = vmatmul.mubr.bf16.gmra.mrb[52].mxu0 %v2201_v57 }
 0x24b   : > { %1223 = vmatprep.mubr.bf16.mxu0 %v2260_v0 }
 0x252   : > { %1224 = vmatmul.mubr.bf16.gmra.mrb[56].mxu0 %v2202_v55 }
 0x253   : > { %1233 = vmatprep.mubr.bf16.mxu0 %v2260_v0 }
 0x25a   : > { %1234 = vmatmul.mubr.bf16.gmra.mrb[60].mxu0 %v2203_v27 }
 0x25b   : > { %1243 = vmatprep.mubr.bf16.mxu0 %v2260_v0 }
 0x262   : > { %1244 = vmatmul.mubr.bf16.gmra.mrb[64].mxu0 %v2204_v29 }
 0x263   : > { %1253 = vmatprep.mubr.bf16.mxu0 %v2260_v0 }
 0x26a   : > { %1254 = vmatmul.mubr.bf16.gmra.mrb[68].mxu0 %v2205_v30 }
 0x26b   : > { %1263 = vmatprep.mubr.bf16.mxu0 %v2260_v0 }
 0x272   : > { %1264 = vmatmul.mubr.bf16.gmra.mrb[72].mxu0 %v2206_v31 }
 0x273   : > { %1273 = vmatprep.mubr.bf16.mxu0 %v2260_v0 }
 0x27a   : > { %1274 = vmatmul.mubr.bf16.gmra.mrb[76].mxu0 %v2207_v32 }
 0x27b   : > { %1861 = vmatprep.mubr.bf16.mxu0 %v2260_v0 }
 0x315   : > { %v1205_v33 = vpop.f32.mrb[48].mxu0 }
 0x316   : > { %v1206_v34 = vadd.f32 %v1205_v33, %v1046_v21  ;;  %v1207_v35 = vpop.f32.mrb[49].mxu0 }
 0x317   : > { %v1208_v37 = vadd.f32 %v1207_v35, %v1046_v21  ;;  %v1209_v38 = vpop.f32.mrb[50].mxu0  ;;  %v1086_v21 = vpop.permute.xlu0 %1085 }
 0x318   : > { %v1210_v39 = vadd.f32 %v1209_v38, %v1051_v36  ;;  %v1211_v40 = vpop.f32.mrb[51].mxu0  ;;  %v1284_v42 = vmax.f32 %v1206_v34, 0.0 }
 0x319   : > { %v1212_v41 = vadd.f32 %v1211_v40, %v1051_v36  ;;  %v1285_v44 = vmax.f32 %v1208_v37, 0.0  ;;  %v1091_v37 = vpop.permute.xlu1 %1090 }
 0x31a   : > { %v1286_v43 = vmax.f32 %v1210_v39, 0.0 }
 0x31b   : > { %v1287_v45 = vmax.f32 %v1212_v41, 0.0 }
 0x31c   : > { %v1316_v46 = vpack.c.bf16 %v1286_v43, %v1284_v42 }
 0x31d   : > { %v1317_v48 = vpack.c.bf16 %v1287_v45, %v1285_v44  ;;  %v1215_v49 = vpop.f32.mrb[52].mxu0 }
 0x31e   : > { %v1216_v50 = vadd.f32 %v1215_v49, %v1056_v47  ;;  %v1217_v22 = vpop.f32.mrb[53].mxu0 }
 0x31f   : > { %v1218_v52 = vadd.f32 %v1217_v22, %v1056_v47  ;;  %v1219_v53 = vpop.f32.mrb[54].mxu0  ;;  %1412 = vmatprep.subr.bf16.mxu1 %v1317_v48  ;;  %v1096_v48 = vpop.permute.xlu0 %1095 }
 0x320   : > { %v1220_v54 = vadd.f32 %v1219_v53, %v1061_v51  ;;  %v1221_v56 = vpop.f32.mrb[55].mxu0  ;;  %1413 = vmatpush1.bf16.msra.mxu1 %v1316_v46  ;;  %v1288_v59 = vmax.f32 %v1216_v50, 0.0 }
 0x321   : > { %v1222_v58 = vadd.f32 %v1221_v56, %v1061_v51  ;;  %v1289_v61 = vmax.f32 %v1218_v52, 0.0  ;;  %v1101_v52 = vpop.permute.xlu1 %1100 }
 0x322   : > { %v1290_v60 = vmax.f32 %v1220_v54, 0.0 }
 0x323   : > { %v1291_v62 = vmax.f32 %v1222_v58, 0.0 }
 0x324   : > { %v1318_v23 = vpack.c.bf16 %v1290_v60, %v1288_v59 }
 0x325   : > { %v1319_v1 = vpack.c.bf16 %v1291_v62, %v1289_v61  ;;  %v1225_v2 = vpop.f32.mrb[56].mxu0 }
 0x326   : > { %v1226_v3 = vadd.f32 %v1225_v2, %v1066_v63  ;;  %v1227_v4 = vpop.f32.mrb[57].mxu0 }
 0x327   : > { %v1228_v6 = vadd.f32 %v1227_v4, %v1066_v63  ;;  %v1229_v7 = vpop.f32.mrb[58].mxu0  ;;  %1414 = vmatprep.subr.bf16.mxu1 %v1319_v1  ;;  %v1106_v1 = vpop.permute.xlu0 %1105 }
 0x328   : > { %v1230_v8 = vadd.f32 %v1229_v7, %v1071_v5  ;;  %v1231_v9 = vpop.f32.mrb[59].mxu0  ;;  %1415 = vmatpush1.bf16.msra.mxu1 %v1318_v23  ;;  %v1292_v11 = vmax.f32 %v1226_v3, 0.0 }
 0x329   : > { %v1232_v10 = vadd.f32 %v1231_v9, %v1071_v5  ;;  %v1293_v13 = vmax.f32 %v1228_v6, 0.0  ;;  %v1111_v6 = vpop.permute.xlu1 %1110 }
 0x32a   : > { %v1294_v12 = vmax.f32 %v1230_v8, 0.0 }
 0x32b   : > { %v1295_v14 = vmax.f32 %v1232_v10, 0.0 }
 0x32c   : > { %v1320_v15 = vpack.c.bf16 %v1294_v12, %v1292_v11 }
 0x32d   : > { %v1321_v17 = vpack.c.bf16 %v1295_v14, %v1293_v13  ;;  %v1235_v24 = vpop.f32.mrb[60].mxu0 }
 0x32e   : > { %v1236_v18 = vadd.f32 %v1235_v24, %v1076_v16  ;;  %v1237_v19 = vpop.f32.mrb[61].mxu0 }
 0x32f   : > { %v1238_v26 = vadd.f32 %v1237_v19, %v1076_v16  ;;  %v1239_v28 = vpop.f32.mrb[62].mxu0  ;;  %1416 = vmatprep.subr.bf16.mxu1 %v1321_v17  ;;  %v1116_v17 = vpop.permute.xlu0 %1115 }
 0x330   : > { %v1240_v25 = vadd.f32 %v1239_v28, %v1081_v20  ;;  %v1241_v57 = vpop.f32.mrb[63].mxu0  ;;  %1417 = vmatpush1.bf16.msra.mxu1 %v1320_v15  ;;  %v1296_v27 = vmax.f32 %v1236_v18, 0.0 }
 0x331   : > { %v1242_v55 = vadd.f32 %v1241_v57, %v1081_v20  ;;  %v1297_v30 = vmax.f32 %v1238_v26, 0.0  ;;  %v1121_v26 = vpop.permute.xlu1 %1120 }
 0x332   : > { %v1298_v29 = vmax.f32 %v1240_v25, 0.0 }
 0x333   : > { %v1299_v31 = vmax.f32 %v1242_v55, 0.0 }
 0x334   : > { %v1322_v32 = vpack.c.bf16 %v1298_v29, %v1296_v27 }
 0x335   : > { %v1323_v33 = vpack.c.bf16 %v1299_v31, %v1297_v30  ;;  %v1245_v34 = vpop.f32.mrb[64].mxu0 }
 0x336   : > { %v1246_v35 = vadd.f32 %v1245_v34, %v1086_v21  ;;  %v1247_v36 = vpop.f32.mrb[65].mxu0  ;;  %v2208_v34 = vld [vmem:[%s2733_s7] sm:$0xff]  }
 0x337   : > { %v1248_v38 = vadd.f32 %v1247_v36, %v1086_v21  ;;  %v1249_v39 = vpop.f32.mrb[66].mxu0  ;;  %1418 = vmatprep.subr.bf16.mxu1 %v1323_v33  ;;  %v2229_v36 = vld [vmem:[%s2344_s20] ss:$8 sps:$4 sm:$0xff]  }
 0x338   : > { %v1250_v40 = vadd.f32 %v1249_v39, %v1091_v37  ;;  %v1251_v41 = vpop.f32.mrb[67].mxu0  ;;  %1419 = vmatpush1.bf16.msra.mxu1 %v1322_v32  ;;  %v1300_v43 = vmax.f32 %v1246_v35, 0.0  ;;  %v2228_v35 = vld [vmem:[%s2344_s20 + $0x4] ss:$8 sps:$4 sm:$0xff]   ;;  %v2231_v39 = vld [vmem:[%s2344_s20 + $0x10] ss:$8 sps:$4 sm:$0xff]  }
 0x339   : > { %v1252_v42 = vadd.f32 %v1251_v41, %v1091_v37  ;;  %v1301_v45 = vmax.f32 %v1248_v38, 0.0  ;;  %v2230_v37 = vld [vmem:[%s2344_s20 + $0x14] ss:$8 sps:$4 sm:$0xff]   ;;  %v2209_v38 = vld [vmem:[%s2733_s7 + $0x8] sm:$0xff]  }
 0x33a   : > { %v1302_v44 = vmax.f32 %v1250_v40, 0.0  ;;  %v2232_v40 = vld [vmem:[%s2344_s20 + $0x24] ss:$8 sps:$4 sm:$0xff]   ;;  %v2233_v41 = vld [vmem:[%s2344_s20 + $0x20] ss:$8 sps:$4 sm:$0xff]  }
 0x33b   : > { %v1303_v46 = vmax.f32 %v1252_v42, 0.0  ;;  %v2234_v42 = vld [vmem:[%s2344_s20 + $0x34] ss:$8 sps:$4 sm:$0xff]  }
 0x33c   : > { %v1324_v47 = vpack.c.bf16 %v1302_v44, %v1300_v43  ;;  %v2210_v43 = vld [vmem:[%s2733_s7 + $0x10] sm:$0xff]  }
 0x33d   : > { %v1325_v49 = vpack.c.bf16 %v1303_v46, %v1301_v45  ;;  %v1255_v50 = vpop.f32.mrb[68].mxu0  ;;  %v2235_v44 = vld [vmem:[%s2344_s20 + $0x30] ss:$8 sps:$4 sm:$0xff]   ;;  %v2212_v46 = vld [vmem:[%s2733_s7 + $0x20] sm:$0xff]   ;;  %s2701_s20 = scalar_lea.vmem %s2736_s10, %s2144_s19 }
 0x33e   : > { %v1256_v22 = vadd.f32 %v1255_v50, %v1096_v48  ;;  %v1257_v51 = vpop.f32.mrb[69].mxu0  ;;  %v2211_v45 = vld [vmem:[%s2733_s7 + $0x18] sm:$0xff]   ;;  %v2216_v50 = vld [vmem:[%s2732_s6] sm:$0xff]  }
 0x33f   : > { %v1258_v53 = vadd.f32 %v1257_v51, %v1096_v48  ;;  %v1259_v54 = vpop.f32.mrb[70].mxu0  ;;  %1420 = vmatprep.subr.bf16.mxu1 %v1325_v49  ;;  %v2214_v48 = vld [vmem:[%s2733_s7 + $0x30] sm:$0xff]   ;;  %v2215_v49 = vld [vmem:[%s2733_s7 + $0x38] sm:$0xff]  }
 0x340   : > { %v1260_v56 = vadd.f32 %v1259_v54, %v1101_v52  ;;  %v1261_v58 = vpop.f32.mrb[71].mxu0  ;;  %1421 = vmatpush1.bf16.msra.mxu1 %v1324_v47  ;;  %v1304_v60 = vmax.f32 %v1256_v22, 0.0  ;;  %v2213_v47 = vld [vmem:[%s2733_s7 + $0x28] sm:$0xff]   ;;  %v2218_v51 = vld [vmem:[%s2732_s6 + $0x10] sm:$0xff]  }
 0x341   : > { %v1262_v59 = vadd.f32 %v1261_v58, %v1101_v52  ;;  %v1305_v62 = vmax.f32 %v1258_v53, 0.0  ;;  %v2217_v22 = vld [vmem:[%s2732_s6 + $0x8] sm:$0xff]   ;;  %v2219_v52 = vld [vmem:[%s2732_s6 + $0x18] sm:$0xff]   ;;  %v2220_v53 = vld [vmem:[%s2732_s6 + $0x20] sm:$0xff]  }
 0x342   : > { %v1306_v61 = vmax.f32 %v1260_v56, 0.0  ;;  %v2221_v54 = vld [vmem:[%s2732_s6 + $0x28] sm:$0xff]   ;;  %v2222_v56 = vld [vmem:[%s2732_s6 + $0x30] sm:$0xff]   ;;  %v2223_v58 = vld [vmem:[%s2732_s6 + $0x38] sm:$0xff]  }
 0x343   : > { %v1307_v23 = vmax.f32 %v1262_v59, 0.0 }
 0x344   : > { %v1326_v63 = vpack.c.bf16 %v1306_v61, %v1304_v60 }
 0x345   : > { %v1327_v2 = vpack.c.bf16 %v1307_v23, %v1305_v62  ;;  %v1265_v3 = vpop.f32.mrb[72].mxu0 }
 0x346   : > { %v1266_v4 = vadd.f32 %v1265_v3, %v1106_v1  ;;  %v1267_v5 = vpop.f32.mrb[73].mxu0 }
 0x347   : > { %v1268_v7 = vadd.f32 %v1267_v5, %v1106_v1  ;;  %v1269_v8 = vpop.f32.mrb[74].mxu0  ;;  %1422 = vmatprep.subr.bf16.mxu1 %v1327_v2 }
 0x348   : > { %v1270_v9 = vadd.f32 %v1269_v8, %v1111_v6  ;;  %v1271_v10 = vpop.f32.mrb[75].mxu0  ;;  %1423 = vmatpush1.bf16.msra.mxu1 %v1326_v63  ;;  %v1308_v12 = vmax.f32 %v1266_v4, 0.0 }
 0x349   : > { %v1272_v11 = vadd.f32 %v1271_v10, %v1111_v6  ;;  %v1309_v14 = vmax.f32 %v1268_v7, 0.0 }
 0x34a   : > { %v1310_v13 = vmax.f32 %v1270_v9, 0.0 }
 0x34b   : > { %v1311_v15 = vmax.f32 %v1272_v11, 0.0 }
 0x34c   : > { %v1328_v16 = vpack.c.bf16 %v1310_v13, %v1308_v12 }
 0x34d   : > { %v1329_v24 = vpack.c.bf16 %v1311_v15, %v1309_v14  ;;  %v1275_v18 = vpop.f32.mrb[76].mxu0 }
 0x34e   : > { %v1276_v19 = vadd.f32 %v1275_v18, %v1116_v17  ;;  %v1277_v20 = vpop.f32.mrb[77].mxu0 }
 0x34f   : > { %v1278_v28 = vadd.f32 %v1277_v20, %v1116_v17  ;;  %v1279_v25 = vpop.f32.mrb[78].mxu0  ;;  %1424 = vmatprep.subr.bf16.mxu1 %v1329_v24 }
 0x350   : > { %v1280_v57 = vadd.f32 %v1279_v25, %v1121_v26  ;;  %v1281_v55 = vpop.f32.mrb[79].mxu0  ;;  %1425 = vmatpush1.bf16.msra.mxu1 %v1328_v16  ;;  %v1312_v29 = vmax.f32 %v1276_v19, 0.0 }
 0x351   : > { %v1282_v27 = vadd.f32 %v1281_v55, %v1121_v26  ;;  %v1313_v31 = vmax.f32 %v1278_v28, 0.0 }
 0x352   : > { %v1314_v30 = vmax.f32 %v1280_v57, 0.0 }
 0x353   : > { %v1315_v32 = vmax.f32 %v1282_v27, 0.0 }
 0x354   : > { %v1330_v21 = vpack.c.bf16 %v1314_v30, %v1312_v29 }
 0x355   : > { %v1331_v33 = vpack.c.bf16 %v1315_v32, %v1313_v31 }
 0x357   : > { %1426 = vmatprep.subr.bf16.mxu1 %v1331_v33 }
 0x358   : > { %1427 = vmatpush1.bf16.msra.mxu1 %v1330_v21 }
 0x359   : > { %1589 = vmatprep.subr.bf16.mxu1 %v2228_v35 }
 0x35b   : > { %1445 = vmatmul.mubr.bf16.vlgmr.msra.gmra.mrb[16].mxu1 %v2208_v34 }
 0x35c   : > { %1590 = vmatpush1.bf16.msra.mxu1 %v2229_v36  ;;  %1454 = vmatprep.mubr.bf16.mxu1 %v2260_v0 }
 0x35d   : > { %1591 = vmatprep.subr.bf16.mxu1 %v2230_v37 }
 0x360   : > { %1592 = vmatpush1.bf16.msra.mxu1 %v2231_v39 }
 0x361   : > { %1593 = vmatprep.subr.bf16.mxu1 %v2232_v40 }
 0x363   : > { %1455 = vmatmul.mubr.bf16.gmra.mrb[20].mxu1 %v2209_v38 }
 0x364   : > { %1464 = vmatprep.mubr.bf16.mxu1 %v2260_v0  ;;  %1594 = vmatpush1.bf16.msra.mxu1 %v2233_v41 }
 0x365   : > { %1595 = vmatprep.subr.bf16.mxu1 %v2234_v42 }
 0x368   : > { %1596 = vmatpush1.bf16.msra.mxu1 %v2235_v44 }
 0x36b   : > { %1465 = vmatmul.mubr.bf16.gmra.mrb[24].mxu1 %v2210_v43 }
 0x36c   : > { %1474 = vmatprep.mubr.bf16.mxu1 %v2260_v0 }
 0x373   : > { %1475 = vmatmul.mubr.bf16.gmra.mrb[28].mxu1 %v2211_v45 }
 0x374   : > { %1484 = vmatprep.mubr.bf16.mxu1 %v2260_v0 }
 0x37b   : > { %1485 = vmatmul.mubr.bf16.gmra.mrb[32].mxu1 %v2212_v46 }
 0x37c   : > { %1494 = vmatprep.mubr.bf16.mxu1 %v2260_v0 }
 0x383   : > { %1495 = vmatmul.mubr.bf16.gmra.mrb[36].mxu1 %v2213_v47 }
 0x384   : > { %1504 = vmatprep.mubr.bf16.mxu1 %v2260_v0 }
 0x38b   : > { %1505 = vmatmul.mubr.bf16.gmra.mrb[40].mxu1 %v2214_v48 }
 0x38c   : > { %1514 = vmatprep.mubr.bf16.mxu1 %v2260_v0 }
 0x393   : > { %1515 = vmatmul.mubr.bf16.gmra.mrb[44].mxu1 %v2215_v49 }
 0x394   : > { %1621 = vmatprep.mubr.bf16.mxu1 %v2260_v0 }
 0x39b   : > { %2065 = vmatmul.mubr.msk.bf16.vlgmr.msra.gmra.mrb[16].mxu1 %vm504_vm0, %v2216_v50 }
 0x39c   : > { %1631 = vmatprep.mubr.bf16.mxu1 %v2260_v0 }
 0x3a3   : > { %2066 = vmatmul.mubr.msk.bf16.gmra.mrb[20].mxu1 %vm504_vm0, %v2217_v22 }
 0x3a4   : > { %1641 = vmatprep.mubr.bf16.mxu1 %v2260_v0 }
 0x3ab   : > { %2067 = vmatmul.mubr.msk.bf16.gmra.mrb[24].mxu1 %vm504_vm0, %v2218_v51 }
 0x3ac   : > { %1651 = vmatprep.mubr.bf16.mxu1 %v2260_v0 }
 0x3b3   : > { %2068 = vmatmul.mubr.msk.bf16.gmra.mrb[28].mxu1 %vm504_vm0, %v2219_v52 }
 0x3b4   : > { %1661 = vmatprep.mubr.bf16.mxu1 %v2260_v0 }
 0x3bb   : > { %2069 = vmatmul.mubr.msk.bf16.gmra.mrb[32].mxu1 %vm504_vm0, %v2220_v53 }
 0x3bc   : > { %1671 = vmatprep.mubr.bf16.mxu1 %v2260_v0 }
 0x3c3   : > { %2070 = vmatmul.mubr.msk.bf16.gmra.mrb[36].mxu1 %vm504_vm0, %v2221_v54 }
 0x3c4   : > { %1681 = vmatprep.mubr.bf16.mxu1 %v2260_v0 }
 0x3cb   : > { %2071 = vmatmul.mubr.msk.bf16.gmra.mrb[40].mxu1 %vm504_vm0, %v2222_v56 }
 0x3cc   : > { %1691 = vmatprep.mubr.bf16.mxu1 %v2260_v0 }
 0x3d3   : > { %2072 = vmatmul.mubr.msk.bf16.gmra.mrb[44].mxu1 %vm504_vm0, %v2223_v58 }
 0x3d4   : > { %1891 = vmatprep.mubr.bf16.mxu1 %v2260_v0 }
 0x46e   : > { %v1623_v59 = vpop.f32.mrb[16].mxu1 }
 0x46f   : > { %v1625_v60 = vpop.f32.mrb[17].mxu1  ;;  %v1702_v62 = vmax.f32 %v1623_v59, 0.0 }
 0x470   : > { %v1627_v61 = vpop.f32.mrb[18].mxu1  ;;  %v1703_v1 = vmax.f32 %v1625_v60, 0.0 }
 0x471   : > { %v1704_v23 = vmax.f32 %v1627_v61, 0.0  ;;  %v1629_v63 = vpop.f32.mrb[19].mxu1 }
 0x472   : > { %v1705_v2 = vmax.f32 %v1629_v63, 0.0 }
 0x473   : > { %v1734_v3 = vpack.c.bf16 %v1704_v23, %v1702_v62 }
 0x474   : > { %v1735_v4 = vpack.c.bf16 %v1705_v2, %v1703_v1 }
 0x476   : > { %v1633_v5 = vpop.f32.mrb[20].mxu1  ;;  %1829 = vmatprep.subr.bf16.mxu0 %v1735_v4  ;;  %2096 = vmatprep.subr.bf16.mxu1 %v1735_v4 }
 0x477   : > { %v1635_v6 = vpop.f32.mrb[21].mxu1  ;;  %1830 = vmatpush1.bf16.msra.mxu0 %v1734_v3  ;;  %2104 = vmatpush1.bf16.msra.mxu1 %v1734_v3  ;;  %v1706_v8 = vmax.f32 %v1633_v5, 0.0 }
 0x478   : > { %v1637_v7 = vpop.f32.mrb[22].mxu1  ;;  %v1707_v11 = vmax.f32 %v1635_v6, 0.0 }
 0x479   : > { %v1708_v9 = vmax.f32 %v1637_v7, 0.0  ;;  %v1639_v10 = vpop.f32.mrb[23].mxu1 }
 0x47a   : > { %v1709_v12 = vmax.f32 %v1639_v10, 0.0 }
 0x47b   : > { %v1736_v13 = vpack.c.bf16 %v1708_v9, %v1706_v8 }
 0x47c   : > { %v1737_v14 = vpack.c.bf16 %v1709_v12, %v1707_v11  ;;  %v2224_v12 = vld [vmem:[%s2734_s8] sm:$0xff]  }
 0x47e   : > { %v1643_v15 = vpop.f32.mrb[24].mxu1  ;;  %1831 = vmatprep.subr.bf16.mxu0 %v1737_v14  ;;  %2097 = vmatprep.subr.bf16.mxu1 %v1737_v14  ;;  %v2226_v14 = vld [vmem:[%s2734_s8 + $0x8] sm:$0xff]  }
 0x47f   : > { %v1645_v16 = vpop.f32.mrb[25].mxu1  ;;  %1832 = vmatpush1.bf16.msra.mxu0 %v1736_v13  ;;  %2105 = vmatpush1.bf16.msra.mxu1 %v1736_v13  ;;  %v1710_v24 = vmax.f32 %v1643_v15, 0.0  ;;  %v2225_v13 = vld [vmem:[%s2734_s8 + $0x18] sm:$0xff]   ;;  %v2227_v15 = vld [vmem:[%s2734_s8 + $0x10] sm:$0xff]  }
 0x480   : > { %v1647_v17 = vpop.f32.mrb[26].mxu1  ;;  %v1711_v20 = vmax.f32 %v1645_v16, 0.0  ;;  %v1769_v16 = vpop.permute.xlu0 %1768 }
 0x481   : > { %v1712_v18 = vmax.f32 %v1647_v17, 0.0  ;;  %v1649_v19 = vpop.f32.mrb[27].mxu1 }
 0x482   : > { %v1713_v26 = vmax.f32 %v1649_v19, 0.0 }
 0x483   : > { %v1738_v28 = vpack.c.bf16 %v1712_v18, %v1710_v24  ;;  %v1774_v18 = vpop.permute.xlu1 %1773 }
 0x484   : > { %v1739_v25 = vpack.c.bf16 %v1713_v26, %v1711_v20  ;;  %v1779_v17 = vpop.permute.xlu0 %1778 }
 0x486   : > { %v1653_v57 = vpop.f32.mrb[28].mxu1  ;;  %1833 = vmatprep.subr.bf16.mxu0 %v1739_v25  ;;  %2098 = vmatprep.subr.bf16.mxu1 %v1739_v25 }
 0x487   : > { %v1655_v55 = vpop.f32.mrb[29].mxu1  ;;  %1834 = vmatpush1.bf16.msra.mxu0 %v1738_v28  ;;  %2106 = vmatpush1.bf16.msra.mxu1 %v1738_v28  ;;  %v1714_v29 = vmax.f32 %v1653_v57, 0.0 }
 0x488   : > { %v1657_v27 = vpop.f32.mrb[30].mxu1  ;;  %v1715_v32 = vmax.f32 %v1655_v55, 0.0  ;;  %v1789_v24 = vpop.permute.xlu0 %1788 }
 0x489   : > { %v1716_v30 = vmax.f32 %v1657_v27, 0.0  ;;  %v1659_v31 = vpop.f32.mrb[31].mxu1 }
 0x48a   : > { %v1717_v21 = vmax.f32 %v1659_v31, 0.0 }
 0x48b   : > { %v1740_v33 = vpack.c.bf16 %v1716_v30, %v1714_v29 }
 0x48c   : > { %v1741_v34 = vpack.c.bf16 %v1717_v21, %v1715_v32  ;;  %v1799_v19 = vpop.permute.xlu0 %1798 }
 0x48e   : > { %v1663_v35 = vpop.f32.mrb[32].mxu1  ;;  %1835 = vmatprep.subr.bf16.mxu0 %v1741_v34  ;;  %2099 = vmatprep.subr.bf16.mxu1 %v1741_v34 }
 0x48f   : > { %v1665_v36 = vpop.f32.mrb[33].mxu1  ;;  %1836 = vmatpush1.bf16.msra.mxu0 %v1740_v33  ;;  %2107 = vmatpush1.bf16.msra.mxu1 %v1740_v33  ;;  %v1718_v38 = vmax.f32 %v1663_v35, 0.0 }
 0x490   : > { %v1667_v37 = vpop.f32.mrb[34].mxu1  ;;  %v1719_v41 = vmax.f32 %v1665_v36, 0.0 }
 0x491   : > { %v1720_v39 = vmax.f32 %v1667_v37, 0.0  ;;  %v1669_v40 = vpop.f32.mrb[35].mxu1  ;;  %v1784_v37 = vpop.permute.xlu1 %1783 }
 0x492   : > { %v1721_v42 = vmax.f32 %v1669_v40, 0.0 }
 0x493   : > { %v1742_v43 = vpack.c.bf16 %v1720_v39, %v1718_v38 }
 0x494   : > { %v1743_v44 = vpack.c.bf16 %v1721_v42, %v1719_v41 }
 0x496   : > { %v1673_v45 = vpop.f32.mrb[36].mxu1  ;;  %1837 = vmatprep.subr.bf16.mxu0 %v1743_v44  ;;  %2100 = vmatprep.subr.bf16.mxu1 %v1743_v44 }
 0x497   : > { %v1675_v46 = vpop.f32.mrb[37].mxu1  ;;  %1838 = vmatpush1.bf16.msra.mxu0 %v1742_v43  ;;  %2108 = vmatpush1.bf16.msra.mxu1 %v1742_v43  ;;  %v1722_v48 = vmax.f32 %v1673_v45, 0.0 }
 0x498   : > { %v1677_v47 = vpop.f32.mrb[38].mxu1  ;;  %v1723_v22 = vmax.f32 %v1675_v46, 0.0  ;;  %v1794_v46 = vpop.permute.xlu1 %1793 }
 0x499   : > { %v1724_v49 = vmax.f32 %v1677_v47, 0.0  ;;  %v1679_v50 = vpop.f32.mrb[39].mxu1 }
 0x49a   : > { %v1725_v51 = vmax.f32 %v1679_v50, 0.0 }
 0x49b   : > { %v1744_v52 = vpack.c.bf16 %v1724_v49, %v1722_v48 }
 0x49c   : > { %v1745_v53 = vpack.c.bf16 %v1725_v51, %v1723_v22 }
 0x49e   : > { %v1683_v54 = vpop.f32.mrb[40].mxu1  ;;  %1839 = vmatprep.subr.bf16.mxu0 %v1745_v53  ;;  %2101 = vmatprep.subr.bf16.mxu1 %v1745_v53 }
 0x49f   : > { %v1685_v56 = vpop.f32.mrb[41].mxu1  ;;  %1840 = vmatpush1.bf16.msra.mxu0 %v1744_v52  ;;  %2109 = vmatpush1.bf16.msra.mxu1 %v1744_v52  ;;  %v1726_v59 = vmax.f32 %v1683_v54, 0.0 }
 0x4a0   : > { %v1687_v58 = vpop.f32.mrb[42].mxu1  ;;  %v1727_v62 = vmax.f32 %v1685_v56, 0.0 }
 0x4a1   : > { %v1728_v60 = vmax.f32 %v1687_v58, 0.0  ;;  %v1689_v61 = vpop.f32.mrb[43].mxu1 }
 0x4a2   : > { %v1729_v23 = vmax.f32 %v1689_v61, 0.0 }
 0x4a3   : > { %v1746_v63 = vpack.c.bf16 %v1728_v60, %v1726_v59 }
 0x4a4   : > { %v1747_v1 = vpack.c.bf16 %v1729_v23, %v1727_v62 }
 0x4a6   : > { %v1693_v2 = vpop.f32.mrb[44].mxu1  ;;  %1841 = vmatprep.subr.bf16.mxu0 %v1747_v1  ;;  %2102 = vmatprep.subr.bf16.mxu1 %v1747_v1 }
 0x4a7   : > { %v1695_v3 = vpop.f32.mrb[45].mxu1  ;;  %1842 = vmatpush1.bf16.msra.mxu0 %v1746_v63  ;;  %2110 = vmatpush1.bf16.msra.mxu1 %v1746_v63  ;;  %v1730_v5 = vmax.f32 %v1693_v2, 0.0 }
 0x4a8   : > { %v1697_v4 = vpop.f32.mrb[46].mxu1  ;;  %v1731_v8 = vmax.f32 %v1695_v3, 0.0 }
 0x4a9   : > { %v1732_v6 = vmax.f32 %v1697_v4, 0.0  ;;  %v1699_v7 = vpop.f32.mrb[47].mxu1 }
 0x4aa   : > { %v1733_v9 = vmax.f32 %v1699_v7, 0.0 }
 0x4ab   : > { %v1748_v10 = vpack.c.bf16 %v1732_v6, %v1730_v5 }
 0x4ac   : > { %v1749_v11 = vpack.c.bf16 %v1733_v9, %v1731_v8 }
 0x4ae   : > { %1843 = vmatprep.subr.bf16.mxu0 %v1749_v11  ;;  %2103 = vmatprep.subr.bf16.mxu1 %v1749_v11 }
 0x4af   : > { %1844 = vmatpush1.bf16.msra.mxu0 %v1748_v10  ;;  %2111 = vmatpush1.bf16.msra.mxu1 %v1748_v10 }
 0x4b2   : > { %1862 = vmatmul.mubr.bf16.vlgmr.msra.gmra.mrb[80].mxu0 %v2224_v12  ;;  %1892 = vmatmul.mubr.bf16.vlgmr.msra.gmra.mrb[48].mxu1 %v2225_v13 }
 0x4b3   : > { %1871 = vmatprep.mubr.bf16.mxu0 %v2260_v0 }
 0x4ba   : > { %1872 = vmatmul.mubr.bf16.gmra.mrb[84].mxu0 %v2226_v14 }
 0x4bb   : > { %1881 = vmatprep.mubr.bf16.mxu0 %v2260_v0 }
 0x4c2   : > { %1882 = vmatmul.mubr.bf16.gmra.mrb[88].mxu0 %v2227_v15 }
 0x585   : > { %v1863_v0 = vpop.f32.mrb[80].mxu0  ;;  %v1893_v20 = vpop.f32.mrb[48].mxu1 }
 0x586   : > { %v1864_v26 = vadd.f32 %v1863_v0, %v1769_v16  ;;  %v1894_v28 = vadd.f32 %v1893_v20, %v1799_v19  ;;  %v1865_v25 = vpop.f32.mrb[81].mxu0  ;;  %v1895_v57 = vpop.f32.mrb[49].mxu1 }
 0x587   : > { %v1866_v55 = vadd.f32 %v1865_v25, %v1769_v16  ;;  %v1896_v27 = vadd.f32 %v1895_v57, %v1799_v19  ;;  %v1867_v29 = vpop.f32.mrb[82].mxu0  ;;  %v1897_v30 = vpop.f32.mrb[50].mxu1 }
 0x588   : > { %1900 = vst [vmem:[%s2701_s20] sm:$0xff] %v1864_v26  ;;  %1912 = vst [vmem:[%s2701_s20 + $0x60] sm:$0x7f] %v1894_v28  ;;  %v1868_v31 = vadd.f32 %v1867_v29, %v1774_v18  ;;  %v1869_v32 = vpop.f32.mrb[83].mxu0  ;;  %v1898_v21 = vpop.f32.mrb[51].mxu1 }
 0x589   : > { %1901 = vst [vmem:[%s2701_s20 + $0x8] sm:$0xff] %v1866_v55  ;;  %1913 = vst [vmem:[%s2701_s20 + $0x68] sm:$0x7f] %v1896_v27  ;;  %v1870_v33 = vadd.f32 %v1869_v32, %v1774_v18 }
 0x58a   : > { %1902 = vst [vmem:[%s2701_s20 + $0x10] sm:$0xff] %v1868_v31 }
 0x58b   : > { %1903 = vst [vmem:[%s2701_s20 + $0x18] sm:$0xff] %v1870_v33 }
 0x58d   : > { %v1873_v34 = vpop.f32.mrb[84].mxu0 }
 0x58e   : > { %v1874_v35 = vadd.f32 %v1873_v34, %v1779_v17  ;;  %v1875_v36 = vpop.f32.mrb[85].mxu0 }
 0x58f   : > { %v1876_v38 = vadd.f32 %v1875_v36, %v1779_v17  ;;  %v1877_v39 = vpop.f32.mrb[86].mxu0 }
 0x590   : > { %1904 = vst [vmem:[%s2701_s20 + $0x20] sm:$0xff] %v1874_v35  ;;  %v1878_v40 = vadd.f32 %v1877_v39, %v1784_v37  ;;  %v1879_v41 = vpop.f32.mrb[87].mxu0 }
 0x591   : > { %1905 = vst [vmem:[%s2701_s20 + $0x28] sm:$0xff] %v1876_v38  ;;  %v1880_v42 = vadd.f32 %v1879_v41, %v1784_v37 }
 0x592   : > { %1906 = vst [vmem:[%s2701_s20 + $0x30] sm:$0xff] %v1878_v40 }
 0x593   : > { %1907 = vst [vmem:[%s2701_s20 + $0x38] sm:$0xff] %v1880_v42 }
 0x595   : > { %v1883_v43 = vpop.f32.mrb[88].mxu0 }
 0x596   : > { %v1884_v44 = vadd.f32 %v1883_v43, %v1789_v24  ;;  %v1885_v45 = vpop.f32.mrb[89].mxu0 }
 0x597   : > { %v1886_v47 = vadd.f32 %v1885_v45, %v1789_v24  ;;  %v1887_v48 = vpop.f32.mrb[90].mxu0 }
 0x598   : > { %1908 = vst [vmem:[%s2701_s20 + $0x40] sm:$0xff] %v1884_v44  ;;  %v1888_v49 = vadd.f32 %v1887_v48, %v1794_v46  ;;  %v1889_v50 = vpop.f32.mrb[91].mxu0 }
 0x599   : > { %1909 = vst [vmem:[%s2701_s20 + $0x48] sm:$0xff] %v1886_v47  ;;  %v1890_v22 = vadd.f32 %v1889_v50, %v1794_v46 }
 0x59a   : > { %1910 = vst [vmem:[%s2701_s20 + $0x50] sm:$0xff] %v1888_v49 }
 0x59b   : > { %1911 = vst [vmem:[%s2701_s20 + $0x58] sm:$0xff] %v1890_v22 }
 0x59c PF: > { %s20_s15 = sadd.s32 1, %s2258_s15   ;;  %s2737_s13 = smov %s2254_s14 }
 0x59d   : > { %p17_p5 = scmp.ge.s32.totalorder %s20_s15, 4   ;;  %s2738_s14 = smov %s2740_s16 }
 0x59f   :  { %19 = sbr.rel (!%p17_p5) target bundleno = 2 (0x2), region = 90 }

</bundles_post_ra>
